<compile_context>
chip_gen: v6e
topology: v6e:2x2x1
jax: 0.10.0
libtpu: 0.0.40
codegen_flags: <defaults>
</compile_context>

<pallas_src>
import functools

import jax
import jax.numpy as jnp
from jax.experimental import pallas as pl
from jax.experimental.pallas import tpu as pltpu

H = 1024   # hidden size fixed by the module (Linear in_features=1024)
NC = 128   # fused head width: [start(2) | end(2) | span1(1) | span2(1) | zero pad]


# --------------------------------------------------------------------------- #
# kernels
# --------------------------------------------------------------------------- #
def _softmax_last(z):
    """Numerically stable softmax over the last axis; reciprocal goes to the EUP."""
    m = jnp.max(z, axis=-1, keepdims=True)
    e = jnp.exp(z - m)
    return e * pl.reciprocal(jnp.sum(e, axis=-1, keepdims=True), approx=True)


def _proj_kernel(x_ref, wenc_ref, benc_ref, wh_ref, bh_ref,
                 se_ref, s1_ref, s2_ref):
    """Projection kernel, grid = (batch, S // chunk).

    Per row chunk: h = tanh(x @ Wenc + benc) (Dropout is identity at inference),
    then ONE lane-dense fused head matmul (cols 0:2 start, 2:4 end, 4 span1,
    5 span2, rest zero pad).  bf16 MXU inputs, f32 accumulation.
    """
    x = x_ref[0]                                                     # (C, H) bf16
    h = jnp.tanh(
        jnp.dot(x, wenc_ref[...], preferred_element_type=jnp.float32)
        + benc_ref[...])                                             # (C, H) f32

    heads = (jnp.dot(h.astype(jnp.bfloat16), wh_ref[...],
                     preferred_element_type=jnp.float32)
             + bh_ref[...])                                          # (C, NC) f32

    # start / end probabilities -> fused (C, 4) block.  The 2-lane softmax and
    # 4-lane store happen once per chunk and are negligible next to the matmuls,
    # so the simple known-good form is kept (no lane-dense (B,4,S) transpose).
    se_ref[0, :, 0:2] = _softmax_last(heads[:, 0:2])
    se_ref[0, :, 2:4] = _softmax_last(heads[:, 2:4])

    # span logit pieces, staged to HBM as tiny f32 columns
    s1_ref[0] = heads[:, 4:5]                                        # (C, 1)
    s2_ref[0] = heads[:, 5:6]                                        # (C, 1)


def _span_kernel(s1_ref, s2_ref, mask_ref, span_ref, *, tail_dtype):
    """Span-plane kernel, grid = (batch, S // row_tile); no scratch carry, so
    both grid axes are 'parallel' (v7x megacore shares row tiles even at B=1).

    span_logits[i, j] = span1[i] + span2[j]; masked_fill(mask == 0, -1e30);
    softmax over j.  Tail runs in bf16 on v6e/v7x, f32 on v5e/older.
    """
    s1 = s1_ref[0].astype(tail_dtype)                                # (T, 1)
    s2 = s2_ref[0].astype(tail_dtype)                                # (1, S)
    logits = s1 + s2                                                 # (T, S)

    # masked_fill_(span_mask == 0, -1e30); int8 compared directly (no widen)
    logits = jnp.where(mask_ref[0] == 0,
                       jnp.asarray(-1e30, dtype=tail_dtype), logits)

    m = jnp.max(logits, axis=-1, keepdims=True)
    e = jnp.exp(logits - m)
    denom = jnp.sum(e, axis=-1, keepdims=True)
    inv = pl.reciprocal(denom.astype(jnp.float32), approx=True).astype(tail_dtype)
    span_ref[0] = (e * inv).astype(span_ref.dtype)


# --------------------------------------------------------------------------- #
# wrapper
# --------------------------------------------------------------------------- #
def _device_kind():
    try:
        return jax.devices()[0].device_kind.lower()
    except Exception:
        return ""


def _vmem_limit_bytes():
    """Generation-aware scoped-VMEM budget; 48 MiB fallback is v7x-safe."""
    try:
        cap = int(pltpu.get_tpu_info().vmem_capacity_bytes)
        return max(32 << 20, min((cap * 3) // 4, 96 << 20))
    except Exception:
        return 48 << 20


def _pick_tile(size, max_tile):
    if size <= max_tile:
        return size
    for t in (512, 256, 128, 64, 32, 16, 8):
        if t <= max_tile and size % t == 0:
            return t
    return size


def mymodel_heads(encoder_rep, span_mask, params, *,
                  chunk=None, row_tile=None, span_tail_dtype=None):
    """Inference branch of MyModel.forward (labels=None): returns
    (start_prob_seq, end_prob_seq, span_prob).

    span_prob is returned in bfloat16 (it is the dominant HBM write stream);
    upcast downstream if f32 probabilities are required."""
    B, S, hid = encoder_rep.shape
    assert hid == H
    wenc, benc, wst, bst, wen, ben, w1, w2 = params

    kind = _device_kind()
    is_v7 = "v7" in kind
    if span_tail_dtype is None:
        # bf16 VPU/EUP exist on v6e/v7x; keep f32 on v5e and older / unknown.
        span_tail_dtype = jnp.bfloat16 if ("v6" in kind or is_v7) else jnp.float32

    if chunk is None:
        chunk = _pick_tile(S, 512)
    if row_tile is None:
        row_tile = _pick_tile(S, 256 if is_v7 else 512)
    assert S % chunk == 0, "seq_len must be divisible by chunk"
    assert S % row_tile == 0, "seq_len must be divisible by row_tile"
    n_chunk = S // chunk
    n_rt = S // row_tile
    vmem_limit = _vmem_limit_bytes()

    # ---- one-time (cheap) parameter packing + dtype prep ----------------------
    w_heads = jnp.zeros((H, NC), jnp.float32)
    w_heads = w_heads.at[:, 0:2].set(wst).at[:, 2:4].set(wen)
    w_heads = w_heads.at[:, 4:5].set(w1).at[:, 5:6].set(w2)
    b_heads = jnp.zeros((1, NC), jnp.float32)
    b_heads = b_heads.at[:, 0:2].set(bst).at[:, 2:4].set(ben)

    wenc_bf = wenc.astype(jnp.bfloat16)
    w_heads_bf = w_heads.astype(jnp.bfloat16)
    # bf16 activations: halves the per-step input DMA and its VMEM block
    x_bf = encoder_rep.astype(jnp.bfloat16)

    # validity mask as int8: 4x less HBM/VMEM traffic than a float32 mask.
    # TODO(synk): if span_mask is structurally derivable (upper triangular /
    # per-example lengths), build it in-kernel from iota + scalar prefetch and
    # drop this (B,S,S) HBM read entirely.
    if span_mask.dtype == jnp.int8:
        mask_i8 = span_mask
    else:
        mask_i8 = (span_mask != 0).astype(jnp.int8)

    # weights/biases: constant index_map -> DMA'd once; single-buffered
    def const_spec(shape):
        return pl.BlockSpec(shape, lambda b, c: (0,) * len(shape),
                            pipeline_mode=pl.Buffered(1))

    # ---- kernel 1: projection + fused heads -----------------------------------
    proj_grid = pltpu.PrefetchScalarGridSpec(
        num_scalar_prefetch=0,
        grid=(B, n_chunk),
        in_specs=[
            pl.BlockSpec((1, chunk, H), lambda b, c: (b, c, 0)),     # x (bf16)
            const_spec((H, H)),                                      # Wenc (bf16)
            const_spec((1, H)),                                      # benc (f32)
            const_spec((H, NC)),                                     # fused head W (bf16)
            const_spec((1, NC)),                                     # fused head b (f32)
        ],
        out_specs=[
            pl.BlockSpec((1, chunk, 4), lambda b, c: (b, c, 0)),     # [start|end] probs
            pl.BlockSpec((1, chunk, 1), lambda b, c: (b, c, 0)),     # span1 logits
            pl.BlockSpec((1, chunk, 1), lambda b, c: (b, c, 0)),     # span2 logits
        ],
    )
    proj_cost = pl.CostEstimate(
        flops=2 * B * S * H * (H + NC),
        transcendentals=B * S * (H + 4),
        bytes_accessed=(B * S * H * 2 + H * H * 2 + H * NC * 2 + (H + NC) * 4
                        + B * S * (4 + 1 + 1) * 4),
    )
    se, span1, span2 = pl.pallas_call(
        _proj_kernel,
        grid_spec=proj_grid,
        out_shape=(
            jax.ShapeDtypeStruct((B, S, 4), jnp.float32),
            jax.ShapeDtypeStruct((B, S, 1), jnp.float32),
            jax.ShapeDtypeStruct((B, S, 1), jnp.float32),
        ),
        compiler_params=pltpu.CompilerParams(
            dimension_semantics=("parallel", "parallel"),
            vmem_limit_bytes=vmem_limit,
        ),
        cost_estimate=proj_cost,
    )(x_bf, wenc_bf, benc, w_heads_bf, b_heads)

    # span2 as a lane-dense row per batch for the broadcast add in kernel 2
    span2_row = span2.reshape(B, 1, S)

    # ---- kernel 2: span plane (broadcast add + mask + softmax) -----------------
    span_grid = pltpu.PrefetchScalarGridSpec(
        num_scalar_prefetch=0,
        grid=(B, n_rt),
        in_specs=[
            pl.BlockSpec((1, row_tile, 1), lambda b, r: (b, r, 0)),  # span1 column
            pl.BlockSpec((1, 1, S), lambda b, r: (b, 0, 0)),         # span2 row
            pl.BlockSpec((1, row_tile, S), lambda b, r: (b, r, 0)),  # mask (int8)
        ],
        out_specs=pl.BlockSpec((1, row_tile, S), lambda b, r: (b, r, 0)),
    )
    span_cost = pl.CostEstimate(
        flops=4 * B * S * S,
        transcendentals=B * S * S,
        bytes_accessed=B * S * S * (1 + 2) + B * S * 8,
    )
    span = pl.pallas_call(
        functools.partial(_span_kernel, tail_dtype=span_tail_dtype),
        grid_spec=span_grid,
        out_shape=jax.ShapeDtypeStruct((B, S, S), jnp.bfloat16),
        compiler_params=pltpu.CompilerParams(
            dimension_semantics=("parallel", "parallel"),
            vmem_limit_bytes=vmem_limit,
        ),
        cost_estimate=span_cost,
    )(span1, span2_row, mask_i8)

    start_prob = se[..., 0:2]
    end_prob = se[..., 2:4]
    return start_prob, end_prob, span


# --------------------------------------------------------------------------- #
# pure-JAX reference + test
# --------------------------------------------------------------------------- #
def _reference(encoder_rep, span_mask, params):
    wenc, benc, wst, bst, wen, ben, w1, w2 = params
    h = jnp.tanh(encoder_rep @ wenc + benc)
    start_logits = h @ wst + bst
    end_logits = h @ wen + ben
    span1 = h @ w1                       # (B, S, 1)
    span2 = (h @ w2)[..., 0]             # (B, S)
    span_logits = span1 + span2[:, None, :]
    span_logits = jnp.where(span_mask == 0, -1e30, span_logits)
    return (jax.nn.softmax(start_logits, -1),
            jax.nn.softmax(end_logits, -1),
            jax.nn.softmax(span_logits, -1))


if __name__ == "__main__":
    B, S = 2, 64
    CHUNK = 32   # 2 projection chunks per batch -> exercises the chunked grid
    TS = 32      # 2 span row tiles per batch
    key = jax.random.PRNGKey(0)
    ks = jax.random.split(key, 10)

    # TODO(synk): the pretrained RoBERTa/BERT encoder (BertModel.from_pretrained)
    # is not reproducible in-script; its sequence output is substituted with a
    # deterministic random tensor fed to the head kernels.
    encoder_rep = jax.random.normal(ks[0], (B, S, H), jnp.float32) * 0.5

    # valid-span mask (int8): only j >= i positions are kept
    span_mask = jnp.broadcast_to(jnp.triu(jnp.ones((S, S), jnp.int8)), (B, S, S))

    scale = 0.02
    params = (
        jax.random.normal(ks[1], (H, H), jnp.float32) * scale,   # encoder_linear W
        jax.random.normal(ks[2], (1, H), jnp.float32) * scale,   # encoder_linear b
        jax.random.normal(ks[3], (H, 2), jnp.float32) * scale,   # start W
        jax.random.normal(ks[4], (1, 2), jnp.float32) * scale,   # start b
        jax.random.normal(ks[5], (H, 2), jnp.float32) * scale,   # end W
        jax.random.normal(ks[6], (1, 2), jnp.float32) * scale,   # end b
        jax.random.normal(ks[7], (H, 1), jnp.float32) * scale,   # span1 w (no bias)
        jax.random.normal(ks[8], (H, 1), jnp.float32) * scale,   # span2 w (no bias)
    )

    start_prob, end_prob, span_prob = jax.block_until_ready(
        mymodel_heads(encoder_rep, span_mask, params, chunk=CHUNK, row_tile=TS)
    )

    ref_start, ref_end, ref_span = _reference(encoder_rep, span_mask, params)
    # bf16 MXU inputs + bf16 span output/tail + approx reciprocal -> relaxed tol
    assert jnp.allclose(start_prob, ref_start, atol=2e-2)
    assert jnp.allclose(end_prob, ref_end, atol=2e-2)
    assert jnp.allclose(span_prob.astype(jnp.float32), ref_span, atol=2e-2)

    print("KERNEL_OK")
</pallas_src>

<mosaic_0001>
module attributes {stable_mosaic.version = 11 : i64} {
  func.func @_proj_kernel(%arg0: i32, %arg1: i32, %arg2: memref<1x32x1024xbf16, #tpu.memory_space<vmem>>, %arg3: memref<1024x1024xbf16, #tpu.memory_space<vmem>>, %arg4: memref<1x1024xf32, #tpu.memory_space<vmem>>, %arg5: memref<1024x128xbf16, #tpu.memory_space<vmem>>, %arg6: memref<1x128xf32, #tpu.memory_space<vmem>>, %arg7: memref<1x32x4xf32, #tpu.memory_space<vmem>>, %arg8: memref<1x32x1xf32, #tpu.memory_space<vmem>>, %arg9: memref<1x32x1xf32, #tpu.memory_space<vmem>>) attributes {dimension_semantics = [#tpu.dimension_semantics<parallel>, #tpu.dimension_semantics<parallel>], iteration_bounds = array<i64: 2, 2>, scalar_prefetch = 0 : i64, scratch_operands = 0 : i64, tpu.core_type = #tpu.core_type<tc>, window_params = [{transform_indices = @transform_0, window_bounds = array<i64: 1, 32, 1024>}, {pipeline_mode = #tpu.pipeline_mode<synchronous>, transform_indices = @transform_1, window_bounds = array<i64: 1024, 1024>}, {pipeline_mode = #tpu.pipeline_mode<synchronous>, transform_indices = @transform_2, window_bounds = array<i64: 1, 1024>}, {pipeline_mode = #tpu.pipeline_mode<synchronous>, transform_indices = @transform_3, window_bounds = array<i64: 1024, 128>}, {pipeline_mode = #tpu.pipeline_mode<synchronous>, transform_indices = @transform_4, window_bounds = array<i64: 1, 128>}, {transform_indices = @transform_5, window_bounds = array<i64: 1, 32, 4>}, {transform_indices = @transform_6, window_bounds = array<i64: 1, 32, 1>}, {transform_indices = @transform_7, window_bounds = array<i64: 1, 32, 1>}]} {
    %c0 = arith.constant 0 : index
    %c0_0 = arith.constant 0 : index
    %c0_1 = arith.constant 0 : index
    %0 = vector.load %arg2[%c0, %c0_0, %c0_1] : memref<1x32x1024xbf16, #tpu.memory_space<vmem>>, vector<1x32x1024xbf16>
    %1 = vector.shape_cast %0 : vector<1x32x1024xbf16> to vector<32x1024xbf16>
    %c0_2 = arith.constant 0 : index
    %c0_3 = arith.constant 0 : index
    %2 = vector.load %arg3[%c0_2, %c0_3] : memref<1024x1024xbf16, #tpu.memory_space<vmem>>, vector<1024x1024xbf16>
    %cst = arith.constant dense<0.000000e+00> : vector<32x1024xf32>
    %3 = tpu.matmul %1, %2, %cst {dimension_numbers = #tpu.dot_dimension_numbers<[1], [0], [0], [1], [0, 0, 1, 1], [], []>} : vector<32x1024xbf16>, vector<1024x1024xbf16>, vector<32x1024xf32> -> vector<32x1024xf32>
    %c0_4 = arith.constant 0 : index
    %c0_5 = arith.constant 0 : index
    %4 = vector.load %arg4[%c0_4, %c0_5] : memref<1x1024xf32, #tpu.memory_space<vmem>>, vector<1x1024xf32>
    %5 = vector.broadcast %4 : vector<1x1024xf32> to vector<32x1024xf32>
    %6 = arith.addf %3, %5 : vector<32x1024xf32>
    %7 = math.tanh %6 : vector<32x1024xf32>
    %8 = arith.truncf %7 : vector<32x1024xf32> to vector<32x1024xbf16>
    %c0_6 = arith.constant 0 : index
    %c0_7 = arith.constant 0 : index
    %9 = vector.load %arg5[%c0_6, %c0_7] : memref<1024x128xbf16, #tpu.memory_space<vmem>>, vector<1024x128xbf16>
    %cst_8 = arith.constant dense<0.000000e+00> : vector<32x128xf32>
    %10 = tpu.matmul %8, %9, %cst_8 {dimension_numbers = #tpu.dot_dimension_numbers<[1], [0], [0], [1], [0, 0, 1, 1], [], []>} : vector<32x1024xbf16>, vector<1024x128xbf16>, vector<32x128xf32> -> vector<32x128xf32>
    %c0_9 = arith.constant 0 : index
    %c0_10 = arith.constant 0 : index
    %11 = vector.load %arg6[%c0_9, %c0_10] : memref<1x128xf32, #tpu.memory_space<vmem>>, vector<1x128xf32>
    %12 = vector.broadcast %11 : vector<1x128xf32> to vector<32x128xf32>
    %13 = arith.addf %10, %12 : vector<32x128xf32>
    %14 = vector.extract_strided_slice %13 {offsets = [0, 0], sizes = [32, 2], strides = [1, 1]} : vector<32x128xf32> to vector<32x2xf32>
    %cst_11 = arith.constant dense<0xFF800000> : vector<32xf32>
    %15 = vector.multi_reduction <maximumf>, %14, %cst_11 [1] : vector<32x2xf32> to vector<32xf32>
    %16 = vector.shape_cast %15 : vector<32xf32> to vector<32x1xf32>
    %17 = vector.broadcast %16 : vector<32x1xf32> to vector<32x2xf32>
    %18 = arith.subf %14, %17 : vector<32x2xf32>
    %19 = math.exp %18 : vector<32x2xf32>
    %cst_12 = arith.constant dense<0.000000e+00> : vector<32xf32>
    %20 = vector.multi_reduction <add>, %19, %cst_12 [1] : vector<32x2xf32> to vector<32xf32>
    %21 = vector.shape_cast %20 : vector<32xf32> to vector<32x1xf32>
    %22 = tpu.reciprocal %21 {approx = true} : vector<32x1xf32> -> vector<32x1xf32>
    %23 = vector.broadcast %22 : vector<32x1xf32> to vector<32x2xf32>
    %24 = arith.mulf %19, %23 : vector<32x2xf32>
    %c0_13 = arith.constant 0 : index
    %c0_14 = arith.constant 0 : index
    %c0_15 = arith.constant 0 : index
    %25 = vector.load %arg7[%c0_13, %c0_14, %c0_15] : memref<1x32x4xf32, #tpu.memory_space<vmem>>, vector<1x32x2xf32>
    %26 = vector.shape_cast %25 : vector<1x32x2xf32> to vector<32x2xf32>
    %27 = vector.shape_cast %24 : vector<32x2xf32> to vector<1x32x2xf32>
    tpu.vector_store %arg7[%c0_13, %c0_14, %c0_15], %27 {strides = array<i32>} : memref<1x32x4xf32, #tpu.memory_space<vmem>>, vector<1x32x2xf32>,
    %28 = vector.extract_strided_slice %13 {offsets = [0, 2], sizes = [32, 2], strides = [1, 1]} : vector<32x128xf32> to vector<32x2xf32>
    %cst_16 = arith.constant dense<0xFF800000> : vector<32xf32>
    %29 = vector.multi_reduction <maximumf>, %28, %cst_16 [1] : vector<32x2xf32> to vector<32xf32>
    %30 = vector.shape_cast %29 : vector<32xf32> to vector<32x1xf32>
    %31 = vector.broadcast %30 : vector<32x1xf32> to vector<32x2xf32>
    %32 = arith.subf %28, %31 : vector<32x2xf32>
    %33 = math.exp %32 : vector<32x2xf32>
    %cst_17 = arith.constant dense<0.000000e+00> : vector<32xf32>
    %34 = vector.multi_reduction <add>, %33, %cst_17 [1] : vector<32x2xf32> to vector<32xf32>
    %35 = vector.shape_cast %34 : vector<32xf32> to vector<32x1xf32>
    %36 = tpu.reciprocal %35 {approx = true} : vector<32x1xf32> -> vector<32x1xf32>
    %37 = vector.broadcast %36 : vector<32x1xf32> to vector<32x2xf32>
    %38 = arith.mulf %33, %37 : vector<32x2xf32>
    %c0_18 = arith.constant 0 : index
    %c0_19 = arith.constant 0 : index
    %c2 = arith.constant 2 : index
    %39 = vector.load %arg7[%c0_18, %c0_19, %c2] : memref<1x32x4xf32, #tpu.memory_space<vmem>>, vector<1x32x2xf32>
    %40 = vector.shape_cast %39 : vector<1x32x2xf32> to vector<32x2xf32>
    %41 = vector.shape_cast %38 : vector<32x2xf32> to vector<1x32x2xf32>
    tpu.vector_store %arg7[%c0_18, %c0_19, %c2], %41 {strides = array<i32>} : memref<1x32x4xf32, #tpu.memory_space<vmem>>, vector<1x32x2xf32>,
    %42 = vector.extract_strided_slice %13 {offsets = [0, 4], sizes = [32, 1], strides = [1, 1]} : vector<32x128xf32> to vector<32x1xf32>
    %c0_20 = arith.constant 0 : index
    %c0_21 = arith.constant 0 : index
    %c0_22 = arith.constant 0 : index
    %43 = vector.load %arg8[%c0_20, %c0_21, %c0_22] : memref<1x32x1xf32, #tpu.memory_space<vmem>>, vector<1x32x1xf32>
    %44 = vector.shape_cast %43 : vector<1x32x1xf32> to vector<32x1xf32>
    %45 = vector.shape_cast %42 : vector<32x1xf32> to vector<1x32x1xf32>
    tpu.vector_store %arg8[%c0_20, %c0_21, %c0_22], %45 {strides = array<i32>} : memref<1x32x1xf32, #tpu.memory_space<vmem>>, vector<1x32x1xf32>,
    %46 = vector.extract_strided_slice %13 {offsets = [0, 5], sizes = [32, 1], strides = [1, 1]} : vector<32x128xf32> to vector<32x1xf32>
    %c0_23 = arith.constant 0 : index
    %c0_24 = arith.constant 0 : index
    %c0_25 = arith.constant 0 : index
    %47 = vector.load %arg9[%c0_23, %c0_24, %c0_25] : memref<1x32x1xf32, #tpu.memory_space<vmem>>, vector<1x32x1xf32>
    %48 = vector.shape_cast %47 : vector<1x32x1xf32> to vector<32x1xf32>
    %49 = vector.shape_cast %46 : vector<32x1xf32> to vector<1x32x1xf32>
    tpu.vector_store %arg9[%c0_23, %c0_24, %c0_25], %49 {strides = array<i32>} : memref<1x32x1xf32, #tpu.memory_space<vmem>>, vector<1x32x1xf32>,
    return
  }
  func.func @transform_0(%arg0: i32, %arg1: i32) -> (i32, i32, i32) {
    %c0_i32 = arith.constant 0 : i32
    %c0_i32_0 = arith.constant 0 : i32
    return %arg0, %arg1, %c0_i32 : i32, i32, i32
  }
  func.func @transform_1(%arg0: i32, %arg1: i32) -> (i32, i32) {
    %c0_i32 = arith.constant 0 : i32
    %c0_i32_0 = arith.constant 0 : i32
    %c0_i32_1 = arith.constant 0 : i32
    return %c0_i32, %c0_i32_0 : i32, i32
  }
  func.func @transform_2(%arg0: i32, %arg1: i32) -> (i32, i32) {
    %c0_i32 = arith.constant 0 : i32
    %c0_i32_0 = arith.constant 0 : i32
    %c0_i32_1 = arith.constant 0 : i32
    return %c0_i32, %c0_i32_0 : i32, i32
  }
  func.func @transform_3(%arg0: i32, %arg1: i32) -> (i32, i32) {
    %c0_i32 = arith.constant 0 : i32
    %c0_i32_0 = arith.constant 0 : i32
    %c0_i32_1 = arith.constant 0 : i32
    return %c0_i32, %c0_i32_0 : i32, i32
  }
  func.func @transform_4(%arg0: i32, %arg1: i32) -> (i32, i32) {
    %c0_i32 = arith.constant 0 : i32
    %c0_i32_0 = arith.constant 0 : i32
    %c0_i32_1 = arith.constant 0 : i32
    return %c0_i32, %c0_i32_0 : i32, i32
  }
  func.func @transform_5(%arg0: i32, %arg1: i32) -> (i32, i32, i32) {
    %c0_i32 = arith.constant 0 : i32
    %c0_i32_0 = arith.constant 0 : i32
    return %arg0, %arg1, %c0_i32 : i32, i32, i32
  }
  func.func @transform_6(%arg0: i32, %arg1: i32) -> (i32, i32, i32) {
    %c0_i32 = arith.constant 0 : i32
    %c0_i32_0 = arith.constant 0 : i32
    return %arg0, %arg1, %c0_i32 : i32, i32, i32
  }
  func.func @transform_7(%arg0: i32, %arg1: i32) -> (i32, i32, i32) {
    %c0_i32 = arith.constant 0 : i32
    %c0_i32_0 = arith.constant 0 : i32
    return %arg0, %arg1, %c0_i32 : i32, i32, i32
  }
}

</mosaic_0001>

<bundles_post_ra>
// kernel: tpu_custom_call.1
= control target key start
LH: loop header
LB: loop body
LE: loop exit
PB: predicated region body
PF: predicated region fallthrough
CT: control target
= control target key end

     0   :  { %s7556_s0 = inlined_call_operand.hbm [shape: bf16[2,64,1024], index: 0, kind: input, shape index: {}]   ;;  %s7557_s1 = inlined_call_operand.hbm [shape: bf16[1024,1024], index: 1, kind: input, shape index: {}]   ;;  %s7558_s2 = inlined_call_operand.hbm [shape: f32[1,1024], index: 2, kind: input, shape index: {}]   ;;  %s7559_s3 = inlined_call_operand.hbm [shape: bf16[1024,128], index: 3, kind: input, shape index: {}]   ;;  %s7560_s4 = inlined_call_operand.hbm [shape: f32[1,128], index: 4, kind: input, shape index: {}]   ;;  %s7561_s5 = inlined_call_operand.vmem [shape: f32[2,64,4], index: 5, kind: output, shape index: {0}]   ;;  %s7562_s6 = inlined_call_operand.vmem [shape: f32[2,64,1], index: 6, kind: output, shape index: {1}]   ;;  %s7563_s7 = inlined_call_operand.vmem [shape: f32[2,64,1], index: 7, kind: output, shape index: {2}]  }
   0x1   :  { %7575 = sst [smem:[#allocation25_spill]] %s7557_s1 }
   0x2   :  { %7576 = sst [smem:[#allocation26_spill]] %s7558_s2 }
   0x3   :  { %7577 = sst [smem:[#allocation27_spill]] %s7559_s3 }
   0x4   :  { %7578 = sst [smem:[#allocation28_spill]] %s7560_s4 }
   0x5   :  { %7579 = sst [smem:[#allocation29_spill]] %s7561_s5 }
   0x6   :  { %7580 = sst [smem:[#allocation30_spill]] %s7563_s7 }
   0x7   :  { %13 = vsyncpa [#allocation3], 0 }
   0x8   :  { %15 = vsyncpa [#allocation3 + $0x1], 0 }
   0x9   :  { %16 = vsyncpa [#allocation5], 0 }
   0xa   :  { %17 = vsyncpa [#allocation8], 0  ;;  %s6914_s24 = smov 0   ;;  %s6916_s25 = smov 0  }
   0xb   :  { %s6918_s26 = smov 0   ;;  %s6920_s27 = smov 0  }
   0xc   :  { %s6922_s28 = smov 0   ;;  %s6924_s29 = smov 0  }
   0xd   :  { %s6926_s30 = smov 0   ;;  %s6928_s8 = smov 0  }
   0xe LB: > { %s5638_s9 = sadd.s32 4294967295, %s6860_s8   ;;  %p57_p0 = scmp.ne.s32.totalorder %s6836_s25, %s6832_s24  ;;  %s6860_s8 = sphi %s6928_s8, %s23_s8   ;;  %s6856_s30 = sphi %s6926_s30, %s7629_s30   ;;  %s6852_s29 = sphi %s6924_s29, %s7628_s29   ;;  %s6848_s28 = sphi %s6922_s28, %s7627_s28   ;;  %s6844_s27 = sphi %s6920_s27, %s7626_s27   ;;  %s6840_s26 = sphi %s6918_s26, %s7625_s26   ;;  %s6836_s25 = sphi %s6916_s25, %s7624_s25   ;;  %s6832_s24 = sphi %s6914_s24, %s7623_s24  }
   0xf   : > { %p6954_p1 = scmp.eq.s32.totalorder %s5638_s9, 0  ;;  %p5640_p2 = scmp.ge.s32.totalorder %s6860_s8, 1 }
  0x10   : > { %p236_p3 = scmp.lt.s32.totalorder %s6860_s8, 5  ;;  %s6862_s13 = smov [#allocation4]  }
  0x11   : > { %s7581_s10 = scalar_select %p6954_p1, 1, 0 }
  0x12   : > { %p6962_p4 = por %p6954_p1, %p57_p0  ;;  %p6966_p5 = pnand %p5640_p2, %p236_p3 }
  0x13   : > { %s248_s14 = sshll.u32 %s6862_s13, 4  ;;  %s6863_s16 = smov [#allocation7]   ;;  %s249_s14 = int_to_ptr.vmem [resolvable:$true] %s248_s14 }
  0x14   : > { %s7582_s11 = scalar_select %p6962_p4, 1, 0 }
  0x15   : > { %p6392_p6 = pneg %p6966_p5  ;;  %s272_s17 = sshll.u32 %s6863_s16, 4  ;;  %s273_s17 = int_to_ptr.vmem [resolvable:$true] %s272_s17 }
  0x16   : > { %s6665_s18 = scalar_lea.vmem %s249_s14, 65536  ;;  %p6673_p12 = scmp.lt.s32.totalorder %s249_s14, %s249_s14 }
  0x17   : > { %p6974_p7 = pnand %p6392_p6, %p6954_p1  ;;  %p6666_p9 = scmp.ne.s32.totalorder %s249_s14, %s6665_s18 }
  0x18   : > { %p6674_p13 = scmp.lt.s32.totalorder %s6665_s18, %s6665_s18 }
  0x19   : > { %p6656_p8 = pneg %p6974_p7 }
  0x1a   : > { %p6675_p0 = por %p6674_p13, %p6673_p12 }
  0x1b   : > { %p6668_p10 = pnand %p6666_p9, %p6656_p8 }
  0x1d   : > { %p6669_p11 = pneg %p6668_p10 }
  0x1f   : > { %p6676_p2 = pnand %p6675_p0, %p6669_p11 }
  0x21   : > { %6679 = shalt.err (!%p6676_p2)
}
  0x22   : > { %s7564_s19 = smov 512   ;;  %s7568_s20 = smov 32  }
  0x23   : > { %s7585_s1 = sld [smem:[#allocation25_spill]]  ;;  %s6691_s23 = scalar_lea.vmem %s273_s17, 8192 }
  0x24   : > { %p6692_p3 = scmp.ne.s32.totalorder %s273_s17, %s6691_s23  ;;  %p6699_p10 = scmp.lt.s32.totalorder %s273_s17, %s273_s17 }
  0x25   : > { %p6700_p11 = scmp.lt.s32.totalorder %s6691_s23, %s6691_s23 }
  0x26   : > { %p6694_p6 = pnand %p6692_p3, %p6656_p8 }
  0x27   : > { %p6701_p12 = por %p6700_p11, %p6699_p10 }
  0x28   : > { %p6695_p9 = pneg %p6694_p6 }
  0x29   : > { %6395 = dma.hbm_to_vmem [thread:$0]  (!%p6974_p7), %s7585_s1, 65536, %s249_s14, [#allocation5], %s7564_s19, %s7564_s19, %s7568_s20  }
  0x2a   : > { %p6702_p13 = pnand %p6701_p12, %p6695_p9 }
  0x2c   : > { %6705 = shalt.err (!%p6702_p13)
}
  0x2d   : > { %s6866_s24 = smov 64   ;;  %s6867_s9 = smov 4  }
  0x2e   : > { %s7586_s3 = sld [smem:[#allocation27_spill]]  ;;  %s6868_s14 = smov [#allocation6]  }
  0x2f   : > { %s262_s18 = sshll.u32 %s6868_s14, 4  ;;  %s6869_s21 = smov [#allocation9]   ;;  %s263_s18 = int_to_ptr.vmem [resolvable:$true] %s262_s18 }
  0x30   : > { %s286_s22 = sshll.u32 %s6869_s21, 4  ;;  %s6717_s19 = scalar_lea.vmem %s263_s18, 128  ;;  %s287_s22 = int_to_ptr.vmem [resolvable:$true] %s286_s22 }
  0x31   : > { %p6718_p0 = scmp.ne.s32.totalorder %s263_s18, %s6717_s19  ;;  %p6725_p6 = scmp.lt.s32.totalorder %s263_s18, %s263_s18 }
  0x32   : > { %p6726_p9 = scmp.lt.s32.totalorder %s6717_s19, %s6717_s19 }
  0x33   : > { %p6720_p2 = pnand %p6718_p0, %p6656_p8 }
  0x34   : > { %6401 = dma.hbm_to_vmem [thread:$0]  (!%p6974_p7), %s7586_s3, 8192, %s273_s17, [#allocation8], %s6866_s24, %s6866_s24, %s6867_s9  }
  0x35   : > { %p6721_p3 = pneg %p6720_p2  ;;  %p6727_p10 = por %p6726_p9, %p6725_p6 }
  0x37   : > { %p6728_p11 = pnand %p6727_p10, %p6721_p3 }
  0x39   : > { %6731 = shalt.err (!%p6728_p11)
}
  0x3a   : > { %s7587_s2 = sld [smem:[#allocation26_spill]]  ;;  %s6743_s24 = scalar_lea.vmem %s287_s22, 16 }
  0x3b   : > { %p6744_p12 = scmp.ne.s32.totalorder %s287_s22, %s6743_s24  ;;  %s6750_s9 = scalar_lea.vmem %s287_s22, 32 }
  0x3c   : > { %p6751_p0 = scmp.lt.s32.totalorder %s287_s22, %s287_s22  ;;  %p6752_p2 = scmp.lt.s32.totalorder %s6750_s9, %s6743_s24 }
  0x3d   : > { %p6746_p13 = pnand %p6744_p12, %p6656_p8 }
  0x3e   : > { %p6753_p4 = por %p6752_p2, %p6751_p0 }
  0x3f   : > { %p6747_p1 = pneg %p6746_p13 }
  0x40   : > { %6398 = dma.hbm_to_vmem [thread:$0]  (!%p6974_p7), %s7587_s2, 128, %s263_s18, [#allocation5]  }
  0x41   : > { %p6754_p6 = pnand %p6753_p4, %p6747_p1 }
  0x43   : > { %6757 = shalt.err (!%p6754_p6)
}
  0x44   : > { %s7588_s4 = sld [smem:[#allocation28_spill]]  ;;  %s32_s16 = sadd.s32 1, %s6852_s29 }
  0x45   : > { %p33_p1 = scmp.ge.s32.totalorder %s32_s16, 2  ;;  %s35_s14 = sadd.s32 1, %s6856_s30 }
  0x46   : > { %p51_p4 = scmp.ne.s32.totalorder %s6840_s26, %s6836_s25  ;;  %p52_p8 = scmp.eq.s32.totalorder %s6860_s8, 0 }
  0x47   : > { %s7631_s16 = smov (%p33_p1, %s32_s16), 0  ;;  %s7633_s14 = smov (!%p33_p1, %s35_s14), %s6856_s30 }
  0x48   : > { %7589 = sst [smem:[#allocation13_spill]] %s7631_s16  ;;  %s40_s15 = ssub.s32 %s6852_s29, %s7631_s16 }
  0x49   : > { %s44_s18 = sadd.s32 1, %s6840_s26  ;;  %p37_p3 = scmp.ge.s32.totalorder %s7633_s14, 2 }
  0x4a   : > { %6404 = dma.hbm_to_vmem [thread:$0]  (!%p6974_p7), %s7588_s4, 16, %s287_s22, [#allocation8]  }
  0x4b   : > { %p7026_p9 = por %p52_p8, %p51_p4  ;;  %p6413_p7 = scmp.lt.s32.totalorder %s6860_s8, 4 }
  0x4c   : > { %s297_s22 = sand.u32 1, %s6840_s26   ;;  %s7635_s14 = smov (%p37_p3, %s7633_s14), 0 }
  0x4d   : > { %s5646_s17 = sshll.u32 %s297_s22, 7  ;;  %s6261_s23 = sshll.u32 %s6852_s29, 5 }
  0x4e   : > { %s39_s24 = ssub.s32 %s6856_s30, %s7635_s14  ;;  %s5649_s19 = sshll.u32 %s6856_s30, 6 }
  0x4f   : > { %s41_s9 = sor.u32 %s40_s15, %s39_s24  ;;  %s308_s13 = sadd.s32 %s6261_s23, %s5649_s19 }
  0x50   : > { %p42_p10 = scmp.eq.s32.totalorder %s41_s9, 0  ;;  %s5650_s20 = sshll.u32 %s308_s13, 6 }
  0x51   : > { %s301_s1 = scalar_lea.vmem [#allocation2], %s5646_s17  ;;  %s310_s5 = scalar_lea.hbm %s7556_s0, %s5650_s20 }
  0x52   : > { %s311_s2 = sshll.u32 %s301_s1, 4  ;;  %p7048_p11 = pnand %p6413_p7, %p7026_p9  ;;  %s312_s2 = int_to_ptr.vmem [resolvable:$true] %s311_s2 }
  0x53   : > { %s7039_s3 = scalar_select %p42_p10, %s6840_s26, %s44_s18  }
  0x54   : > { %s298_s15 = scalar_lea.sflag [#allocation3], %s297_s22  ;;  %p6760_p12 = pneg %p7048_p11 }
  0x55   : > { %s6771_s23 = scalar_lea.vmem %s312_s2, 2048  ;;  %s6870_s1 = smov [#allocation2]  }
  0x56   : > { %p6772_p13 = scmp.ne.s32.totalorder %s312_s2, %s6771_s23  ;;  %s6776_s18 = sshll.u32 %s6870_s1, 4  ;;  %s6777_s18 = int_to_ptr.vmem [resolvable:$false] %s6776_s18 }
  0x57   : > { %s6778_s4 = scalar_lea.vmem %s6777_s18, 4096  ;;  %p6779_p6 = scmp.lt.s32.totalorder %s312_s2, %s6777_s18 }
  0x58   : > { %p6774_p0 = pnand %p6772_p13, %p6760_p12  ;;  %p6780_p1 = scmp.lt.s32.totalorder %s6778_s4, %s6771_s23 }
  0x5a   : > { %p6775_p2 = pneg %p6774_p0  ;;  %p6781_p4 = por %p6780_p1, %p6779_p6 }
  0x5c   : > { %p6782_p8 = pnand %p6781_p4, %p6775_p2 }
  0x5e   : > { %6785 = shalt.err (!%p6782_p8)
}
  0x5f   : > { %s7592_s20 = smov 32   ;;  %s7593_s16 = smov 512  }
  0x60   : > { %6408 = dma.hbm_to_vmem [thread:$0]  (!%p7048_p11), %s310_s5, 2048, %s312_s2, %s298_s15, %s7593_s16, %s7593_s16, %s7592_s20  }
  0x61   : > { %323 = sbr.rel (%p6966_p5) target bundleno = 1490 (0x5d2), region = 40 }
  0x66   : > { %s325_s21 = sand.u32 1, %s6836_s25   ;;  %p7594_p3 = scmp.ne.s32.totalorder %s7582_s11, 0 }
  0x67   : > { %s5652_s22 = sshll.u32 %s325_s21, 7  ;;  %s326_s17 = scalar_lea.sflag [#allocation3], %s325_s21 }
  0x68   : > { %s7062_s24 = scalar_lea.vmem [#allocation2], %s5652_s22 }
  0x69   : > { %6819 = dma.done.wait (%p7594_p3), %s326_s17, 2048  }
  0x6a   : > { %6821 = vsyncadd (%p7594_p3), %s326_s17, 4294965248  ;;  %p7595_p9 = scmp.ne.s32.totalorder %s7581_s10, 0 }
  0x6c   : > { %6823 = dma.done.wait (%p7595_p9), [#allocation5], 65664  }
  0x6d   : > { %6825 = vsyncadd (%p7595_p9), [#allocation5], 4294901632 }
  0x6e   : > { %6827 = dma.done.wait (%p7595_p9), [#allocation8], 8208  }
  0x6f   : > { %6829 = vsyncadd (%p7595_p9), [#allocation8], 4294959088  ;;  %v502_v0 = vld [vmem:[#allocation4 + $0x1c0] sm:$0xff]  ;;  %v7087_v59 = vld [vmem:[%s7062_s24 + $0x8] sm:$0xff]  ;;  %vm5300_vm0 = vcmask 31760   ;;  %vm5251_vm1 = vcmask 15360  }
  0x70   : > { %v506_v1 = vld [vmem:[#allocation4 + $0x1e0] sm:$0xff]  ;;  %v7090_v60 = vld [vmem:[%s7062_s24 + $0x28] sm:$0xff]  ;;  %s6871_s2 = smov 126   ;;  %s6872_s5 = smov 124   ;;  %vm5381_vm2 = vcmask 7168  }
  0x71   : > { %v630_v2 = vld [vmem:[#allocation4 + $0x5c0] sm:$0xff]  ;;  %v5739_v3 = vcombine.high %v502_v0, %v506_v1  ;;  %v5738_v5 = vcombine.low %v502_v0, %v506_v1  ;;  %v7094_v63 = vcombine.high %v7087_v59, %v7090_v60  ;;  %s6873_s7 = smov 123   ;;  %s5657_s10 = sshll.u32 %s6844_s27, 2 }
  0x72   : > { %v634_v4 = vld [vmem:[#allocation4 + $0x5e0] sm:$0xff]  ;;  %p400_p5 = scmp.lt.s32.totalorder %s6848_s28, 1  ;;  %p402_p7 = scmp.lt.s32.totalorder %s5657_s10, 7 }
  0x73   : > { %v494_v6 = vld [vmem:[#allocation4 + $0x180] sm:$0xff]  ;;  %v5867_v8 = vcombine.high %v630_v2, %v634_v4  ;;  %v5866_v9 = vcombine.low %v630_v2, %v634_v4  ;;  %3640 = vmatprep.subr.bf16.mxu0 %v5739_v3  ;;  %3725 = vmatprep.mubr.bf16.mxu1 %v7094_v63  ;;  %s7620_s1 = sld [smem:[#allocation30_spill]] }
  0x74   : > { %v498_v7 = vld [vmem:[#allocation4 + $0x1a0] sm:$0xff]  ;;  %3641 = vmatpush1.bf16.msra.mxu0 %v5738_v5  ;;  %s7637_s28 = smov (!%p400_p5, %s6848_s28), 1  ;;  %s7639_s10 = smov (!%p402_p7, %s5657_s10), 7 }
  0x75   : > { %v5731_v10 = vcombine.high %v494_v6, %v498_v7  ;;  %v622_v11 = vld [vmem:[#allocation4 + $0x580] sm:$0xff]  ;;  %3693 = vmatprep.subr.bf16.mxu1 %v5867_v8  ;;  %v5730_v18 = vcombine.low %v494_v6, %v498_v7  ;;  %s5658_s11 = sshll.u32 %s7637_s28, 3  ;;  %s7621_s20 = sld [smem:[#allocation29_spill]] }
  0x76   : > { %v626_v12 = vld [vmem:[#allocation4 + $0x5a0] sm:$0xff]  ;;  %3694 = vmatpush1.bf16.msra.mxu1 %v5866_v9  ;;  %s405_s12 = sadd.s32 %s5658_s11, %s7639_s10 }
  0x77   : > { %v486_v13 = vld [vmem:[#allocation4 + $0x140] sm:$0xff]  ;;  %v5859_v14 = vcombine.high %v622_v11, %v626_v12  ;;  %3642 = vmatprep.subr.bf16.mxu0 %v5731_v10  ;;  %v5858_v19 = vcombine.low %v622_v11, %v626_v12  ;;  %s5659_s9 = sshll.u32 %s405_s12, 3 }
  0x78   : > { %v490_v15 = vld [vmem:[#allocation4 + $0x160] sm:$0xff]  ;;  %3643 = vmatpush1.bf16.msra.mxu0 %v5730_v18  ;;  %s417_s15 = scalar_lea.vmem %s7562_s6, %s5659_s9 }
  0x79   : > { %v614_v16 = vld [vmem:[#allocation4 + $0x540] sm:$0xff]  ;;  %v5723_v20 = vcombine.high %v486_v13, %v490_v15  ;;  %3695 = vmatprep.subr.bf16.mxu1 %v5859_v14  ;;  %v5722_v26 = vcombine.low %v486_v13, %v490_v15  ;;  %s7492_s18 = scalar_lea.vmem %s7620_s1, %s5659_s9 }
  0x7a   : > { %v618_v17 = vld [vmem:[#allocation4 + $0x560] sm:$0xff]  ;;  %3696 = vmatpush1.bf16.msra.mxu1 %v5858_v19 }
  0x7b   : > { %v5851_v21 = vcombine.high %v614_v16, %v618_v17  ;;  %v478_v22 = vld [vmem:[#allocation4 + $0x100] sm:$0xff]  ;;  %3644 = vmatprep.subr.bf16.mxu0 %v5723_v20  ;;  %v5850_v27 = vcombine.low %v614_v16, %v618_v17  ;;  %s7499_s16 = scalar_lea.vmem %s7621_s20, %s5659_s9 }
  0x7c   : > { %v482_v23 = vld [vmem:[#allocation4 + $0x120] sm:$0xff]  ;;  %3645 = vmatpush1.bf16.msra.mxu0 %v5722_v26 }
  0x7d   : > { %v606_v24 = vld [vmem:[#allocation4 + $0x500] sm:$0xff]  ;;  %v5715_v28 = vcombine.high %v478_v22, %v482_v23  ;;  %3697 = vmatprep.subr.bf16.mxu1 %v5851_v21  ;;  %v5714_v34 = vcombine.low %v478_v22, %v482_v23 }
  0x7e   : > { %v610_v25 = vld [vmem:[#allocation4 + $0x520] sm:$0xff]  ;;  %3698 = vmatpush1.bf16.msra.mxu1 %v5850_v27 }
  0x7f   : > { %v5843_v29 = vcombine.high %v606_v24, %v610_v25  ;;  %v470_v30 = vld [vmem:[#allocation4 + $0xc0] sm:$0xff]  ;;  %3646 = vmatprep.subr.bf16.mxu0 %v5715_v28  ;;  %v5842_v35 = vcombine.low %v606_v24, %v610_v25 }
  0x80   : > { %v474_v31 = vld [vmem:[#allocation4 + $0xe0] sm:$0xff]  ;;  %3647 = vmatpush1.bf16.msra.mxu0 %v5714_v34 }
  0x81   : > { %v598_v32 = vld [vmem:[#allocation4 + $0x4c0] sm:$0xff]  ;;  %v5707_v36 = vcombine.high %v470_v30, %v474_v31  ;;  %3699 = vmatprep.subr.bf16.mxu1 %v5843_v29  ;;  %v5706_v42 = vcombine.low %v470_v30, %v474_v31 }
  0x82   : > { %v602_v33 = vld [vmem:[#allocation4 + $0x4e0] sm:$0xff]  ;;  %3700 = vmatpush1.bf16.msra.mxu1 %v5842_v35 }
  0x83   : > { %v5835_v37 = vcombine.high %v598_v32, %v602_v33  ;;  %v462_v38 = vld [vmem:[#allocation4 + $0x80] sm:$0xff]  ;;  %3648 = vmatprep.subr.bf16.mxu0 %v5707_v36  ;;  %v5834_v43 = vcombine.low %v598_v32, %v602_v33 }
  0x84   : > { %v466_v39 = vld [vmem:[#allocation4 + $0xa0] sm:$0xff]  ;;  %3649 = vmatpush1.bf16.msra.mxu0 %v5706_v42 }
  0x85   : > { %v590_v40 = vld [vmem:[#allocation4 + $0x480] sm:$0xff]  ;;  %v5699_v44 = vcombine.high %v462_v38, %v466_v39  ;;  %3701 = vmatprep.subr.bf16.mxu1 %v5835_v37  ;;  %v5698_v50 = vcombine.low %v462_v38, %v466_v39 }
  0x86   : > { %v594_v41 = vld [vmem:[#allocation4 + $0x4a0] sm:$0xff]  ;;  %3702 = vmatpush1.bf16.msra.mxu1 %v5834_v43 }
  0x87   : > { %v5827_v45 = vcombine.high %v590_v40, %v594_v41  ;;  %v454_v46 = vld [vmem:[#allocation4 + $0x40] sm:$0xff]  ;;  %3650 = vmatprep.subr.bf16.mxu0 %v5699_v44  ;;  %v5826_v51 = vcombine.low %v590_v40, %v594_v41 }
  0x88   : > { %v458_v47 = vld [vmem:[#allocation4 + $0x60] sm:$0xff]  ;;  %3651 = vmatpush1.bf16.msra.mxu0 %v5698_v50 }
  0x89   : > { %v582_v48 = vld [vmem:[#allocation4 + $0x440] sm:$0xff]  ;;  %v5691_v52 = vcombine.high %v454_v46, %v458_v47  ;;  %3703 = vmatprep.subr.bf16.mxu1 %v5827_v45  ;;  %v5690_v0 = vcombine.low %v454_v46, %v458_v47 }
  0x8a   : > { %v586_v49 = vld [vmem:[#allocation4 + $0x460] sm:$0xff]  ;;  %3704 = vmatpush1.bf16.msra.mxu1 %v5826_v51 }
  0x8b   : > { %v446_v53 = vld [vmem:[#allocation4] sm:$0xff]  ;;  %v5819_v56 = vcombine.high %v582_v48, %v586_v49  ;;  %3652 = vmatprep.subr.bf16.mxu0 %v5691_v52  ;;  %v5818_v1 = vcombine.low %v582_v48, %v586_v49 }
  0x8c   : > { %v7077_v54 = vld [vmem:[%s7062_s24] sm:$0xff]  ;;  %3653 = vmatpush1.bf16.msra.mxu0 %v5690_v0 }
  0x8d   : > { %v7080_v55 = vld [vmem:[%s7062_s24 + $0x20] sm:$0xff]  ;;  %3705 = vmatprep.subr.bf16.mxu1 %v5819_v56 }
  0x8e   : > { %v450_v57 = vld [vmem:[#allocation4 + $0x20] sm:$0xff]  ;;  %v7084_v58 = vcombine.high %v7077_v54, %v7080_v55  ;;  %3706 = vmatpush1.bf16.msra.mxu1 %v5818_v1 }
  0x8f   : > { %v574_v61 = vld [vmem:[#allocation4 + $0x400] sm:$0xff]  ;;  %v5683_v2 = vcombine.high %v446_v53, %v450_v57  ;;  %v5682_v8 = vcombine.low %v446_v53, %v450_v57 }
  0x90   : > { %v578_v62 = vld [vmem:[#allocation4 + $0x420] sm:$0xff]  ;;  %3672 = vmatprep.mubr.bf16.mxu0 %v7084_v58 }
  0x91   : > { %v5811_v3 = vcombine.high %v574_v61, %v578_v62  ;;  %v566_v4 = vld [vmem:[#allocation4 + $0x3c0] sm:$0xff]  ;;  %3654 = vmatprep.subr.bf16.mxu0 %v5683_v2  ;;  %v5810_v9 = vcombine.low %v574_v61, %v578_v62 }
  0x92   : > { %v570_v5 = vld [vmem:[#allocation4 + $0x3e0] sm:$0xff]  ;;  %3655 = vmatpush1.bf16.msra.mxu0 %v5682_v8 }
  0x93   : > { %v694_v6 = vld [vmem:[#allocation4 + $0x7c0] sm:$0xff]  ;;  %v5803_v10 = vcombine.high %v566_v4, %v570_v5  ;;  %3707 = vmatprep.subr.bf16.mxu1 %v5811_v3  ;;  %v5802_v16 = vcombine.low %v566_v4, %v570_v5 }
  0x94   : > { %v698_v7 = vld [vmem:[#allocation4 + $0x7e0] sm:$0xff]  ;;  %3708 = vmatpush1.bf16.msra.mxu1 %v5810_v9 }
  0x95   : > { %v5931_v11 = vcombine.high %v694_v6, %v698_v7  ;;  %v558_v12 = vld [vmem:[#allocation4 + $0x380] sm:$0xff]  ;;  %3656 = vmatprep.subr.bf16.mxu0 %v5803_v10  ;;  %v5930_v17 = vcombine.low %v694_v6, %v698_v7 }
  0x96   : > { %v562_v13 = vld [vmem:[#allocation4 + $0x3a0] sm:$0xff]  ;;  %3657 = vmatpush2.bf16.msra.mxu0 %v5802_v16 }
  0x97   : > { %v686_v14 = vld [vmem:[#allocation4 + $0x780] sm:$0xff]  ;;  %v5795_v18 = vcombine.high %v558_v12, %v562_v13  ;;  %3709 = vmatprep.subr.bf16.mxu1 %v5931_v11  ;;  %v5794_v24 = vcombine.low %v558_v12, %v562_v13 }
  0x98   : > { %v690_v15 = vld [vmem:[#allocation4 + $0x7a0] sm:$0xff]  ;;  %3710 = vmatpush2.bf16.msra.mxu1 %v5930_v17 }
  0x99   : > { %v5923_v19 = vcombine.high %v686_v14, %v690_v15  ;;  %v550_v20 = vld [vmem:[#allocation4 + $0x340] sm:$0xff]  ;;  %3658 = vmatprep.subr.bf16.mxu0 %v5795_v18  ;;  %v5922_v25 = vcombine.low %v686_v14, %v690_v15 }
  0x9a   : > { %v554_v21 = vld [vmem:[#allocation4 + $0x360] sm:$0xff]  ;;  %3659 = vmatpush2.bf16.msra.mxu0 %v5794_v24 }
  0x9b   : > { %v678_v22 = vld [vmem:[#allocation4 + $0x740] sm:$0xff]  ;;  %v5787_v26 = vcombine.high %v550_v20, %v554_v21  ;;  %3711 = vmatprep.subr.bf16.mxu1 %v5923_v19  ;;  %v5786_v32 = vcombine.low %v550_v20, %v554_v21  ;;  %v7100_v21 = vcombine.low %v7077_v54, %v7080_v55 }
  0x9c   : > { %v682_v23 = vld [vmem:[#allocation4 + $0x760] sm:$0xff]  ;;  %3712 = vmatpush2.bf16.msra.mxu1 %v5922_v25  ;;  %v7106_v25 = vcombine.low %v7087_v59, %v7090_v60 }
  0x9d   : > { %v5915_v27 = vcombine.high %v678_v22, %v682_v23  ;;  %v542_v28 = vld [vmem:[#allocation4 + $0x300] sm:$0xff]  ;;  %3660 = vmatprep.subr.bf16.mxu0 %v5787_v26  ;;  %v5914_v33 = vcombine.low %v678_v22, %v682_v23 }
  0x9e   : > { %v546_v29 = vld [vmem:[#allocation4 + $0x320] sm:$0xff]  ;;  %3661 = vmatpush2.bf16.msra.mxu0 %v5786_v32 }
  0x9f   : > { %v670_v30 = vld [vmem:[#allocation4 + $0x700] sm:$0xff]  ;;  %v5779_v34 = vcombine.high %v542_v28, %v546_v29  ;;  %3713 = vmatprep.subr.bf16.mxu1 %v5915_v27  ;;  %v5778_v40 = vcombine.low %v542_v28, %v546_v29  ;;  %v439_v27 = vld [vmem:[%s7062_s24 + $0x48] sm:$0xff] }
  0xa0   : > { %v674_v31 = vld [vmem:[#allocation4 + $0x720] sm:$0xff]  ;;  %3714 = vmatpush2.bf16.msra.mxu1 %v5914_v33  ;;  %v443_v28 = vld [vmem:[%s7062_s24 + $0x68] sm:$0xff] }
  0xa1   : > { %v5907_v35 = vcombine.high %v670_v30, %v674_v31  ;;  %v534_v36 = vld [vmem:[#allocation4 + $0x2c0] sm:$0xff]  ;;  %3662 = vmatprep.subr.bf16.mxu0 %v5779_v34  ;;  %v5906_v41 = vcombine.low %v670_v30, %v674_v31  ;;  %v7113_v59 = vcombine.high %v439_v27, %v443_v28 }
  0xa2   : > { %v538_v37 = vld [vmem:[#allocation4 + $0x2e0] sm:$0xff]  ;;  %3663 = vmatpush2.bf16.msra.mxu0 %v5778_v40 }
  0xa3   : > { %v662_v38 = vld [vmem:[#allocation4 + $0x6c0] sm:$0xff]  ;;  %v5771_v42 = vcombine.high %v534_v36, %v538_v37  ;;  %3715 = vmatprep.subr.bf16.mxu1 %v5907_v35  ;;  %v5770_v48 = vcombine.low %v534_v36, %v538_v37 }
  0xa4   : > { %v666_v39 = vld [vmem:[#allocation4 + $0x6e0] sm:$0xff]  ;;  %3716 = vmatpush2.bf16.msra.mxu1 %v5906_v41 }
  0xa5   : > { %v5899_v43 = vcombine.high %v662_v38, %v666_v39  ;;  %v526_v44 = vld [vmem:[#allocation4 + $0x280] sm:$0xff]  ;;  %3664 = vmatprep.subr.bf16.mxu0 %v5771_v42  ;;  %v5898_v49 = vcombine.low %v662_v38, %v666_v39  ;;  %v7118_v42 = vld [vmem:[%s7062_s24 + $0x10] sm:$0xff] }
  0xa6   : > { %v530_v45 = vld [vmem:[#allocation4 + $0x2a0] sm:$0xff]  ;;  %3665 = vmatpush2.bf16.msra.mxu0 %v5770_v48  ;;  %v7132_v48 = vcombine.low %v439_v27, %v443_v28 }
  0xa7   : > { %v654_v46 = vld [vmem:[#allocation4 + $0x680] sm:$0xff]  ;;  %v5763_v50 = vcombine.high %v526_v44, %v530_v45  ;;  %3717 = vmatprep.subr.bf16.mxu1 %v5899_v43  ;;  %v5762_v61 = vcombine.low %v526_v44, %v530_v45  ;;  %v7124_v44 = vld [vmem:[%s7062_s24 + $0x30] sm:$0xff]  ;;  %v7127_v45 = vld [vmem:[%s7062_s24 + $0x18] sm:$0xff] }
  0xa8   : > { %v658_v47 = vld [vmem:[#allocation4 + $0x6a0] sm:$0xff]  ;;  %3718 = vmatpush2.bf16.msra.mxu1 %v5898_v49 }
  0xa9   : > { %v5891_v51 = vcombine.high %v654_v46, %v658_v47  ;;  %v518_v52 = vld [vmem:[#allocation4 + $0x240] sm:$0xff]  ;;  %3666 = vmatprep.subr.bf16.mxu0 %v5763_v50  ;;  %v5890_v62 = vcombine.low %v654_v46, %v658_v47  ;;  %v7130_v46 = vld [vmem:[%s7062_s24 + $0x38] sm:$0xff] }
  0xaa   : > { %v522_v53 = vld [vmem:[#allocation4 + $0x260] sm:$0xff]  ;;  %3667 = vmatpush2.bf16.msra.mxu0 %v5762_v61  ;;  %v7136_v61 = vcombine.high %v7118_v42, %v7124_v44 }
  0xab   : > { %v646_v56 = vld [vmem:[#allocation4 + $0x640] sm:$0xff]  ;;  %v5755_v0 = vcombine.high %v518_v52, %v522_v53  ;;  %3719 = vmatprep.subr.bf16.mxu1 %v5891_v51  ;;  %v5754_v6 = vcombine.low %v518_v52, %v522_v53 }
  0xac   : > { %v650_v57 = vld [vmem:[#allocation4 + $0x660] sm:$0xff]  ;;  %3720 = vmatpush2.bf16.msra.mxu1 %v5890_v62  ;;  %v7141_v62 = vcombine.high %v7127_v45, %v7130_v46 }
  0xad   : > { %v5883_v1 = vcombine.high %v646_v56, %v650_v57  ;;  %v510_v2 = vld [vmem:[#allocation4 + $0x200] sm:$0xff]  ;;  %3668 = vmatprep.subr.bf16.mxu0 %v5755_v0  ;;  %v5882_v7 = vcombine.low %v646_v56, %v650_v57 }
  0xae   : > { %v514_v3 = vld [vmem:[#allocation4 + $0x220] sm:$0xff]  ;;  %3669 = vmatpush2.bf16.msra.mxu0 %v5754_v6 }
  0xaf   : > { %v638_v4 = vld [vmem:[#allocation4 + $0x600] sm:$0xff]  ;;  %v5747_v8 = vcombine.high %v510_v2, %v514_v3  ;;  %3721 = vmatprep.subr.bf16.mxu1 %v5883_v1  ;;  %v5746_v14 = vcombine.low %v510_v2, %v514_v3 }
  0xb0   : > { %v642_v5 = vld [vmem:[#allocation4 + $0x620] sm:$0xff]  ;;  %3722 = vmatpush2.bf16.msra.mxu1 %v5882_v7 }
  0xb1   : > { %v5875_v9 = vcombine.high %v638_v4, %v642_v5  ;;  %v758_v10 = vld [vmem:[#allocation4 + $0x9c0] sm:$0xff]  ;;  %3670 = vmatprep.subr.bf16.mxu0 %v5747_v8  ;;  %v5874_v15 = vcombine.low %v638_v4, %v642_v5 }
  0xb2   : > { %v762_v11 = vld [vmem:[#allocation4 + $0x9e0] sm:$0xff]  ;;  %3671 = vmatpush2.bf16.msra.mxu0 %v5746_v14 }
  0xb3   : > { %v886_v12 = vld [vmem:[#allocation4 + $0xdc0] sm:$0xff]  ;;  %v5995_v16 = vcombine.high %v758_v10, %v762_v11  ;;  %3723 = vmatprep.subr.bf16.mxu1 %v5875_v9  ;;  %v5994_v26 = vcombine.low %v758_v10, %v762_v11 }
  0xb4   : > { %v890_v13 = vld [vmem:[#allocation4 + $0xde0] sm:$0xff]  ;;  %3724 = vmatpush2.bf16.msra.mxu1 %v5874_v15 }
  0xb5   : > { %v6123_v17 = vcombine.high %v886_v12, %v890_v13  ;;  %v750_v18 = vld [vmem:[#allocation4 + $0x980] sm:$0xff]  ;;  %3746 = vmatprep.subr.bf16.mxu0 %v5995_v16  ;;  %v6122_v29 = vcombine.low %v886_v12, %v890_v13  ;;  %3673 = vmatmul.mubr.bf16.vlgmr.msra.gmra.mxu0 %v7100_v21 }
  0xb6   : > { %v754_v19 = vld [vmem:[#allocation4 + $0x9a0] sm:$0xff]  ;;  %3747 = vmatpush1.bf16.msra.mxu0 %v5994_v26 }
  0xb7   : > { %v878_v20 = vld [vmem:[#allocation4 + $0xd80] sm:$0xff]  ;;  %v5987_v30 = vcombine.high %v750_v18, %v754_v19  ;;  %3799 = vmatprep.subr.bf16.mxu1 %v6123_v17  ;;  %3726 = vmatmul.mubr.bf16.vlgmr.msra.gmra.mxu1 %v7106_v25  ;;  %v5986_v60 = vcombine.low %v750_v18, %v754_v19 }
  0xb8   : > { %v882_v22 = vld [vmem:[#allocation4 + $0xda0] sm:$0xff]  ;;  %3800 = vmatpush1.bf16.msra.mxu1 %v6122_v29  ;;  %3735 = vmatprep.mubr.bf16.mxu1 %v7113_v59 }
  0xb9   : > { %v438_v23 = vld [vmem:[%s7062_s24 + $0x40] sm:$0xff]  ;;  %v6115_v31 = vcombine.high %v878_v20, %v882_v22  ;;  %3748 = vmatprep.subr.bf16.mxu0 %v5987_v30  ;;  %v6114_v35 = vcombine.low %v878_v20, %v882_v22 }
  0xba   : > { %v442_v24 = vld [vmem:[%s7062_s24 + $0x60] sm:$0xff]  ;;  %3749 = vmatpush1.bf16.msra.mxu0 %v5986_v60 }
  0xbb   : > { %v742_v32 = vld [vmem:[#allocation4 + $0x940] sm:$0xff]  ;;  %v7110_v55 = vcombine.high %v438_v23, %v442_v24  ;;  %3801 = vmatprep.subr.bf16.mxu1 %v6115_v31  ;;  %v7120_v43 = vcombine.low %v438_v23, %v442_v24 }
  0xbc   : > { %v746_v54 = vld [vmem:[#allocation4 + $0x960] sm:$0xff]  ;;  %3802 = vmatpush1.bf16.msra.mxu1 %v6114_v35 }
  0xbd   : > { %v870_v33 = vld [vmem:[#allocation4 + $0xd40] sm:$0xff]  ;;  %v5979_v36 = vcombine.high %v742_v32, %v746_v54  ;;  %3682 = vmatprep.mubr.bf16.mxu0 %v7110_v55  ;;  %v5978_v47 = vcombine.low %v742_v32, %v746_v54 }
  0xbe   : > { %v874_v34 = vld [vmem:[#allocation4 + $0xd60] sm:$0xff]  ;;  %3683 = vmatmul.mubr.bf16.gmra.mxu0 %v7120_v43 }
  0xbf   : > { %v734_v37 = vld [vmem:[#allocation4 + $0x900] sm:$0xff]  ;;  %v6107_v39 = vcombine.high %v870_v33, %v874_v34  ;;  %3750 = vmatprep.subr.bf16.mxu0 %v5979_v36  ;;  %v6106_v49 = vcombine.low %v870_v33, %v874_v34  ;;  %3736 = vmatmul.mubr.bf16.gmra.mxu1 %v7132_v48 }
  0xc0   : > { %v738_v38 = vld [vmem:[#allocation4 + $0x920] sm:$0xff]  ;;  %3751 = vmatpush1.bf16.msra.mxu0 %v5978_v47  ;;  %3778 = vmatprep.mubr.bf16.mxu0 %v7136_v61 }
  0xc1   : > { %v862_v40 = vld [vmem:[#allocation4 + $0xd00] sm:$0xff]  ;;  %v5971_v50 = vcombine.high %v734_v37, %v738_v38  ;;  %3803 = vmatprep.subr.bf16.mxu1 %v6107_v39  ;;  %v5970_v0 = vcombine.low %v734_v37, %v738_v38  ;;  %3831 = vmatprep.mubr.bf16.mxu1 %v7141_v62 }
  0xc2   : > { %v866_v41 = vld [vmem:[#allocation4 + $0xd20] sm:$0xff]  ;;  %3804 = vmatpush1.bf16.msra.mxu1 %v6106_v49 }
  0xc3   : > { %v726_v51 = vld [vmem:[#allocation4 + $0x8c0] sm:$0xff]  ;;  %v6099_v56 = vcombine.high %v862_v40, %v866_v41  ;;  %3752 = vmatprep.subr.bf16.mxu0 %v5971_v50  ;;  %v6098_v1 = vcombine.low %v862_v40, %v866_v41 }
  0xc4   : > { %v730_v52 = vld [vmem:[#allocation4 + $0x8e0] sm:$0xff]  ;;  %3753 = vmatpush1.bf16.msra.mxu0 %v5970_v0 }
  0xc5   : > { %v854_v53 = vld [vmem:[#allocation4 + $0xcc0] sm:$0xff]  ;;  %v5963_v2 = vcombine.high %v726_v51, %v730_v52  ;;  %3805 = vmatprep.subr.bf16.mxu1 %v6099_v56  ;;  %v5962_v8 = vcombine.low %v726_v51, %v730_v52 }
  0xc6   : > { %v858_v57 = vld [vmem:[#allocation4 + $0xce0] sm:$0xff]  ;;  %3806 = vmatpush1.bf16.msra.mxu1 %v6098_v1 }
  0xc7   : > { %v718_v3 = vld [vmem:[#allocation4 + $0x880] sm:$0xff]  ;;  %v6091_v6 = vcombine.high %v854_v53, %v858_v57  ;;  %3754 = vmatprep.subr.bf16.mxu0 %v5963_v2  ;;  %v6090_v9 = vcombine.low %v854_v53, %v858_v57 }
  0xc8   : > { %v722_v4 = vld [vmem:[#allocation4 + $0x8a0] sm:$0xff]  ;;  %3755 = vmatpush1.bf16.msra.mxu0 %v5962_v8 }
  0xc9   : > { %v846_v5 = vld [vmem:[#allocation4 + $0xc80] sm:$0xff]  ;;  %v5955_v10 = vcombine.high %v718_v3, %v722_v4  ;;  %3807 = vmatprep.subr.bf16.mxu1 %v6091_v6  ;;  %v5954_v16 = vcombine.low %v718_v3, %v722_v4 }
  0xca   : > { %v850_v7 = vld [vmem:[#allocation4 + $0xca0] sm:$0xff]  ;;  %3808 = vmatpush1.bf16.msra.mxu1 %v6090_v9 }
  0xcb   : > { %v710_v11 = vld [vmem:[#allocation4 + $0x840] sm:$0xff]  ;;  %v6083_v14 = vcombine.high %v846_v5, %v850_v7  ;;  %3756 = vmatprep.subr.bf16.mxu0 %v5955_v10  ;;  %v6082_v17 = vcombine.low %v846_v5, %v850_v7 }
  0xcc   : > { %v714_v12 = vld [vmem:[#allocation4 + $0x860] sm:$0xff]  ;;  %3757 = vmatpush1.bf16.msra.mxu0 %v5954_v16 }
  0xcd   : > { %v838_v13 = vld [vmem:[#allocation4 + $0xc40] sm:$0xff]  ;;  %v5947_v18 = vcombine.high %v710_v11, %v714_v12  ;;  %3809 = vmatprep.subr.bf16.mxu1 %v6083_v14  ;;  %v5946_v26 = vcombine.low %v710_v11, %v714_v12 }
  0xce   : > { %v842_v15 = vld [vmem:[#allocation4 + $0xc60] sm:$0xff]  ;;  %3810 = vmatpush1.bf16.msra.mxu1 %v6082_v17 }
  0xcf   : > { %v702_v19 = vld [vmem:[#allocation4 + $0x800] sm:$0xff]  ;;  %v6075_v23 = vcombine.high %v838_v13, %v842_v15  ;;  %3758 = vmatprep.subr.bf16.mxu0 %v5947_v18  ;;  %v6074_v27 = vcombine.low %v838_v13, %v842_v15 }
  0xd0   : > { %v706_v20 = vld [vmem:[#allocation4 + $0x820] sm:$0xff]  ;;  %3759 = vmatpush1.bf16.msra.mxu0 %v5946_v26 }
  0xd1   : > { %v830_v22 = vld [vmem:[#allocation4 + $0xc00] sm:$0xff]  ;;  %v5939_v28 = vcombine.high %v702_v19, %v706_v20  ;;  %3811 = vmatprep.subr.bf16.mxu1 %v6075_v23  ;;  %v5938_v33 = vcombine.low %v702_v19, %v706_v20 }
  0xd2   : > { %v834_v24 = vld [vmem:[#allocation4 + $0xc20] sm:$0xff]  ;;  %3812 = vmatpush1.bf16.msra.mxu1 %v6074_v27 }
  0xd3   : > { %v822_v29 = vld [vmem:[#allocation4 + $0xbc0] sm:$0xff]  ;;  %v6067_v32 = vcombine.high %v830_v22, %v834_v24  ;;  %3760 = vmatprep.subr.bf16.mxu0 %v5939_v28  ;;  %v6066_v34 = vcombine.low %v830_v22, %v834_v24 }
  0xd4   : > { %v826_v30 = vld [vmem:[#allocation4 + $0xbe0] sm:$0xff]  ;;  %3761 = vmatpush1.bf16.msra.mxu0 %v5938_v33 }
  0xd5   : > { %v950_v31 = vld [vmem:[#allocation4 + $0xfc0] sm:$0xff]  ;;  %v6059_v60 = vcombine.high %v822_v29, %v826_v30  ;;  %3813 = vmatprep.subr.bf16.mxu1 %v6067_v32  ;;  %v6058_v40 = vcombine.low %v822_v29, %v826_v30 }
  0xd6   : > { %v954_v54 = vld [vmem:[#allocation4 + $0xfe0] sm:$0xff]  ;;  %3814 = vmatpush1.bf16.msra.mxu1 %v6066_v34 }
  0xd7   : > { %v814_v35 = vld [vmem:[#allocation4 + $0xb80] sm:$0xff]  ;;  %v6187_v38 = vcombine.high %v950_v31, %v954_v54  ;;  %3762 = vmatprep.subr.bf16.mxu0 %v6059_v60  ;;  %v6186_v41 = vcombine.low %v950_v31, %v954_v54 }
  0xd8   : > { %v818_v36 = vld [vmem:[#allocation4 + $0xba0] sm:$0xff]  ;;  %3763 = vmatpush2.bf16.msra.mxu0 %v6058_v40 }
  0xd9   : > { %v942_v37 = vld [vmem:[#allocation4 + $0xf80] sm:$0xff]  ;;  %v6051_v47 = vcombine.high %v814_v35, %v818_v36  ;;  %3815 = vmatprep.subr.bf16.mxu1 %v6187_v38  ;;  %v6050_v56 = vcombine.low %v814_v35, %v818_v36 }
  0xda   : > { %v946_v39 = vld [vmem:[#allocation4 + $0xfa0] sm:$0xff]  ;;  %3816 = vmatpush2.bf16.msra.mxu1 %v6186_v41  ;;  %v503_v41 = vld [vmem:[#allocation4 + $0x1c8] sm:$0xff] }
  0xdb   : > { %v806_v49 = vld [vmem:[#allocation4 + $0xb40] sm:$0xff]  ;;  %v6179_v52 = vcombine.high %v942_v37, %v946_v39  ;;  %3764 = vmatprep.subr.bf16.mxu0 %v6051_v47  ;;  %v6178_v57 = vcombine.low %v942_v37, %v946_v39  ;;  %v507_v47 = vld [vmem:[#allocation4 + $0x1e8] sm:$0xff] }
  0xdc   : > { %v810_v50 = vld [vmem:[#allocation4 + $0xb60] sm:$0xff]  ;;  %3765 = vmatpush2.bf16.msra.mxu0 %v6050_v56  ;;  %v499_v56 = vld [vmem:[#allocation4 + $0x1a8] sm:$0xff] }
  0xdd   : > { %v934_v51 = vld [vmem:[#allocation4 + $0xf40] sm:$0xff]  ;;  %v6043_v0 = vcombine.high %v806_v49, %v810_v50  ;;  %3817 = vmatprep.subr.bf16.mxu1 %v6179_v52  ;;  %v6042_v6 = vcombine.low %v806_v49, %v810_v50  ;;  %v631_v49 = vld [vmem:[#allocation4 + $0x5c8] sm:$0xff] }
  0xde   : > { %v938_v53 = vld [vmem:[#allocation4 + $0xf60] sm:$0xff]  ;;  %3818 = vmatpush2.bf16.msra.mxu1 %v6178_v57 }
  0xdf   : > { %v798_v1 = vld [vmem:[#allocation4 + $0xb00] sm:$0xff]  ;;  %v6171_v4 = vcombine.high %v934_v51, %v938_v53  ;;  %3766 = vmatprep.subr.bf16.mxu0 %v6043_v0  ;;  %v6170_v7 = vcombine.low %v934_v51, %v938_v53  ;;  %v635_v51 = vld [vmem:[#allocation4 + $0x5e8] sm:$0xff]  ;;  %v5741_v0 = vcombine.high %v503_v41, %v507_v47 }
  0xe0   : > { %v802_v2 = vld [vmem:[#allocation4 + $0xb20] sm:$0xff]  ;;  %3767 = vmatpush2.bf16.msra.mxu0 %v6042_v6  ;;  %v495_v53 = vld [vmem:[#allocation4 + $0x188] sm:$0xff]  ;;  %v441_v6 = vld [vmem:[%s7062_s24 + $0x58] sm:$0xff] }
  0xe1   : > { %v926_v3 = vld [vmem:[#allocation4 + $0xf00] sm:$0xff]  ;;  %v6035_v8 = vcombine.high %v798_v1, %v802_v2  ;;  %3819 = vmatprep.subr.bf16.mxu1 %v6171_v4  ;;  %v6034_v14 = vcombine.low %v798_v1, %v802_v2  ;;  %v623_v1 = vld [vmem:[#allocation4 + $0x588] sm:$0xff]  ;;  %v444_v4 = vld [vmem:[%s7062_s24 + $0x70] sm:$0xff] }
  0xe2   : > { %v930_v5 = vld [vmem:[#allocation4 + $0xf20] sm:$0xff]  ;;  %3820 = vmatpush2.bf16.msra.mxu1 %v6170_v7  ;;  %v627_v2 = vld [vmem:[#allocation4 + $0x5a8] sm:$0xff]  ;;  %v7151_v7 = vcombine.low %v7118_v42, %v7124_v44 }
  0xe3   : > { %v790_v9 = vld [vmem:[#allocation4 + $0xac0] sm:$0xff]  ;;  %v6163_v12 = vcombine.high %v926_v3, %v930_v5  ;;  %3768 = vmatprep.subr.bf16.mxu0 %v6035_v8  ;;  %v6162_v15 = vcombine.low %v926_v3, %v930_v5  ;;  %v440_v3 = vld [vmem:[%s7062_s24 + $0x50] sm:$0xff]  ;;  %v5869_v5 = vcombine.high %v631_v49, %v635_v51  ;;  %v7155_v8 = vcombine.low %v7127_v45, %v7130_v46  ;;  %v619_v42 = vld [vmem:[#allocation4 + $0x568] sm:$0xff] }
  0xe4   : > { %v794_v10 = vld [vmem:[#allocation4 + $0xae0] sm:$0xff]  ;;  %3769 = vmatpush2.bf16.msra.mxu0 %v6034_v14  ;;  %v5861_v14 = vcombine.high %v623_v1, %v627_v2  ;;  %v5732_v45 = vcombine.low %v495_v53, %v499_v56  ;;  %v5860_v46 = vcombine.low %v623_v1, %v627_v2 }
  0xe5   : > { %v918_v11 = vld [vmem:[#allocation4 + $0xec0] sm:$0xff]  ;;  %v6027_v16 = vcombine.high %v790_v9, %v794_v10  ;;  %3821 = vmatprep.subr.bf16.mxu1 %v6163_v12  ;;  %v6026_v23 = vcombine.low %v790_v9, %v794_v10  ;;  %v5740_v9 = vcombine.low %v503_v41, %v507_v47  ;;  %v445_v10 = vld [vmem:[%s7062_s24 + $0x78] sm:$0xff]  ;;  %v5733_v12 = vcombine.high %v495_v53, %v499_v56  ;;  %v595_v41 = vld [vmem:[#allocation4 + $0x4a8] sm:$0xff] }
  0xe6   : > { %v922_v13 = vld [vmem:[#allocation4 + $0xee0] sm:$0xff]  ;;  %3822 = vmatpush2.bf16.msra.mxu1 %v6162_v15  ;;  %v7158_v15 = vcombine.high %v440_v3, %v444_v4  ;;  %v7161_v44 = vcombine.high %v441_v6, %v445_v10  ;;  %v459_v53 = vld [vmem:[#allocation4 + $0x68] sm:$0xff] }
  0xe7   : > { %v782_v17 = vld [vmem:[#allocation4 + $0xa80] sm:$0xff]  ;;  %v6155_v20 = vcombine.high %v918_v11, %v922_v13  ;;  %3770 = vmatprep.subr.bf16.mxu0 %v6027_v16  ;;  %v6154_v24 = vcombine.low %v918_v11, %v922_v13  ;;  %v5868_v11 = vcombine.low %v631_v49, %v635_v51  ;;  %v487_v13 = vld [vmem:[#allocation4 + $0x148] sm:$0xff] }
  0xe8   : > { %v786_v18 = vld [vmem:[#allocation4 + $0xaa0] sm:$0xff]  ;;  %3771 = vmatpush2.bf16.msra.mxu0 %v6026_v23  ;;  %v491_v16 = vld [vmem:[#allocation4 + $0x168] sm:$0xff] }
  0xe9   : > { %v910_v19 = vld [vmem:[#allocation4 + $0xe80] sm:$0xff]  ;;  %v6019_v26 = vcombine.high %v782_v17, %v786_v18  ;;  %3823 = vmatprep.subr.bf16.mxu1 %v6155_v20  ;;  %v6018_v32 = vcombine.low %v782_v17, %v786_v18  ;;  %v615_v17 = vld [vmem:[#allocation4 + $0x548] sm:$0xff]  ;;  %v5725_v18 = vcombine.high %v487_v13, %v491_v16 }
  0xea   : > { %v914_v22 = vld [vmem:[#allocation4 + $0xea0] sm:$0xff]  ;;  %3824 = vmatpush2.bf16.msra.mxu1 %v6154_v24  ;;  %v483_v20 = vld [vmem:[#allocation4 + $0x128] sm:$0xff]  ;;  %v5853_v23 = vcombine.high %v615_v17, %v619_v42 }
  0xeb   : > { %v774_v27 = vld [vmem:[#allocation4 + $0xa40] sm:$0xff]  ;;  %v6147_v30 = vcombine.high %v910_v19, %v914_v22  ;;  %3772 = vmatprep.subr.bf16.mxu0 %v6019_v26  ;;  %v6146_v54 = vcombine.low %v910_v19, %v914_v22  ;;  %v479_v19 = vld [vmem:[#allocation4 + $0x108] sm:$0xff]  ;;  %v7165_v26 = vcombine.low %v440_v3, %v444_v4 }
  0xec   : > { %v778_v28 = vld [vmem:[#allocation4 + $0xa60] sm:$0xff]  ;;  %3773 = vmatpush2.bf16.msra.mxu0 %v6018_v32  ;;  %v607_v22 = vld [vmem:[#allocation4 + $0x508] sm:$0xff] }
  0xed   : > { %v902_v29 = vld [vmem:[#allocation4 + $0xe40] sm:$0xff]  ;;  %v6011_v33 = vcombine.high %v774_v27, %v778_v28  ;;  %3825 = vmatprep.subr.bf16.mxu1 %v6147_v30  ;;  %v6010_v38 = vcombine.low %v774_v27, %v778_v28  ;;  %v611_v24 = vld [vmem:[#allocation4 + $0x528] sm:$0xff]  ;;  %v5724_v27 = vcombine.low %v487_v13, %v491_v16  ;;  %v7168_v28 = vcombine.low %v441_v6, %v445_v10 }
  0xee   : > { %v906_v31 = vld [vmem:[#allocation4 + $0xe60] sm:$0xff]  ;;  %3826 = vmatpush2.bf16.msra.mxu1 %v6146_v54  ;;  %v5717_v30 = vcombine.high %v479_v19, %v483_v20  ;;  %v471_v32 = vld [vmem:[#allocation4 + $0xc8] sm:$0xff] }
  0xef   : > { %v766_v34 = vld [vmem:[#allocation4 + $0xa00] sm:$0xff]  ;;  %v6139_v36 = vcombine.high %v902_v29, %v906_v31  ;;  %3774 = vmatprep.subr.bf16.mxu0 %v6011_v33  ;;  %v6138_v39 = vcombine.low %v902_v29, %v906_v31  ;;  %7596 = vst [vmem:[#allocation14_spill] sm:$0xff] %v7168_v28  ;;  %v5852_v29 = vcombine.low %v615_v17, %v619_v42  ;;  %v475_v54 = vld [vmem:[#allocation4 + $0xe8] sm:$0xff] }
  0xf0   : > { %v770_v60 = vld [vmem:[#allocation4 + $0xa20] sm:$0xff]  ;;  %3775 = vmatpush2.bf16.msra.mxu0 %v6010_v38  ;;  %v5845_v31 = vcombine.high %v607_v22, %v611_v24  ;;  %v599_v33 = vld [vmem:[#allocation4 + $0x4c8] sm:$0xff]  ;;  %v5708_v47 = vcombine.low %v471_v32, %v475_v54 }
  0xf1   : > { %v894_v35 = vld [vmem:[#allocation4 + $0xe00] sm:$0xff]  ;;  %v6003_v40 = vcombine.high %v766_v34, %v770_v60  ;;  %3827 = vmatprep.subr.bf16.mxu1 %v6139_v36  ;;  %v6002_v52 = vcombine.low %v766_v34, %v770_v60  ;;  %v603_v34 = vld [vmem:[#allocation4 + $0x4e8] sm:$0xff]  ;;  %v5716_v60 = vcombine.low %v479_v19, %v483_v20  ;;  %v5709_v36 = vcombine.high %v471_v32, %v475_v54 }
  0xf2   : > { %v898_v37 = vld [vmem:[#allocation4 + $0xe20] sm:$0xff]  ;;  %3828 = vmatpush2.bf16.msra.mxu1 %v6138_v39  ;;  %v463_v38 = vld [vmem:[#allocation4 + $0x88] sm:$0xff]  ;;  %v5836_v49 = vcombine.low %v599_v33, %v603_v34 }
  0xf3   : > { %v6131_v50 = vcombine.high %v894_v35, %v898_v37  ;;  %3776 = vmatprep.subr.bf16.mxu0 %v6003_v40  ;;  %v6130_v57 = vcombine.low %v894_v35, %v898_v37  ;;  %v5844_v35 = vcombine.low %v607_v22, %v611_v24  ;;  %v5837_v37 = vcombine.high %v599_v33, %v603_v34  ;;  %v467_v39 = vld [vmem:[#allocation4 + $0xa8] sm:$0xff] }
  0xf4   : > { %3777 = vmatpush2.bf16.msra.mxu0 %v6002_v52  ;;  %v591_v40 = vld [vmem:[#allocation4 + $0x488] sm:$0xff] }
  0xf5   : > { %3829 = vmatprep.subr.bf16.mxu1 %v6131_v50  ;;  %3852 = vmatprep.subr.bf16.mxu0 %v5741_v0  ;;  %v5701_v50 = vcombine.high %v463_v38, %v467_v39  ;;  %v5829_v51 = vcombine.high %v591_v40, %v595_v41  ;;  %v455_v52 = vld [vmem:[#allocation4 + $0x48] sm:$0xff]  ;;  %v5700_v0 = vcombine.low %v463_v38, %v467_v39 }
  0xf6   : > { %3830 = vmatpush2.bf16.msra.mxu1 %v6130_v57  ;;  %v583_v56 = vld [vmem:[#allocation4 + $0x448] sm:$0xff]  ;;  %v5828_v1 = vcombine.low %v591_v40, %v595_v41  ;;  %v5693_v2 = vcombine.high %v455_v52, %v459_v53  ;;  %v5692_v10 = vcombine.low %v455_v52, %v459_v53 }
  0xf7   : > { %3905 = vmatprep.subr.bf16.mxu1 %v5869_v5  ;;  %3779 = vmatmul.mubr.bf16.vlgmr.msra.gmra.mxu0 %v7151_v7  ;;  %v587_v57 = vld [vmem:[#allocation4 + $0x468] sm:$0xff] }
  0xf8   : > { %3853 = vmatpush1.bf16.msra.mxu0 %v5740_v9  ;;  %3788 = vmatprep.mubr.bf16.mxu0 %v7158_v15  ;;  %v5821_v3 = vcombine.high %v583_v56, %v587_v57  ;;  %v447_v4 = vld [vmem:[#allocation4 + $0x8] sm:$0xff] }
  0xf9   : > { %3832 = vmatmul.mubr.bf16.vlgmr.msra.gmra.mxu1 %v7155_v8  ;;  %3854 = vmatprep.subr.bf16.mxu0 %v5733_v12  ;;  %v451_v5 = vld [vmem:[#allocation4 + $0x28] sm:$0xff] }
  0xfa   : > { %3906 = vmatpush1.bf16.msra.mxu1 %v5868_v11  ;;  %3841 = vmatprep.mubr.bf16.mxu1 %v7161_v44  ;;  %v575_v6 = vld [vmem:[#allocation4 + $0x408] sm:$0xff]  ;;  %v5820_v11 = vcombine.low %v583_v56, %v587_v57  ;;  %v5685_v12 = vcombine.high %v447_v4, %v451_v5 }
  0xfb   : > { %3907 = vmatprep.subr.bf16.mxu1 %v5861_v14  ;;  %v579_v9 = vld [vmem:[#allocation4 + $0x428] sm:$0xff] }
  0xfc   : > { %3855 = vmatpush1.bf16.msra.mxu0 %v5732_v45  ;;  %v5813_v13 = vcombine.high %v575_v6, %v579_v9  ;;  %v567_v14 = vld [vmem:[#allocation4 + $0x3c8] sm:$0xff]  ;;  %v5684_v45 = vcombine.low %v447_v4, %v451_v5 }
  0xfd   : > { %3856 = vmatprep.subr.bf16.mxu0 %v5725_v18  ;;  %v571_v16 = vld [vmem:[#allocation4 + $0x3e8] sm:$0xff] }
  0xfe   : > { %3908 = vmatpush1.bf16.msra.mxu1 %v5860_v46  ;;  %v695_v17 = vld [vmem:[#allocation4 + $0x7c8] sm:$0xff]  ;;  %v5812_v46 = vcombine.low %v575_v6, %v579_v9  ;;  %v5805_v18 = vcombine.high %v567_v14, %v571_v16 }
  0xff   : > { %3909 = vmatprep.subr.bf16.mxu1 %v5853_v23  ;;  %3789 = vmatmul.mubr.bf16.gmra.mxu0 %v7165_v26  ;;  %v699_v42 = vld [vmem:[#allocation4 + $0x7e8] sm:$0xff] }
 0x100   : > { %3857 = vmatpush1.bf16.msra.mxu0 %v5724_v27  ;;  %3884 = vmatprep.mubr.bf16.mxu0 %v7084_v58  ;;  %v5933_v19 = vcombine.high %v695_v17, %v699_v42  ;;  %v559_v20 = vld [vmem:[#allocation4 + $0x388] sm:$0xff]  ;;  %v5804_v27 = vcombine.low %v567_v14, %v571_v16 }
 0x101   : > { %3842 = vmatmul.mubr.bf16.gmra.mxu1 %v7168_v28  ;;  %3858 = vmatprep.subr.bf16.mxu0 %v5717_v30  ;;  %v563_v22 = vld [vmem:[#allocation4 + $0x3a8] sm:$0xff] }
 0x102   : > { %3910 = vmatpush1.bf16.msra.mxu1 %v5852_v29  ;;  %3937 = vmatprep.mubr.bf16.mxu1 %v7094_v63  ;;  %v687_v23 = vld [vmem:[#allocation4 + $0x788] sm:$0xff]  ;;  %v5932_v29 = vcombine.low %v695_v17, %v699_v42  ;;  %v5797_v30 = vcombine.high %v559_v20, %v563_v22 }
 0x103   : > { %3911 = vmatprep.subr.bf16.mxu1 %v5845_v31  ;;  %v691_v24 = vld [vmem:[#allocation4 + $0x7a8] sm:$0xff] }
 0x104   : > { %3859 = vmatpush1.bf16.msra.mxu0 %v5716_v60  ;;  %v5925_v31 = vcombine.high %v687_v23, %v691_v24  ;;  %v551_v32 = vld [vmem:[#allocation4 + $0x348] sm:$0xff]  ;;  %v5796_v60 = vcombine.low %v559_v20, %v563_v22 }
 0x105   : > { %3860 = vmatprep.subr.bf16.mxu0 %v5709_v36  ;;  %v555_v54 = vld [vmem:[#allocation4 + $0x368] sm:$0xff] }
 0x106   : > { %3912 = vmatpush1.bf16.msra.mxu1 %v5844_v35  ;;  %v679_v33 = vld [vmem:[#allocation4 + $0x748] sm:$0xff]  ;;  %v5924_v35 = vcombine.low %v687_v23, %v691_v24  ;;  %v5789_v36 = vcombine.high %v551_v32, %v555_v54 }
 0x107   : > { %3913 = vmatprep.subr.bf16.mxu1 %v5837_v37  ;;  %v683_v34 = vld [vmem:[#allocation4 + $0x768] sm:$0xff] }
 0x108   : > { %3861 = vmatpush1.bf16.msra.mxu0 %v5708_v47  ;;  %v5917_v37 = vcombine.high %v679_v33, %v683_v34  ;;  %v543_v38 = vld [vmem:[#allocation4 + $0x308] sm:$0xff]  ;;  %v5788_v47 = vcombine.low %v551_v32, %v555_v54 }
 0x109   : > { %3862 = vmatprep.subr.bf16.mxu0 %v5701_v50  ;;  %v547_v39 = vld [vmem:[#allocation4 + $0x328] sm:$0xff] }
 0x10a   : > { %3914 = vmatpush1.bf16.msra.mxu1 %v5836_v49  ;;  %v671_v40 = vld [vmem:[#allocation4 + $0x708] sm:$0xff]  ;;  %v5916_v49 = vcombine.low %v679_v33, %v683_v34  ;;  %v5781_v50 = vcombine.high %v543_v38, %v547_v39 }
 0x10b   : > { %3915 = vmatprep.subr.bf16.mxu1 %v5829_v51  ;;  %v675_v41 = vld [vmem:[#allocation4 + $0x728] sm:$0xff] }
 0x10c   : > { %3863 = vmatpush1.bf16.msra.mxu0 %v5700_v0  ;;  %v5909_v51 = vcombine.high %v671_v40, %v675_v41  ;;  %v535_v52 = vld [vmem:[#allocation4 + $0x2c8] sm:$0xff]  ;;  %v5780_v0 = vcombine.low %v543_v38, %v547_v39 }
 0x10d   : > { %3864 = vmatprep.subr.bf16.mxu0 %v5693_v2  ;;  %v539_v53 = vld [vmem:[#allocation4 + $0x2e8] sm:$0xff] }
 0x10e   : > { %3916 = vmatpush1.bf16.msra.mxu1 %v5828_v1  ;;  %v663_v56 = vld [vmem:[#allocation4 + $0x6c8] sm:$0xff]  ;;  %v5908_v1 = vcombine.low %v671_v40, %v675_v41  ;;  %v5773_v2 = vcombine.high %v535_v52, %v539_v53 }
 0x10f   : > { %3917 = vmatprep.subr.bf16.mxu1 %v5821_v3  ;;  %v667_v57 = vld [vmem:[#allocation4 + $0x6e8] sm:$0xff] }
 0x110   : > { %3865 = vmatpush1.bf16.msra.mxu0 %v5692_v10  ;;  %v5901_v3 = vcombine.high %v663_v56, %v667_v57  ;;  %v527_v4 = vld [vmem:[#allocation4 + $0x288] sm:$0xff]  ;;  %v5772_v10 = vcombine.low %v535_v52, %v539_v53 }
 0x111   : > { %3866 = vmatprep.subr.bf16.mxu0 %v5685_v12  ;;  %v531_v5 = vld [vmem:[#allocation4 + $0x2a8] sm:$0xff] }
 0x112   : > { %3918 = vmatpush1.bf16.msra.mxu1 %v5820_v11  ;;  %v655_v6 = vld [vmem:[#allocation4 + $0x688] sm:$0xff]  ;;  %v5900_v11 = vcombine.low %v663_v56, %v667_v57  ;;  %v5765_v12 = vcombine.high %v527_v4, %v531_v5 }
 0x113   : > { %3919 = vmatprep.subr.bf16.mxu1 %v5813_v13  ;;  %v659_v9 = vld [vmem:[#allocation4 + $0x6a8] sm:$0xff] }
 0x114   : > { %3867 = vmatpush1.bf16.msra.mxu0 %v5684_v45  ;;  %v5893_v13 = vcombine.high %v655_v6, %v659_v9  ;;  %v519_v14 = vld [vmem:[#allocation4 + $0x248] sm:$0xff]  ;;  %v5764_v45 = vcombine.low %v527_v4, %v531_v5 }
 0x115   : > { %3868 = vmatprep.subr.bf16.mxu0 %v5805_v18  ;;  %v523_v16 = vld [vmem:[#allocation4 + $0x268] sm:$0xff] }
 0x116   : > { %3920 = vmatpush1.bf16.msra.mxu1 %v5812_v46  ;;  %v647_v17 = vld [vmem:[#allocation4 + $0x648] sm:$0xff]  ;;  %v5892_v46 = vcombine.low %v655_v6, %v659_v9  ;;  %v5757_v18 = vcombine.high %v519_v14, %v523_v16 }
 0x117   : > { %3921 = vmatprep.subr.bf16.mxu1 %v5933_v19  ;;  %v651_v42 = vld [vmem:[#allocation4 + $0x668] sm:$0xff] }
 0x118   : > { %3869 = vmatpush2.bf16.msra.mxu0 %v5804_v27  ;;  %v5885_v19 = vcombine.high %v647_v17, %v651_v42  ;;  %v511_v20 = vld [vmem:[#allocation4 + $0x208] sm:$0xff]  ;;  %v5756_v27 = vcombine.low %v519_v14, %v523_v16 }
 0x119   : > { %3870 = vmatprep.subr.bf16.mxu0 %v5797_v30  ;;  %v515_v22 = vld [vmem:[#allocation4 + $0x228] sm:$0xff] }
 0x11a   : > { %3922 = vmatpush2.bf16.msra.mxu1 %v5932_v29  ;;  %v639_v23 = vld [vmem:[#allocation4 + $0x608] sm:$0xff]  ;;  %v5884_v29 = vcombine.low %v647_v17, %v651_v42  ;;  %v5749_v30 = vcombine.high %v511_v20, %v515_v22 }
 0x11b   : > { %3923 = vmatprep.subr.bf16.mxu1 %v5925_v31  ;;  %v643_v24 = vld [vmem:[#allocation4 + $0x628] sm:$0xff] }
 0x11c   : > { %3871 = vmatpush2.bf16.msra.mxu0 %v5796_v60  ;;  %v5877_v31 = vcombine.high %v639_v23, %v643_v24  ;;  %v759_v32 = vld [vmem:[#allocation4 + $0x9c8] sm:$0xff]  ;;  %v5748_v60 = vcombine.low %v511_v20, %v515_v22 }
 0x11d   : > { %3872 = vmatprep.subr.bf16.mxu0 %v5789_v36  ;;  %v763_v54 = vld [vmem:[#allocation4 + $0x9e8] sm:$0xff] }
 0x11e   : > { %3924 = vmatpush2.bf16.msra.mxu1 %v5924_v35  ;;  %v887_v33 = vld [vmem:[#allocation4 + $0xdc8] sm:$0xff]  ;;  %v5876_v35 = vcombine.low %v639_v23, %v643_v24  ;;  %v5997_v36 = vcombine.high %v759_v32, %v763_v54 }
 0x11f   : > { %3925 = vmatprep.subr.bf16.mxu1 %v5917_v37  ;;  %v891_v34 = vld [vmem:[#allocation4 + $0xde8] sm:$0xff] }
 0x120   : > { %3873 = vmatpush2.bf16.msra.mxu0 %v5788_v47  ;;  %v6125_v37 = vcombine.high %v887_v33, %v891_v34  ;;  %v751_v38 = vld [vmem:[#allocation4 + $0x988] sm:$0xff]  ;;  %v5996_v47 = vcombine.low %v759_v32, %v763_v54 }
 0x121   : > { %3874 = vmatprep.subr.bf16.mxu0 %v5781_v50  ;;  %v755_v39 = vld [vmem:[#allocation4 + $0x9a8] sm:$0xff] }
 0x122   : > { %3926 = vmatpush2.bf16.msra.mxu1 %v5916_v49  ;;  %v879_v40 = vld [vmem:[#allocation4 + $0xd88] sm:$0xff]  ;;  %v6124_v49 = vcombine.low %v887_v33, %v891_v34  ;;  %v5989_v50 = vcombine.high %v751_v38, %v755_v39 }
 0x123   : > { %3927 = vmatprep.subr.bf16.mxu1 %v5909_v51  ;;  %v883_v41 = vld [vmem:[#allocation4 + $0xda8] sm:$0xff] }
 0x124   : > { %3875 = vmatpush2.bf16.msra.mxu0 %v5780_v0  ;;  %v6117_v51 = vcombine.high %v879_v40, %v883_v41  ;;  %v743_v52 = vld [vmem:[#allocation4 + $0x948] sm:$0xff]  ;;  %v5988_v0 = vcombine.low %v751_v38, %v755_v39 }
 0x125   : > { %3876 = vmatprep.subr.bf16.mxu0 %v5773_v2  ;;  %v747_v53 = vld [vmem:[#allocation4 + $0x968] sm:$0xff] }
 0x126   : > { %3928 = vmatpush2.bf16.msra.mxu1 %v5908_v1  ;;  %v871_v56 = vld [vmem:[#allocation4 + $0xd48] sm:$0xff]  ;;  %v6116_v1 = vcombine.low %v879_v40, %v883_v41  ;;  %v5981_v2 = vcombine.high %v743_v52, %v747_v53 }
 0x127   : > { %3929 = vmatprep.subr.bf16.mxu1 %v5901_v3  ;;  %v875_v57 = vld [vmem:[#allocation4 + $0xd68] sm:$0xff] }
 0x128   : > { %3877 = vmatpush2.bf16.msra.mxu0 %v5772_v10  ;;  %v6109_v3 = vcombine.high %v871_v56, %v875_v57  ;;  %v735_v4 = vld [vmem:[#allocation4 + $0x908] sm:$0xff]  ;;  %v5980_v10 = vcombine.low %v743_v52, %v747_v53 }
 0x129   : > { %3878 = vmatprep.subr.bf16.mxu0 %v5765_v12  ;;  %v739_v5 = vld [vmem:[#allocation4 + $0x928] sm:$0xff] }
 0x12a   : > { %3930 = vmatpush2.bf16.msra.mxu1 %v5900_v11  ;;  %v863_v6 = vld [vmem:[#allocation4 + $0xd08] sm:$0xff]  ;;  %v6108_v11 = vcombine.low %v871_v56, %v875_v57  ;;  %v5973_v12 = vcombine.high %v735_v4, %v739_v5 }
 0x12b   : > { %3931 = vmatprep.subr.bf16.mxu1 %v5893_v13  ;;  %v867_v9 = vld [vmem:[#allocation4 + $0xd28] sm:$0xff] }
 0x12c   : > { %3879 = vmatpush2.bf16.msra.mxu0 %v5764_v45  ;;  %v6101_v13 = vcombine.high %v863_v6, %v867_v9  ;;  %v727_v14 = vld [vmem:[#allocation4 + $0x8c8] sm:$0xff]  ;;  %v5972_v45 = vcombine.low %v735_v4, %v739_v5 }
 0x12d   : > { %3880 = vmatprep.subr.bf16.mxu0 %v5757_v18  ;;  %v731_v16 = vld [vmem:[#allocation4 + $0x8e8] sm:$0xff] }
 0x12e   : > { %3932 = vmatpush2.bf16.msra.mxu1 %v5892_v46  ;;  %v855_v17 = vld [vmem:[#allocation4 + $0xcc8] sm:$0xff]  ;;  %v6100_v46 = vcombine.low %v863_v6, %v867_v9  ;;  %v5965_v18 = vcombine.high %v727_v14, %v731_v16 }
 0x12f   : > { %3933 = vmatprep.subr.bf16.mxu1 %v5885_v19  ;;  %v859_v42 = vld [vmem:[#allocation4 + $0xce8] sm:$0xff] }
 0x130   : > { %3881 = vmatpush2.bf16.msra.mxu0 %v5756_v27  ;;  %v6093_v19 = vcombine.high %v855_v17, %v859_v42  ;;  %v719_v20 = vld [vmem:[#allocation4 + $0x888] sm:$0xff]  ;;  %v5964_v27 = vcombine.low %v727_v14, %v731_v16 }
 0x131   : > { %3882 = vmatprep.subr.bf16.mxu0 %v5749_v30  ;;  %v723_v22 = vld [vmem:[#allocation4 + $0x8a8] sm:$0xff] }
 0x132   : > { %3934 = vmatpush2.bf16.msra.mxu1 %v5884_v29  ;;  %v847_v23 = vld [vmem:[#allocation4 + $0xc88] sm:$0xff]  ;;  %v6092_v29 = vcombine.low %v855_v17, %v859_v42  ;;  %v5957_v30 = vcombine.high %v719_v20, %v723_v22 }
 0x133   : > { %3935 = vmatprep.subr.bf16.mxu1 %v5877_v31  ;;  %v851_v24 = vld [vmem:[#allocation4 + $0xca8] sm:$0xff] }
 0x134   : > { %3883 = vmatpush2.bf16.msra.mxu0 %v5748_v60  ;;  %v6085_v31 = vcombine.high %v847_v23, %v851_v24  ;;  %v711_v32 = vld [vmem:[#allocation4 + $0x848] sm:$0xff]  ;;  %v5956_v60 = vcombine.low %v719_v20, %v723_v22 }
 0x135   : > { %3958 = vmatprep.subr.bf16.mxu0 %v5997_v36  ;;  %v715_v54 = vld [vmem:[#allocation4 + $0x868] sm:$0xff] }
 0x136   : > { %3936 = vmatpush2.bf16.msra.mxu1 %v5876_v35  ;;  %v839_v33 = vld [vmem:[#allocation4 + $0xc48] sm:$0xff]  ;;  %v6084_v35 = vcombine.low %v847_v23, %v851_v24  ;;  %v5949_v36 = vcombine.high %v711_v32, %v715_v54 }
 0x137   : > { %4011 = vmatprep.subr.bf16.mxu1 %v6125_v37  ;;  %3885 = vmatmul.mubr.bf16.vlgmr.msra.gmra.mxu0 %v7100_v21  ;;  %v843_v34 = vld [vmem:[#allocation4 + $0xc68] sm:$0xff] }
 0x138   : > { %3959 = vmatpush1.bf16.msra.mxu0 %v5996_v47  ;;  %3894 = vmatprep.mubr.bf16.mxu0 %v7110_v55  ;;  %v6077_v37 = vcombine.high %v839_v33, %v843_v34  ;;  %v703_v38 = vld [vmem:[#allocation4 + $0x808] sm:$0xff]  ;;  %v5948_v47 = vcombine.low %v711_v32, %v715_v54 }
 0x139   : > { %3938 = vmatmul.mubr.bf16.vlgmr.msra.gmra.mxu1 %v7106_v25  ;;  %3960 = vmatprep.subr.bf16.mxu0 %v5989_v50  ;;  %v707_v39 = vld [vmem:[#allocation4 + $0x828] sm:$0xff] }
 0x13a   : > { %4012 = vmatpush1.bf16.msra.mxu1 %v6124_v49  ;;  %3947 = vmatprep.mubr.bf16.mxu1 %v7113_v59  ;;  %v831_v40 = vld [vmem:[#allocation4 + $0xc08] sm:$0xff]  ;;  %v6076_v49 = vcombine.low %v839_v33, %v843_v34  ;;  %v5941_v50 = vcombine.high %v703_v38, %v707_v39 }
 0x13b   : > { %4013 = vmatprep.subr.bf16.mxu1 %v6117_v51  ;;  %v835_v41 = vld [vmem:[#allocation4 + $0xc28] sm:$0xff] }
 0x13c   : > { %3961 = vmatpush1.bf16.msra.mxu0 %v5988_v0  ;;  %v6069_v51 = vcombine.high %v831_v40, %v835_v41  ;;  %v823_v52 = vld [vmem:[#allocation4 + $0xbc8] sm:$0xff]  ;;  %v5940_v0 = vcombine.low %v703_v38, %v707_v39 }
 0x13d   : > { %3962 = vmatprep.subr.bf16.mxu0 %v5981_v2  ;;  %v827_v53 = vld [vmem:[#allocation4 + $0xbe8] sm:$0xff] }
 0x13e   : > { %4014 = vmatpush1.bf16.msra.mxu1 %v6116_v1  ;;  %v951_v56 = vld [vmem:[#allocation4 + $0xfc8] sm:$0xff]  ;;  %v6068_v1 = vcombine.low %v831_v40, %v835_v41  ;;  %v6061_v2 = vcombine.high %v823_v52, %v827_v53 }
 0x13f   : > { %4015 = vmatprep.subr.bf16.mxu1 %v6109_v3  ;;  %3895 = vmatmul.mubr.bf16.gmra.mxu0 %v7120_v43  ;;  %v955_v57 = vld [vmem:[#allocation4 + $0xfe8] sm:$0xff] }
 0x140   : > { %3963 = vmatpush1.bf16.msra.mxu0 %v5980_v10  ;;  %3990 = vmatprep.mubr.bf16.mxu0 %v7136_v61  ;;  %v6189_v3 = vcombine.high %v951_v56, %v955_v57  ;;  %v815_v4 = vld [vmem:[#allocation4 + $0xb88] sm:$0xff]  ;;  %v6060_v10 = vcombine.low %v823_v52, %v827_v53 }
 0x141   : > { %3948 = vmatmul.mubr.bf16.gmra.mxu1 %v7132_v48  ;;  %3964 = vmatprep.subr.bf16.mxu0 %v5973_v12  ;;  %v819_v5 = vld [vmem:[#allocation4 + $0xba8] sm:$0xff] }
 0x142   : > { %4016 = vmatpush1.bf16.msra.mxu1 %v6108_v11  ;;  %4043 = vmatprep.mubr.bf16.mxu1 %v7141_v62  ;;  %v943_v6 = vld [vmem:[#allocation4 + $0xf88] sm:$0xff]  ;;  %v6188_v11 = vcombine.low %v951_v56, %v955_v57  ;;  %v6053_v12 = vcombine.high %v815_v4, %v819_v5 }
 0x143   : > { %4017 = vmatprep.subr.bf16.mxu1 %v6101_v13  ;;  %v947_v9 = vld [vmem:[#allocation4 + $0xfa8] sm:$0xff] }
 0x144   : > { %3965 = vmatpush1.bf16.msra.mxu0 %v5972_v45  ;;  %v6181_v13 = vcombine.high %v943_v6, %v947_v9  ;;  %v807_v14 = vld [vmem:[#allocation4 + $0xb48] sm:$0xff]  ;;  %v6052_v45 = vcombine.low %v815_v4, %v819_v5 }
 0x145   : > { %3966 = vmatprep.subr.bf16.mxu0 %v5965_v18  ;;  %v811_v16 = vld [vmem:[#allocation4 + $0xb68] sm:$0xff] }
 0x146   : > { %4018 = vmatpush1.bf16.msra.mxu1 %v6100_v46  ;;  %v935_v17 = vld [vmem:[#allocation4 + $0xf48] sm:$0xff]  ;;  %v6180_v46 = vcombine.low %v943_v6, %v947_v9  ;;  %v6045_v18 = vcombine.high %v807_v14, %v811_v16 }
 0x147   : > { %4019 = vmatprep.subr.bf16.mxu1 %v6093_v19  ;;  %v939_v42 = vld [vmem:[#allocation4 + $0xf68] sm:$0xff] }
 0x148   : > { %3967 = vmatpush1.bf16.msra.mxu0 %v5964_v27  ;;  %v6173_v19 = vcombine.high %v935_v17, %v939_v42  ;;  %v799_v20 = vld [vmem:[#allocation4 + $0xb08] sm:$0xff]  ;;  %v6044_v27 = vcombine.low %v807_v14, %v811_v16 }
 0x149   : > { %3968 = vmatprep.subr.bf16.mxu0 %v5957_v30  ;;  %v803_v22 = vld [vmem:[#allocation4 + $0xb28] sm:$0xff] }
 0x14a   : > { %4020 = vmatpush1.bf16.msra.mxu1 %v6092_v29  ;;  %v927_v23 = vld [vmem:[#allocation4 + $0xf08] sm:$0xff]  ;;  %v6172_v29 = vcombine.low %v935_v17, %v939_v42  ;;  %v6037_v30 = vcombine.high %v799_v20, %v803_v22  ;;  %v504_v17 = vld [vmem:[#allocation4 + $0x1d0] sm:$0xff] }
 0x14b   : > { %4021 = vmatprep.subr.bf16.mxu1 %v6085_v31  ;;  %v931_v24 = vld [vmem:[#allocation4 + $0xf28] sm:$0xff]  ;;  %v508_v42 = vld [vmem:[#allocation4 + $0x1f0] sm:$0xff] }
 0x14c   : > { %3969 = vmatpush1.bf16.msra.mxu0 %v5956_v60  ;;  %v6165_v31 = vcombine.high %v927_v23, %v931_v24  ;;  %v791_v32 = vld [vmem:[#allocation4 + $0xac8] sm:$0xff]  ;;  %v6036_v60 = vcombine.low %v799_v20, %v803_v22  ;;  %v958_v22 = vld [vmem:[#allocation6] sm:$0xff] }
 0x14d   : > { %3970 = vmatprep.subr.bf16.mxu0 %v5949_v36  ;;  %v795_v54 = vld [vmem:[#allocation4 + $0xae8] sm:$0xff] }
 0x14e   : > { %4022 = vmatpush1.bf16.msra.mxu1 %v6084_v35  ;;  %v919_v33 = vld [vmem:[#allocation4 + $0xec8] sm:$0xff]  ;;  %v6164_v35 = vcombine.low %v927_v23, %v931_v24  ;;  %v6029_v36 = vcombine.high %v791_v32, %v795_v54  ;;  %v5743_v23 = vcombine.high %v504_v17, %v508_v42 }
 0x14f   : > { %4023 = vmatprep.subr.bf16.mxu1 %v6077_v37  ;;  %v923_v34 = vld [vmem:[#allocation4 + $0xee8] sm:$0xff] }
 0x150   : > { %3971 = vmatpush1.bf16.msra.mxu0 %v5948_v47  ;;  %v6157_v37 = vcombine.high %v919_v33, %v923_v34  ;;  %v783_v38 = vld [vmem:[#allocation4 + $0xa88] sm:$0xff]  ;;  %v6028_v47 = vcombine.low %v791_v32, %v795_v54  ;;  %v5742_v54 = vcombine.low %v504_v17, %v508_v42  ;;  %v472_v17 = vld [vmem:[#allocation4 + $0xd0] sm:$0xff] }
 0x151   : > { %3972 = vmatprep.subr.bf16.mxu0 %v5941_v50  ;;  %v787_v39 = vld [vmem:[#allocation4 + $0xaa8] sm:$0xff]  ;;  %v476_v42 = vld [vmem:[#allocation4 + $0xf0] sm:$0xff] }
 0x152   : > { %4024 = vmatpush1.bf16.msra.mxu1 %v6076_v49  ;;  %v911_v40 = vld [vmem:[#allocation4 + $0xe88] sm:$0xff]  ;;  %v6156_v49 = vcombine.low %v919_v33, %v923_v34  ;;  %v6021_v50 = vcombine.high %v783_v38, %v787_v39 }
 0x153   : > { %4025 = vmatprep.subr.bf16.mxu1 %v6069_v51  ;;  %v915_v41 = vld [vmem:[#allocation4 + $0xea8] sm:$0xff] }
 0x154   : > { %3973 = vmatpush1.bf16.msra.mxu0 %v5940_v0  ;;  %v6149_v51 = vcombine.high %v911_v40, %v915_v41  ;;  %v775_v52 = vld [vmem:[#allocation4 + $0xa48] sm:$0xff]  ;;  %v6020_v0 = vcombine.low %v783_v38, %v787_v39  ;;  %v616_v38 = vld [vmem:[#allocation4 + $0x550] sm:$0xff] }
 0x155   : > { %3974 = vmatprep.subr.bf16.mxu0 %v6061_v2  ;;  %v779_v53 = vld [vmem:[#allocation4 + $0xa68] sm:$0xff]  ;;  %v6148_v2 = vcombine.low %v911_v40, %v915_v41  ;;  %v620_v39 = vld [vmem:[#allocation4 + $0x570] sm:$0xff] }
 0x156   : > { %4026 = vmatpush1.bf16.msra.mxu1 %v6068_v1  ;;  %v903_v56 = vld [vmem:[#allocation4 + $0xe48] sm:$0xff]  ;;  %v960_v1 = vlaneseq }
 0x157   : > { %4027 = vmatprep.subr.bf16.mxu1 %v6189_v3  ;;  %v907_v57 = vld [vmem:[#allocation4 + $0xe68] sm:$0xff]  ;;  %v6013_v3 = vcombine.high %v775_v52, %v779_v53 }
 0x158   : > { %3975 = vmatpush2.bf16.msra.mxu0 %v6060_v10  ;;  %v6141_v4 = vcombine.high %v903_v56, %v907_v57  ;;  %v767_v5 = vld [vmem:[#allocation4 + $0xa08] sm:$0xff] }
 0x159   : > { %3976 = vmatprep.subr.bf16.mxu0 %v6053_v12  ;;  %v771_v6 = vld [vmem:[#allocation4 + $0xa28] sm:$0xff]  ;;  %v7182_v12 = vshrl.u32 %v960_v1, 7 }
 0x15a   : > { %4028 = vmatpush2.bf16.msra.mxu1 %v6188_v11  ;;  %v895_v9 = vld [vmem:[#allocation4 + $0xe08] sm:$0xff]  ;;  %v6012_v11 = vcombine.low %v775_v52, %v779_v53  ;;  %v6005_v14 = vcombine.high %v767_v5, %v771_v6 }
 0x15b   : > { %4029 = vmatprep.subr.bf16.mxu1 %v6181_v13  ;;  %v899_v10 = vld [vmem:[#allocation4 + $0xe28] sm:$0xff]  ;;  %v6140_v13 = vcombine.low %v903_v56, %v907_v57  ;;  %v5855_v56 = vcombine.high %v616_v38, %v620_v39  ;;  %v480_v57 = vld [vmem:[#allocation4 + $0x110] sm:$0xff] }
 0x15c   : > { %3977 = vmatpush2.bf16.msra.mxu0 %v6052_v45  ;;  %v6133_v16 = vcombine.high %v895_v9, %v899_v10  ;;  %v632_v45 = vld [vmem:[#allocation4 + $0x5d0] sm:$0xff]  ;;  %v6132_v20 = vcombine.low %v895_v9, %v899_v10  ;;  %v5854_v10 = vcombine.low %v616_v38, %v620_v39 }
 0x15d   : > { %3978 = vmatprep.subr.bf16.mxu0 %v6045_v18  ;;  %v6004_v18 = vcombine.low %v767_v5, %v771_v6 }
 0x15e   : > { %4030 = vmatpush2.bf16.msra.mxu1 %v6180_v46  ;;  %v636_v46 = vld [vmem:[#allocation4 + $0x5f0] sm:$0xff] }
 0x15f   : > { %4031 = vmatprep.subr.bf16.mxu1 %v6173_v19  ;;  %v962_v19 = vsub.s32 0, %v7182_v12  ;;  %v5871_v24 = vcombine.high %v632_v45, %v636_v46  ;;  %v5870_v33 = vcombine.low %v632_v45, %v636_v46  ;;  %v600_v45 = vld [vmem:[#allocation4 + $0x4d0] sm:$0xff] }
 0x160   : > { %3979 = vmatpush2.bf16.msra.mxu0 %v6044_v27  ;;  %v496_v27 = vld [vmem:[#allocation4 + $0x190] sm:$0xff] }
 0x161   : > { %3980 = vmatprep.subr.bf16.mxu0 %v6037_v30  ;;  %v624_v30 = vld [vmem:[#allocation4 + $0x590] sm:$0xff]  ;;  %v7185_v32 = vrot.slane %v958_v22, %v962_v19 }
 0x162   : > { %4032 = vmatpush2.bf16.msra.mxu1 %v6172_v29  ;;  %v500_v29 = vld [vmem:[#allocation4 + $0x1b0] sm:$0xff] }
 0x163   : > { %4033 = vmatprep.subr.bf16.mxu1 %v6165_v31  ;;  %v628_v31 = vld [vmem:[#allocation4 + $0x5b0] sm:$0xff]  ;;  %v5735_v34 = vcombine.high %v496_v27, %v500_v29 }
 0x164   : > { %3981 = vmatpush2.bf16.msra.mxu0 %v6036_v60  ;;  %v5863_v60 = vcombine.high %v624_v30, %v628_v31  ;;  %v604_v46 = vld [vmem:[#allocation4 + $0x4f0] sm:$0xff] }
 0x165   : > { %3982 = vmatprep.subr.bf16.mxu0 %v6029_v36  ;;  %v492_v36 = vld [vmem:[#allocation4 + $0x170] sm:$0xff]  ;;  %v5838_v38 = vcombine.low %v600_v45, %v604_v46 }
 0x166   : > { %4034 = vmatpush2.bf16.msra.mxu1 %v6164_v35  ;;  %v488_v35 = vld [vmem:[#allocation4 + $0x150] sm:$0xff] }
 0x167   : > { %4035 = vmatprep.subr.bf16.mxu1 %v6157_v37  ;;  %v5726_v6 = vcombine.low %v488_v35, %v492_v36 }
 0x168   : > { %3983 = vmatpush2.bf16.msra.mxu0 %v6028_v47  ;;  %v5734_v47 = vcombine.low %v496_v27, %v500_v29  ;;  %v5839_v29 = vcombine.high %v600_v45, %v604_v46  ;;  %v572_v45 = vld [vmem:[#allocation4 + $0x3f0] sm:$0xff] }
 0x169   : > { %3984 = vmatprep.subr.bf16.mxu0 %v6021_v50  ;;  %v5862_v50 = vcombine.low %v624_v30, %v628_v31  ;;  %v464_v30 = vld [vmem:[#allocation4 + $0x90] sm:$0xff] }
 0x16a   : > { %4036 = vmatpush2.bf16.msra.mxu1 %v6156_v49  ;;  %v468_v31 = vld [vmem:[#allocation4 + $0xb0] sm:$0xff] }
 0x16b   : > { %4037 = vmatprep.subr.bf16.mxu1 %v6149_v51  ;;  %v5727_v51 = vcombine.high %v488_v35, %v492_v36  ;;  %v5710_v36 = vcombine.low %v472_v17, %v476_v42  ;;  %v5703_v39 = vcombine.high %v464_v30, %v468_v31  ;;  %v696_v46 = vld [vmem:[#allocation4 + $0x7d0] sm:$0xff] }
 0x16c   : > { %3985 = vmatpush2.bf16.msra.mxu0 %v6020_v0  ;;  %v484_v0 = vld [vmem:[#allocation4 + $0x130] sm:$0xff] }
 0x16d   : > { %3986 = vmatprep.subr.bf16.mxu0 %v6013_v3  ;;  %v612_v3 = vld [vmem:[#allocation4 + $0x530] sm:$0xff]  ;;  %v5718_v19 = vcombine.low %v480_v57, %v484_v0 }
 0x16e   : > { %4038 = vmatpush2.bf16.msra.mxu1 %v6148_v2  ;;  %v608_v2 = vld [vmem:[#allocation4 + $0x510] sm:$0xff] }
 0x16f   : > { %4039 = vmatprep.subr.bf16.mxu1 %v6141_v4 }
 0x170   : > { %3987 = vmatpush2.bf16.msra.mxu0 %v6012_v11  ;;  %v5719_v11 = vcombine.high %v480_v57, %v484_v0  ;;  %v588_v57 = vld [vmem:[#allocation4 + $0x470] sm:$0xff]  ;;  %v5702_v0 = vcombine.low %v464_v30, %v468_v31 }
 0x171   : > { %3988 = vmatprep.subr.bf16.mxu0 %v6005_v14  ;;  %v688_v30 = vld [vmem:[#allocation4 + $0x790] sm:$0xff] }
 0x172   : > { %4040 = vmatpush2.bf16.msra.mxu1 %v6140_v13  ;;  %v692_v31 = vld [vmem:[#allocation4 + $0x7b0] sm:$0xff] }
 0x173   : > { %4041 = vmatprep.subr.bf16.mxu1 %v6133_v16  ;;  %v5847_v16 = vcombine.high %v608_v2, %v612_v3 }
 0x174   : > { %3989 = vmatpush2.bf16.msra.mxu0 %v6004_v18 }
 0x175   : > { %4064 = vmatprep.subr.bf16.mxu0 %v5743_v23  ;;  %v3674_v37 = vpop.f32.mrf.mxu0  ;;  %v5846_v23 = vcombine.low %v608_v2, %v612_v3  ;;  %v448_v3 = vld [vmem:[#allocation4 + $0x10] sm:$0xff] }
 0x176   : > { %4042 = vmatpush2.bf16.msra.mxu1 %v6132_v20  ;;  %v3675_v40 = vadd.f32 %v3674_v37, %v7185_v32 }
 0x177   : > { %4117 = vmatprep.subr.bf16.mxu1 %v5871_v24  ;;  %3991 = vmatmul.mubr.bf16.vlgmr.msra.gmra.mxu0 %v7151_v7  ;;  %v3727_v41 = vpop.f32.mrf.mxu1  ;;  %v7190_v49 = vpop.f32.mrf.mxu0  ;;  %v5711_v24 = vcombine.high %v472_v17, %v476_v42  ;;  %v568_v42 = vld [vmem:[#allocation4 + $0x3d0] sm:$0xff] }
 0x178   : > { %4065 = vmatpush1.bf16.msra.mxu0 %v5742_v54  ;;  %v7192_v52 = vadd.f32 %v3727_v41, %v3675_v40  ;;  %4000 = vmatprep.mubr.bf16.mxu0 %v7158_v15 }
 0x179   : > { %4044 = vmatmul.mubr.bf16.vlgmr.msra.gmra.mxu1 %v7155_v8  ;;  %4066 = vmatprep.subr.bf16.mxu0 %v5735_v34  ;;  %v7194_v53 = vpop.f32.mrf.mxu1  ;;  %v3678_v1 = vpop.f32.mrf.mxu0  ;;  %v592_v34 = vld [vmem:[#allocation4 + $0x490] sm:$0xff] }
 0x17a   : > { %4118 = vmatpush1.bf16.msra.mxu1 %v5870_v33  ;;  %4053 = vmatprep.mubr.bf16.mxu1 %v7161_v44  ;;  %v3679_v4 = vadd.f32 %v3678_v1, %v7185_v32 }
 0x17b   : > { %4119 = vmatprep.subr.bf16.mxu1 %v5863_v60  ;;  %v3731_v5 = vpop.f32.mrf.mxu1  ;;  %v7199_v9 = vpop.f32.mrf.mxu0  ;;  %v596_v60 = vld [vmem:[#allocation4 + $0x4b0] sm:$0xff] }
 0x17c   : > { %4067 = vmatpush1.bf16.msra.mxu0 %v5734_v47  ;;  %v7201_v13 = vadd.f32 %v3731_v5, %v3679_v4  ;;  %v5831_v41 = vcombine.high %v592_v34, %v596_v60  ;;  %v456_v47 = vld [vmem:[#allocation4 + $0x50] sm:$0xff]  ;;  %v5830_v1 = vcombine.low %v592_v34, %v596_v60  ;;  %v5806_v34 = vcombine.low %v568_v42, %v572_v45 }
 0x17d   : > { %4068 = vmatprep.subr.bf16.mxu0 %v5727_v51  ;;  %v7203_v14 = vpop.f32.mrf.mxu1  ;;  %v452_v4 = vld [vmem:[#allocation4 + $0x30] sm:$0xff] }
 0x17e   : > { %4120 = vmatpush1.bf16.msra.mxu1 %v5862_v50  ;;  %v3684_v18 = vpop.f32.mrf.mxu0  ;;  %v460_v50 = vld [vmem:[#allocation4 + $0x70] sm:$0xff] }
 0x17f   : > { %4121 = vmatprep.subr.bf16.mxu1 %v5855_v56  ;;  %4001 = vmatmul.mubr.bf16.gmra.mxu0 %v7165_v26  ;;  %v3685_v20 = vadd.f32 %v3684_v18, %v7185_v32  ;;  %v3737_v22 = vpop.f32.mrf.mxu1  ;;  %v584_v56 = vld [vmem:[#allocation4 + $0x450] sm:$0xff]  ;;  %v5695_v2 = vcombine.high %v456_v47, %v460_v50 }
 0x180   : > { %4069 = vmatpush1.bf16.msra.mxu0 %v5726_v6  ;;  %v7208_v27 = vpop.f32.mrf.mxu0  ;;  %4096 = vmatprep.mubr.bf16.mxu0 %v7084_v58  ;;  %v576_v5 = vld [vmem:[#allocation4 + $0x410] sm:$0xff] }
 0x181   : > { %4054 = vmatmul.mubr.bf16.gmra.mxu1 %v7168_v28  ;;  %4070 = vmatprep.subr.bf16.mxu0 %v5719_v11  ;;  %v7210_v54 = vadd.f32 %v3737_v22, %v3685_v20  ;;  %v7212_v33 = vpop.f32.mrf.mxu1  ;;  %v580_v6 = vld [vmem:[#allocation4 + $0x430] sm:$0xff]  ;;  %v5822_v11 = vcombine.low %v584_v56, %v588_v57  ;;  %v5807_v22 = vcombine.high %v568_v42, %v572_v45 }
 0x182   : > { %4122 = vmatpush1.bf16.msra.mxu1 %v5854_v10  ;;  %v3688_v35 = vpop.f32.mrf.mxu0  ;;  %4149 = vmatprep.mubr.bf16.mxu1 %v7094_v63  ;;  %v5694_v10 = vcombine.low %v456_v47, %v460_v50  ;;  %v5815_v17 = vcombine.high %v576_v5, %v580_v6  ;;  %v700_v18 = vld [vmem:[#allocation4 + $0x7f0] sm:$0xff]  ;;  %v5814_v20 = vcombine.low %v576_v5, %v580_v6 }
 0x183   : > { %4123 = vmatprep.subr.bf16.mxu1 %v5847_v16  ;;  %v3689_v37 = vadd.f32 %v3688_v35, %v7185_v32  ;;  %v3741_v40 = vpop.f32.mrf.mxu1  ;;  %v5823_v32 = vcombine.high %v584_v56, %v588_v57  ;;  %v5687_v16 = vcombine.high %v448_v3, %v452_v4  ;;  %v5934_v60 = vcombine.low %v696_v46, %v700_v18  ;;  %v544_v57 = vld [vmem:[#allocation4 + $0x310] sm:$0xff] }
 0x184   : > { %4071 = vmatpush1.bf16.msra.mxu0 %v5718_v19  ;;  %v5686_v19 = vcombine.low %v448_v3, %v452_v4  ;;  %v5926_v47 = vcombine.low %v688_v30, %v692_v31  ;;  %v536_v6 = vld [vmem:[#allocation4 + $0x2d0] sm:$0xff] }
 0x185   : > { %4072 = vmatprep.subr.bf16.mxu0 %v5711_v24  ;;  %v7217_v51 = vadd.f32 %v3741_v40, %v3689_v37  ;;  %v560_v24 = vld [vmem:[#allocation4 + $0x390] sm:$0xff] }
 0x186   : > { %4124 = vmatpush1.bf16.msra.mxu1 %v5846_v23  ;;  %v5935_v23 = vcombine.high %v696_v46, %v700_v18  ;;  %v552_v37 = vld [vmem:[#allocation4 + $0x350] sm:$0xff] }
 0x187   : > { %4125 = vmatprep.subr.bf16.mxu1 %v5839_v29  ;;  %v564_v29 = vld [vmem:[#allocation4 + $0x3b0] sm:$0xff] }
 0x188   : > { %4073 = vmatpush1.bf16.msra.mxu0 %v5710_v36  ;;  %v5799_v35 = vcombine.high %v560_v24, %v564_v29  ;;  %v5927_v36 = vcombine.high %v688_v30, %v692_v31  ;;  %v684_v40 = vld [vmem:[#allocation4 + $0x770] sm:$0xff] }
 0x189   : > { %4074 = vmatprep.subr.bf16.mxu0 %v5703_v39  ;;  %v680_v39 = vld [vmem:[#allocation4 + $0x750] sm:$0xff] }
 0x18a   : > { %4126 = vmatpush1.bf16.msra.mxu1 %v5838_v38  ;;  %v556_v38 = vld [vmem:[#allocation4 + $0x370] sm:$0xff]  ;;  %v5919_v56 = vcombine.high %v680_v39, %v684_v40  ;;  %v5918_v3 = vcombine.low %v680_v39, %v684_v40 }
 0x18b   : > { %4127 = vmatprep.subr.bf16.mxu1 %v5831_v41  ;;  %v5798_v41 = vcombine.low %v560_v24, %v564_v29  ;;  %v5791_v50 = vcombine.high %v552_v37, %v556_v38  ;;  %v528_v18 = vld [vmem:[#allocation4 + $0x290] sm:$0xff] }
 0x18c   : > { %4075 = vmatpush1.bf16.msra.mxu0 %v5702_v0  ;;  %v548_v0 = vld [vmem:[#allocation4 + $0x330] sm:$0xff] }
 0x18d   : > { %4076 = vmatprep.subr.bf16.mxu0 %v5695_v2  ;;  %v676_v2 = vld [vmem:[#allocation4 + $0x730] sm:$0xff]  ;;  %v5783_v4 = vcombine.high %v544_v57, %v548_v0 }
 0x18e   : > { %4128 = vmatpush1.bf16.msra.mxu1 %v5830_v1  ;;  %v672_v1 = vld [vmem:[#allocation4 + $0x710] sm:$0xff] }
 0x18f   : > { %4129 = vmatprep.subr.bf16.mxu1 %v5823_v32  ;;  %v5790_v32 = vcombine.low %v552_v37, %v556_v38  ;;  %v5911_v5 = vcombine.high %v672_v1, %v676_v2  ;;  %v5910_v42 = vcombine.low %v672_v1, %v676_v2  ;;  %v520_v31 = vld [vmem:[#allocation4 + $0x250] sm:$0xff] }
 0x190   : > { %4077 = vmatpush1.bf16.msra.mxu0 %v5694_v10  ;;  %v540_v10 = vld [vmem:[#allocation4 + $0x2f0] sm:$0xff] }
 0x191   : > { %4078 = vmatprep.subr.bf16.mxu0 %v5687_v16  ;;  %v668_v16 = vld [vmem:[#allocation4 + $0x6f0] sm:$0xff]  ;;  %v5775_v45 = vcombine.high %v536_v6, %v540_v10 }
 0x192   : > { %4130 = vmatpush1.bf16.msra.mxu1 %v5822_v11  ;;  %v664_v11 = vld [vmem:[#allocation4 + $0x6d0] sm:$0xff] }
 0x193   : > { %4131 = vmatprep.subr.bf16.mxu1 %v5815_v17  ;;  %v5782_v17 = vcombine.low %v544_v57, %v548_v0  ;;  %v5903_v46 = vcombine.high %v664_v11, %v668_v16  ;;  %v5902_v24 = vcombine.low %v664_v11, %v668_v16  ;;  %v512_v40 = vld [vmem:[#allocation4 + $0x210] sm:$0xff] }
 0x194   : > { %4079 = vmatpush1.bf16.msra.mxu0 %v5686_v19  ;;  %v532_v19 = vld [vmem:[#allocation4 + $0x2b0] sm:$0xff] }
 0x195   : > { %4080 = vmatprep.subr.bf16.mxu0 %v5807_v22  ;;  %v660_v22 = vld [vmem:[#allocation4 + $0x6b0] sm:$0xff]  ;;  %v5767_v29 = vcombine.high %v528_v18, %v532_v19 }
 0x196   : > { %4132 = vmatpush1.bf16.msra.mxu1 %v5814_v20  ;;  %v656_v20 = vld [vmem:[#allocation4 + $0x690] sm:$0xff] }
 0x197   : > { %4133 = vmatprep.subr.bf16.mxu1 %v5935_v23  ;;  %v5774_v23 = vcombine.low %v536_v6, %v540_v10  ;;  %v5895_v30 = vcombine.high %v656_v20, %v660_v22  ;;  %v5894_v37 = vcombine.low %v656_v20, %v660_v22  ;;  %v760_v2 = vld [vmem:[#allocation4 + $0x9d0] sm:$0xff]  ;;  %v7221_v22 = vpop.f32.mrf.mxu1 }
 0x198   : > { %4081 = vmatpush2.bf16.msra.mxu0 %v5806_v34  ;;  %v524_v34 = vld [vmem:[#allocation4 + $0x270] sm:$0xff] }
 0x199   : > { %4082 = vmatprep.subr.bf16.mxu0 %v5799_v35  ;;  %v652_v35 = vld [vmem:[#allocation4 + $0x670] sm:$0xff]  ;;  %v5759_v38 = vcombine.high %v520_v31, %v524_v34 }
 0x19a   : > { %4134 = vmatpush2.bf16.msra.mxu1 %v5934_v60  ;;  %v648_v60 = vld [vmem:[#allocation4 + $0x650] sm:$0xff] }
 0x19b   : > { %4135 = vmatprep.subr.bf16.mxu1 %v5927_v36  ;;  %v5766_v36 = vcombine.low %v528_v18, %v532_v19  ;;  %v5887_v39 = vcombine.high %v648_v60, %v652_v35  ;;  %v5886_v57 = vcombine.low %v648_v60, %v652_v35  ;;  %v752_v16 = vld [vmem:[#allocation4 + $0x990] sm:$0xff]  ;;  %v7219_v18 = vpop.f32.mrf.mxu0 }
 0x19c   : > { %4083 = vmatpush2.bf16.msra.mxu0 %v5798_v41  ;;  %v516_v41 = vld [vmem:[#allocation4 + $0x230] sm:$0xff] }
 0x19d   : > { %4084 = vmatprep.subr.bf16.mxu0 %v5791_v50  ;;  %v644_v50 = vld [vmem:[#allocation4 + $0x630] sm:$0xff]  ;;  %v5751_v0 = vcombine.high %v512_v40, %v516_v41 }
 0x19e   : > { %4136 = vmatpush2.bf16.msra.mxu1 %v5926_v47  ;;  %v640_v47 = vld [vmem:[#allocation4 + $0x610] sm:$0xff] }
 0x19f   : > { %4137 = vmatprep.subr.bf16.mxu1 %v5919_v56  ;;  %v5758_v56 = vcombine.low %v520_v31, %v524_v34  ;;  %v5879_v1 = vcombine.high %v640_v47, %v644_v50  ;;  %v5878_v6 = vcombine.low %v640_v47, %v644_v50  ;;  %v872_v31 = vld [vmem:[#allocation4 + $0xd50] sm:$0xff] }
 0x1a0   : > { %4085 = vmatpush2.bf16.msra.mxu0 %v5790_v32  ;;  %v764_v32 = vld [vmem:[#allocation4 + $0x9f0] sm:$0xff] }
 0x1a1   : > { %4086 = vmatprep.subr.bf16.mxu0 %v5783_v4  ;;  %v892_v4 = vld [vmem:[#allocation4 + $0xdf0] sm:$0xff]  ;;  %v5999_v10 = vcombine.high %v760_v2, %v764_v32 }
 0x1a2   : > { %4138 = vmatpush2.bf16.msra.mxu1 %v5918_v3  ;;  %v888_v3 = vld [vmem:[#allocation4 + $0xdd0] sm:$0xff] }
 0x1a3   : > { %4139 = vmatprep.subr.bf16.mxu1 %v5911_v5  ;;  %v5750_v5 = vcombine.low %v512_v40, %v516_v41  ;;  %v6127_v11 = vcombine.high %v888_v3, %v892_v4  ;;  %v6126_v19 = vcombine.low %v888_v3, %v892_v4  ;;  %v876_v34 = vld [vmem:[#allocation4 + $0xd70] sm:$0xff] }
 0x1a4   : > { %4087 = vmatpush2.bf16.msra.mxu0 %v5782_v17  ;;  %v756_v17 = vld [vmem:[#allocation4 + $0x9b0] sm:$0xff]  ;;  %v6111_v41 = vcombine.high %v872_v31, %v876_v34  ;;  %v6110_v4 = vcombine.low %v872_v31, %v876_v34 }
 0x1a5   : > { %4088 = vmatprep.subr.bf16.mxu0 %v5775_v45  ;;  %v884_v45 = vld [vmem:[#allocation4 + $0xdb0] sm:$0xff]  ;;  %v5991_v20 = vcombine.high %v752_v16, %v756_v17 }
 0x1a6   : > { %4140 = vmatpush2.bf16.msra.mxu1 %v5910_v42  ;;  %v880_v42 = vld [vmem:[#allocation4 + $0xd90] sm:$0xff] }
 0x1a7   : > { %4141 = vmatprep.subr.bf16.mxu1 %v5903_v46  ;;  %v5998_v46 = vcombine.low %v760_v2, %v764_v32  ;;  %v736_v47 = vld [vmem:[#allocation4 + $0x910] sm:$0xff] }
 0x1a8   : > { %4089 = vmatpush2.bf16.msra.mxu0 %v5774_v23  ;;  %v6119_v23 = vcombine.high %v880_v42, %v884_v45  ;;  %v740_v50 = vld [vmem:[#allocation4 + $0x930] sm:$0xff] }
 0x1a9   : > { %4090 = vmatprep.subr.bf16.mxu0 %v5767_v29  ;;  %v748_v29 = vld [vmem:[#allocation4 + $0x970] sm:$0xff] }
 0x1aa   : > { %4142 = vmatpush2.bf16.msra.mxu1 %v5902_v24  ;;  %v744_v24 = vld [vmem:[#allocation4 + $0x950] sm:$0xff] }
 0x1ab   : > { %4143 = vmatprep.subr.bf16.mxu1 %v5895_v30  ;;  %v5982_v32 = vcombine.low %v744_v24, %v748_v29  ;;  %v720_v34 = vld [vmem:[#allocation4 + $0x890] sm:$0xff] }
 0x1ac   : > { %4091 = vmatpush2.bf16.msra.mxu0 %v5766_v36  ;;  %v5990_v36 = vcombine.low %v752_v16, %v756_v17  ;;  %v728_v16 = vld [vmem:[#allocation4 + $0x8d0] sm:$0xff] }
 0x1ad   : > { %4092 = vmatprep.subr.bf16.mxu0 %v5759_v38  ;;  %v6118_v38 = vcombine.low %v880_v42, %v884_v45  ;;  %v732_v17 = vld [vmem:[#allocation4 + $0x8f0] sm:$0xff] }
 0x1ae   : > { %4144 = vmatpush2.bf16.msra.mxu1 %v5894_v37  ;;  %v856_v45 = vld [vmem:[#allocation4 + $0xcd0] sm:$0xff] }
 0x1af   : > { %4145 = vmatprep.subr.bf16.mxu1 %v5887_v39  ;;  %v5983_v39 = vcombine.high %v744_v24, %v748_v29  ;;  %v5967_v29 = vcombine.high %v728_v16, %v732_v17 }
 0x1b0   : > { %4093 = vmatpush2.bf16.msra.mxu0 %v5758_v56 }
 0x1b1   : > { %4094 = vmatprep.subr.bf16.mxu0 %v5751_v0  ;;  %v868_v0 = vld [vmem:[#allocation4 + $0xd30] sm:$0xff] }
 0x1b2   : > { %4146 = vmatpush2.bf16.msra.mxu1 %v5886_v57  ;;  %v864_v57 = vld [vmem:[#allocation4 + $0xd10] sm:$0xff] }
 0x1b3   : > { %4147 = vmatprep.subr.bf16.mxu1 %v5879_v1  ;;  %v6102_v24 = vcombine.low %v864_v57, %v868_v0 }
 0x1b4   : > { %4095 = vmatpush2.bf16.msra.mxu0 %v5750_v5  ;;  %v5975_v5 = vcombine.high %v736_v47, %v740_v50 }
 0x1b5   : > { %4170 = vmatprep.subr.bf16.mxu0 %v5999_v10 }
 0x1b6   : > { %4148 = vmatpush2.bf16.msra.mxu1 %v5878_v6 }
 0x1b7   : > { %4223 = vmatprep.subr.bf16.mxu1 %v6127_v11  ;;  %v3780_v30 = vpop.f32.mrf.mxu0  ;;  %4097 = vmatmul.mubr.bf16.vlgmr.msra.gmra.mxu0 %v7100_v21  ;;  %v6103_v11 = vcombine.high %v864_v57, %v868_v0  ;;  %v712_v0 = vld [vmem:[#allocation4 + $0x850] sm:$0xff] }
 0x1b8   : > { %v3781_v60 = vadd.f32 %v3780_v30, %v7192_v52  ;;  %4171 = vmatpush1.bf16.msra.mxu0 %v5998_v46  ;;  %4106 = vmatprep.mubr.bf16.mxu0 %v7110_v55 }
 0x1b9   : > { %v3833_v35 = vpop.f32.mrf.mxu1  ;;  %4150 = vmatmul.mubr.bf16.vlgmr.msra.gmra.mxu1 %v7106_v25  ;;  %v7226_v37 = vpop.f32.mrf.mxu0  ;;  %4172 = vmatprep.subr.bf16.mxu0 %v5991_v20  ;;  %v5974_v20 = vcombine.low %v736_v47, %v740_v50  ;;  %v5966_v47 = vcombine.low %v728_v16, %v732_v17  ;;  %v708_v16 = vld [vmem:[#allocation4 + $0x830] sm:$0xff] }
 0x1ba   : > { %4224 = vmatpush1.bf16.msra.mxu1 %v6126_v19  ;;  %v3834_v52 = vadd.f32 %v3833_v35, %v3781_v60  ;;  %4159 = vmatprep.mubr.bf16.mxu1 %v7113_v59  ;;  %v724_v60 = vld [vmem:[#allocation4 + $0x8b0] sm:$0xff] }
 0x1bb   : > { %v7228_v40 = vpop.f32.mrf.mxu1  ;;  %4225 = vmatprep.subr.bf16.mxu1 %v6119_v23  ;;  %v3784_v56 = vpop.f32.mrf.mxu0  ;;  %v832_v17 = vld [vmem:[#allocation4 + $0xc10] sm:$0xff] }
 0x1bc   : > { %v3785_v1 = vadd.f32 %v3784_v56, %v7201_v13  ;;  %4173 = vmatpush1.bf16.msra.mxu0 %v5990_v36  ;;  %6557 = vtanh.f32 %v3834_v52  ;;  %v860_v13 = vld [vmem:[#allocation4 + $0xcf0] sm:$0xff]  ;;  %v5959_v52 = vcombine.high %v720_v34, %v724_v60 }
 0x1bd   : > { %v3837_v2 = vpop.f32.mrf.mxu1  ;;  %v7233_v3 = vpop.f32.mrf.mxu0  ;;  %4174 = vmatprep.subr.bf16.mxu0 %v5983_v39  ;;  %v6095_v31 = vcombine.high %v856_v45, %v860_v13  ;;  %v848_v36 = vld [vmem:[#allocation4 + $0xc90] sm:$0xff]  ;;  %v6094_v50 = vcombine.low %v856_v45, %v860_v13 }
 0x1be   : > { %4226 = vmatpush1.bf16.msra.mxu1 %v6118_v38  ;;  %v3838_v6 = vadd.f32 %v3837_v2, %v3785_v1  ;;  %v852_v38 = vld [vmem:[#allocation4 + $0xcb0] sm:$0xff] }
 0x1bf   : > { %v7235_v10 = vpop.f32.mrf.mxu1  ;;  %4227 = vmatprep.subr.bf16.mxu1 %v6111_v41  ;;  %v3790_v42 = vpop.f32.mrf.mxu0  ;;  %4107 = vmatmul.mubr.bf16.gmra.mxu0 %v7120_v43  ;;  %v6087_v57 = vcombine.high %v848_v36, %v852_v38  ;;  %v716_v1 = vld [vmem:[#allocation4 + $0x870] sm:$0xff] }
 0x1c0   : > { %6559 = vtanh.f32 %v3838_v6  ;;  %v3791_v46 = vadd.f32 %v3790_v42, %v7210_v54  ;;  %4175 = vmatpush1.bf16.msra.mxu0 %v5982_v32  ;;  %4202 = vmatprep.mubr.bf16.mxu0 %v7136_v61  ;;  %v840_v2 = vld [vmem:[#allocation4 + $0xc50] sm:$0xff]  ;;  %v5950_v13 = vcombine.low %v712_v0, %v716_v1 }
 0x1c1   : > { %v3843_v19 = vpop.f32.mrf.mxu1  ;;  %4160 = vmatmul.mubr.bf16.gmra.mxu1 %v7132_v48  ;;  %v7240_v23 = vpop.f32.mrf.mxu0  ;;  %4176 = vmatprep.subr.bf16.mxu0 %v5975_v5  ;;  %v844_v32 = vld [vmem:[#allocation4 + $0xc70] sm:$0xff]  ;;  %v5951_v5 = vcombine.high %v712_v0, %v716_v1 }
 0x1c2   : > { %4228 = vmatpush1.bf16.msra.mxu1 %v6110_v4  ;;  %v3844_v54 = vadd.f32 %v3843_v19, %v3791_v46  ;;  %4255 = vmatprep.mubr.bf16.mxu1 %v7141_v62  ;;  %v5958_v4 = vcombine.low %v720_v34, %v724_v60  ;;  %v6079_v6 = vcombine.high %v840_v2, %v844_v32  ;;  %v836_v42 = vld [vmem:[#allocation4 + $0xc30] sm:$0xff]  ;;  %v933_v34 = vld [vmem:[#allocation4 + $0xf38] sm:$0xff] }
 0x1c3   : > { %v7242_v30 = vpop.f32.mrf.mxu1  ;;  %4229 = vmatprep.subr.bf16.mxu1 %v6103_v11  ;;  %v3794_v35 = vpop.f32.mrf.mxu0  ;;  %v704_v11 = vld [vmem:[#allocation4 + $0x810] sm:$0xff]  ;;  %v6078_v19 = vcombine.low %v840_v2, %v844_v32 }
 0x1c4   : > { %v3795_v39 = vadd.f32 %v3794_v35, %v7217_v51  ;;  %4177 = vmatpush1.bf16.msra.mxu0 %v5974_v20  ;;  %6561 = vtanh.f32 %v3844_v54  ;;  %v6086_v51 = vcombine.low %v848_v36, %v852_v38  ;;  %v5943_v20 = vcombine.high %v704_v11, %v708_v16  ;;  %v952_v60 = vld [vmem:[#allocation4 + $0xfd0] sm:$0xff] }
 0x1c5   : > { %v3847_v41 = vpop.f32.mrf.mxu1  ;;  %4178 = vmatprep.subr.bf16.mxu0 %v5967_v29  ;;  %v824_v29 = vld [vmem:[#allocation4 + $0xbd0] sm:$0xff]  ;;  %v5942_v35 = vcombine.low %v704_v11, %v708_v16  ;;  %v6070_v36 = vcombine.low %v832_v17, %v836_v42 }
 0x1c6   : > { %4230 = vmatpush1.bf16.msra.mxu1 %v6102_v24  ;;  %v3848_v56 = vadd.f32 %v3847_v41, %v3795_v39  ;;  %v6071_v24 = vcombine.high %v832_v17, %v836_v42  ;;  %v956_v54 = vld [vmem:[#allocation4 + $0xff0] sm:$0xff] }
 0x1c7   : > { %4231 = vmatprep.subr.bf16.mxu1 %v6095_v31  ;;  %v828_v31 = vld [vmem:[#allocation4 + $0xbf0] sm:$0xff]  ;;  %v6191_v39 = vcombine.high %v952_v60, %v956_v54  ;;  %v6190_v1 = vcombine.low %v952_v60, %v956_v54 }
 0x1c8   : > { %6563 = vtanh.f32 %v3848_v56  ;;  %4179 = vmatpush1.bf16.msra.mxu0 %v5966_v47  ;;  %v6063_v38 = vcombine.high %v824_v29, %v828_v31  ;;  %v816_v41 = vld [vmem:[#allocation4 + $0xb90] sm:$0xff] }
 0x1c9   : > { %4180 = vmatprep.subr.bf16.mxu0 %v5959_v52  ;;  %v7247_v45 = vpop.eup %6557  ;;  %v820_v47 = vld [vmem:[#allocation4 + $0xbb0] sm:$0xff] }
 0x1ca   : > { %4232 = vmatpush1.bf16.msra.mxu1 %v6094_v50  ;;  %7597 = vst [vmem:[#allocation15_spill] sm:$0xff] %v7247_v45  ;;  %v944_v50 = vld [vmem:[#allocation4 + $0xf90] sm:$0xff]  ;;  %v6055_v2 = vcombine.high %v816_v41, %v820_v47  ;;  %v6054_v16 = vcombine.low %v816_v41, %v820_v47 }
 0x1cb   : > { %4233 = vmatprep.subr.bf16.mxu1 %v6087_v57  ;;  %v948_v52 = vld [vmem:[#allocation4 + $0xfb0] sm:$0xff]  ;;  %v6062_v57 = vcombine.low %v824_v29, %v828_v31 }
 0x1cc   : > { %4181 = vmatpush1.bf16.msra.mxu0 %v5958_v4  ;;  %v6183_v32 = vcombine.high %v944_v50, %v948_v52  ;;  %v808_v4 = vld [vmem:[#allocation4 + $0xb50] sm:$0xff]  ;;  %v6182_v17 = vcombine.low %v944_v50, %v948_v52 }
 0x1cd   : > { %v7249_v46 = vpop.eup %6559  ;;  %4182 = vmatprep.subr.bf16.mxu0 %v5951_v5  ;;  %v940_v11 = vld [vmem:[#allocation4 + $0xf70] sm:$0xff] }
 0x1ce   : > { %7598 = vst [vmem:[#allocation16_spill] sm:$0xff] %v7249_v46  ;;  %4234 = vmatpush1.bf16.msra.mxu1 %v6086_v51  ;;  %v812_v51 = vld [vmem:[#allocation4 + $0xb70] sm:$0xff] }
 0x1cf   : > { %4235 = vmatprep.subr.bf16.mxu1 %v6079_v6  ;;  %v936_v6 = vld [vmem:[#allocation4 + $0xf50] sm:$0xff]  ;;  %v6047_v42 = vcombine.high %v808_v4, %v812_v51  ;;  %v6046_v31 = vcombine.low %v808_v4, %v812_v51 }
 0x1d0   : > { %4183 = vmatpush1.bf16.msra.mxu0 %v5950_v13  ;;  %v6175_v13 = vcombine.high %v936_v6, %v940_v11  ;;  %v932_v29 = vld [vmem:[#allocation4 + $0xf30] sm:$0xff]  ;;  %v6174_v60 = vcombine.low %v936_v6, %v940_v11 }
 0x1d1   : > { %4184 = vmatprep.subr.bf16.mxu0 %v5943_v20  ;;  %v7253_v56 = vpop.eup %6561  ;;  %v804_v20 = vld [vmem:[#allocation4 + $0xb30] sm:$0xff] }
 0x1d2   : > { %4236 = vmatpush1.bf16.msra.mxu1 %v6078_v19  ;;  %7599 = vst [vmem:[#allocation17_spill] sm:$0xff] %v7253_v56  ;;  %v800_v19 = vld [vmem:[#allocation4 + $0xb10] sm:$0xff]  ;;  %v974_v56 = vsub.s32 3, %v7182_v12 }
 0x1d3   : > { %4237 = vmatprep.subr.bf16.mxu1 %v6071_v24  ;;  %v928_v24 = vld [vmem:[#allocation4 + $0xf10] sm:$0xff]  ;;  %v6039_v54 = vcombine.high %v800_v19, %v804_v20  ;;  %v6038_v47 = vcombine.low %v800_v19, %v804_v20 }
 0x1d4   : > { %4185 = vmatpush1.bf16.msra.mxu0 %v5942_v35  ;;  %v6167_v35 = vcombine.high %v928_v24, %v932_v29  ;;  %v924_v41 = vld [vmem:[#allocation4 + $0xef0] sm:$0xff]  ;;  %v6166_v50 = vcombine.low %v928_v24, %v932_v29 }
 0x1d5   : > { %v7255_v0 = vpop.eup %6563  ;;  %4186 = vmatprep.subr.bf16.mxu0 %v6063_v38  ;;  %v796_v38 = vld [vmem:[#allocation4 + $0xaf0] sm:$0xff] }
 0x1d6   : > { %7600 = vst [vmem:[#allocation18_spill] sm:$0xff] %v7255_v0  ;;  %4238 = vmatpush1.bf16.msra.mxu1 %v6070_v36  ;;  %v792_v36 = vld [vmem:[#allocation4 + $0xad0] sm:$0xff]  ;;  %v7315_v0 = vld [vmem:[#allocation6] sm:$0xff] }
 0x1d7   : > { %4239 = vmatprep.subr.bf16.mxu1 %v6191_v39  ;;  %v920_v39 = vld [vmem:[#allocation4 + $0xed0] sm:$0xff]  ;;  %v6031_v52 = vcombine.high %v792_v36, %v796_v38  ;;  %v6030_v51 = vcombine.low %v792_v36, %v796_v38 }
 0x1d8   : > { %4187 = vmatpush2.bf16.msra.mxu0 %v6062_v57  ;;  %v6159_v57 = vcombine.high %v920_v39, %v924_v41  ;;  %v916_v4 = vld [vmem:[#allocation4 + $0xeb0] sm:$0xff]  ;;  %v6158_v6 = vcombine.low %v920_v39, %v924_v41 }
 0x1d9   : > { %4188 = vmatprep.subr.bf16.mxu0 %v6055_v2  ;;  %v788_v2 = vld [vmem:[#allocation4 + $0xab0] sm:$0xff] }
 0x1da   : > { %4240 = vmatpush2.bf16.msra.mxu1 %v6190_v1  ;;  %v784_v1 = vld [vmem:[#allocation4 + $0xa90] sm:$0xff] }
 0x1db   : > { %4241 = vmatprep.subr.bf16.mxu1 %v6183_v32  ;;  %v912_v32 = vld [vmem:[#allocation4 + $0xe90] sm:$0xff]  ;;  %v6023_v11 = vcombine.high %v784_v1, %v788_v2  ;;  %v6022_v20 = vcombine.low %v784_v1, %v788_v2  ;;  %v637_v1 = vld [vmem:[#allocation4 + $0x5f8] sm:$0xff] }
 0x1dc   : > { %4189 = vmatpush2.bf16.msra.mxu0 %v6054_v16  ;;  %v6151_v16 = vcombine.high %v912_v32, %v916_v4  ;;  %v908_v19 = vld [vmem:[#allocation4 + $0xe70] sm:$0xff]  ;;  %v6150_v24 = vcombine.low %v912_v32, %v916_v4 }
 0x1dd   : > { %4190 = vmatprep.subr.bf16.mxu0 %v6047_v42  ;;  %v780_v42 = vld [vmem:[#allocation4 + $0xa70] sm:$0xff] }
 0x1de   : > { %4242 = vmatpush2.bf16.msra.mxu1 %v6182_v17  ;;  %v776_v17 = vld [vmem:[#allocation4 + $0xa50] sm:$0xff] }
 0x1df   : > { %4243 = vmatprep.subr.bf16.mxu1 %v6175_v13  ;;  %v904_v13 = vld [vmem:[#allocation4 + $0xe50] sm:$0xff]  ;;  %v6015_v29 = vcombine.high %v776_v17, %v780_v42  ;;  %v6014_v38 = vcombine.low %v776_v17, %v780_v42  ;;  %v629_v17 = vld [vmem:[#allocation4 + $0x5b8] sm:$0xff] }
 0x1e0   : > { %4191 = vmatpush2.bf16.msra.mxu0 %v6046_v31  ;;  %v6143_v31 = vcombine.high %v904_v13, %v908_v19  ;;  %v900_v36 = vld [vmem:[#allocation4 + $0xe30] sm:$0xff]  ;;  %v6142_v39 = vcombine.low %v904_v13, %v908_v19 }
 0x1e1   : > { %4192 = vmatprep.subr.bf16.mxu0 %v6039_v54  ;;  %v772_v54 = vld [vmem:[#allocation4 + $0xa30] sm:$0xff] }
 0x1e2   : > { %4244 = vmatpush2.bf16.msra.mxu1 %v6174_v60  ;;  %v768_v60 = vld [vmem:[#allocation4 + $0xa10] sm:$0xff] }
 0x1e3   : > { %4245 = vmatprep.subr.bf16.mxu1 %v6167_v35  ;;  %v896_v35 = vld [vmem:[#allocation4 + $0xe10] sm:$0xff]  ;;  %v6007_v41 = vcombine.high %v768_v60, %v772_v54  ;;  %v6006_v2 = vcombine.low %v768_v60, %v772_v54  ;;  %v621_v60 = vld [vmem:[#allocation4 + $0x578] sm:$0xff] }
 0x1e4   : > { %4193 = vmatpush2.bf16.msra.mxu0 %v6038_v47  ;;  %v6135_v47 = vcombine.high %v896_v35, %v900_v36  ;;  %v6134_v32 = vcombine.low %v896_v35, %v900_v36 }
 0x1e5   : > { %4194 = vmatprep.subr.bf16.mxu0 %v6031_v52  ;;  %v509_v52 = vld [vmem:[#allocation4 + $0x1f8] sm:$0xff] }
 0x1e6   : > { %4246 = vmatpush2.bf16.msra.mxu1 %v6166_v50  ;;  %v505_v50 = vld [vmem:[#allocation4 + $0x1d8] sm:$0xff] }
 0x1e7   : > { %4247 = vmatprep.subr.bf16.mxu1 %v6159_v57  ;;  %v633_v57 = vld [vmem:[#allocation4 + $0x5d8] sm:$0xff]  ;;  %v5745_v4 = vcombine.high %v505_v50, %v509_v52  ;;  %v5744_v42 = vcombine.low %v505_v50, %v509_v52 }
 0x1e8   : > { %4195 = vmatpush2.bf16.msra.mxu0 %v6030_v51  ;;  %v5873_v51 = vcombine.high %v633_v57, %v637_v1  ;;  %v5872_v13 = vcombine.low %v633_v57, %v637_v1  ;;  %v613_v50 = vld [vmem:[#allocation4 + $0x538] sm:$0xff] }
 0x1e9   : > { %4196 = vmatprep.subr.bf16.mxu0 %v6023_v11  ;;  %v501_v11 = vld [vmem:[#allocation4 + $0x1b8] sm:$0xff] }
 0x1ea   : > { %4248 = vmatpush2.bf16.msra.mxu1 %v6158_v6  ;;  %v497_v6 = vld [vmem:[#allocation4 + $0x198] sm:$0xff] }
 0x1eb   : > { %4249 = vmatprep.subr.bf16.mxu1 %v6151_v16  ;;  %v625_v16 = vld [vmem:[#allocation4 + $0x598] sm:$0xff]  ;;  %v5737_v19 = vcombine.high %v497_v6, %v501_v11  ;;  %v5736_v54 = vcombine.low %v497_v6, %v501_v11 }
 0x1ec   : > { %4197 = vmatpush2.bf16.msra.mxu0 %v6022_v20  ;;  %v5865_v20 = vcombine.high %v625_v16, %v629_v17  ;;  %v5864_v35 = vcombine.low %v625_v16, %v629_v17  ;;  %v605_v6 = vld [vmem:[#allocation4 + $0x4f8] sm:$0xff] }
 0x1ed   : > { %4198 = vmatprep.subr.bf16.mxu0 %v6015_v29  ;;  %v493_v29 = vld [vmem:[#allocation4 + $0x178] sm:$0xff] }
 0x1ee   : > { %4250 = vmatpush2.bf16.msra.mxu1 %v6150_v24  ;;  %v489_v24 = vld [vmem:[#allocation4 + $0x158] sm:$0xff] }
 0x1ef   : > { %4251 = vmatprep.subr.bf16.mxu1 %v6143_v31  ;;  %v617_v31 = vld [vmem:[#allocation4 + $0x558] sm:$0xff]  ;;  %v5729_v36 = vcombine.high %v489_v24, %v493_v29  ;;  %v5728_v52 = vcombine.low %v489_v24, %v493_v29 }
 0x1f0   : > { %4199 = vmatpush2.bf16.msra.mxu0 %v6014_v38  ;;  %v5857_v38 = vcombine.high %v617_v31, %v621_v60  ;;  %v5856_v57 = vcombine.low %v617_v31, %v621_v60  ;;  %v597_v24 = vld [vmem:[#allocation4 + $0x4b8] sm:$0xff] }
 0x1f1   : > { %4200 = vmatprep.subr.bf16.mxu0 %v6007_v41  ;;  %v485_v41 = vld [vmem:[#allocation4 + $0x138] sm:$0xff] }
 0x1f2   : > { %4252 = vmatpush2.bf16.msra.mxu1 %v6142_v39  ;;  %v481_v39 = vld [vmem:[#allocation4 + $0x118] sm:$0xff] }
 0x1f3   : > { %4253 = vmatprep.subr.bf16.mxu1 %v6135_v47  ;;  %v609_v47 = vld [vmem:[#allocation4 + $0x518] sm:$0xff]  ;;  %v5721_v1 = vcombine.high %v481_v39, %v485_v41  ;;  %v5720_v11 = vcombine.low %v481_v39, %v485_v41 }
 0x1f4   : > { %4201 = vmatpush2.bf16.msra.mxu0 %v6006_v2  ;;  %v5849_v2 = vcombine.high %v609_v47, %v613_v50  ;;  %v5848_v16 = vcombine.low %v609_v47, %v613_v50  ;;  %v589_v39 = vld [vmem:[#allocation4 + $0x478] sm:$0xff] }
 0x1f5   : > { %4276 = vmatprep.subr.bf16.mxu0 %v5745_v4  ;;  %v477_v4 = vld [vmem:[#allocation4 + $0xf8] sm:$0xff] }
 0x1f6   : > { %4254 = vmatpush2.bf16.msra.mxu1 %v6134_v32  ;;  %v473_v32 = vld [vmem:[#allocation4 + $0xd8] sm:$0xff] }
 0x1f7   : > { %4329 = vmatprep.subr.bf16.mxu1 %v5873_v51  ;;  %4203 = vmatmul.mubr.bf16.vlgmr.msra.gmra.mxu0 %v7151_v7  ;;  %v601_v51 = vld [vmem:[#allocation4 + $0x4d8] sm:$0xff]  ;;  %v5713_v17 = vcombine.high %v473_v32, %v477_v4  ;;  %v5712_v29 = vcombine.low %v473_v32, %v477_v4 }
 0x1f8   : > { %4277 = vmatpush1.bf16.msra.mxu0 %v5744_v42  ;;  %4212 = vmatprep.mubr.bf16.mxu0 %v7158_v15  ;;  %v5841_v42 = vcombine.high %v601_v51, %v605_v6  ;;  %v5840_v31 = vcombine.low %v601_v51, %v605_v6  ;;  %v449_v50 = vld [vmem:[#allocation4 + $0x18] sm:$0xff] }
 0x1f9   : > { %4256 = vmatmul.mubr.bf16.vlgmr.msra.gmra.mxu1 %v7155_v8  ;;  %4278 = vmatprep.subr.bf16.mxu0 %v5737_v19  ;;  %v469_v19 = vld [vmem:[#allocation4 + $0xb8] sm:$0xff] }
 0x1fa   : > { %4330 = vmatpush1.bf16.msra.mxu1 %v5872_v13  ;;  %4265 = vmatprep.mubr.bf16.mxu1 %v7161_v44  ;;  %v465_v13 = vld [vmem:[#allocation4 + $0x98] sm:$0xff] }
 0x1fb   : > { %4331 = vmatprep.subr.bf16.mxu1 %v5865_v20  ;;  %v593_v20 = vld [vmem:[#allocation4 + $0x498] sm:$0xff]  ;;  %v5705_v60 = vcombine.high %v465_v13, %v469_v19  ;;  %v5704_v41 = vcombine.low %v465_v13, %v469_v19 }
 0x1fc   : > { %4279 = vmatpush1.bf16.msra.mxu0 %v5736_v54  ;;  %v5833_v54 = vcombine.high %v593_v20, %v597_v24  ;;  %v569_v6 = vld [vmem:[#allocation4 + $0x3d8] sm:$0xff] }
 0x1fd   : > { %4280 = vmatprep.subr.bf16.mxu0 %v5729_v36  ;;  %v461_v36 = vld [vmem:[#allocation4 + $0x78] sm:$0xff] }
 0x1fe   : > { %4332 = vmatpush1.bf16.msra.mxu1 %v5864_v35  ;;  %v457_v35 = vld [vmem:[#allocation4 + $0x58] sm:$0xff] }
 0x1ff   : > { %4333 = vmatprep.subr.bf16.mxu1 %v5857_v38  ;;  %4213 = vmatmul.mubr.bf16.gmra.mxu0 %v7165_v26  ;;  %v585_v38 = vld [vmem:[#allocation4 + $0x458] sm:$0xff]  ;;  %v5697_v47 = vcombine.high %v457_v35, %v461_v36 }
 0x200   : > { %4281 = vmatpush1.bf16.msra.mxu0 %v5728_v52  ;;  %4308 = vmatprep.mubr.bf16.mxu0 %v7084_v58  ;;  %v5832_v58 = vcombine.low %v593_v20, %v597_v24  ;;  %v453_v52 = vld [vmem:[#allocation4 + $0x38] sm:$0xff]  ;;  %v5824_v32 = vcombine.low %v585_v38, %v589_v39 }
 0x201   : > { %4266 = vmatmul.mubr.bf16.gmra.mxu1 %v7168_v28  ;;  %4282 = vmatprep.subr.bf16.mxu0 %v5721_v1  ;;  %v581_v1 = vld [vmem:[#allocation4 + $0x438] sm:$0xff]  ;;  %v5689_v4 = vcombine.high %v449_v50, %v453_v52 }
 0x202   : > { %4334 = vmatpush1.bf16.msra.mxu1 %v5856_v57  ;;  %4361 = vmatprep.mubr.bf16.mxu1 %v7094_v63  ;;  %v5825_v63 = vcombine.high %v585_v38, %v589_v39  ;;  %v577_v57 = vld [vmem:[#allocation4 + $0x418] sm:$0xff] }
 0x203   : > { %4335 = vmatprep.subr.bf16.mxu1 %v5849_v2  ;;  %v5696_v2 = vcombine.low %v457_v35, %v461_v36  ;;  %v5817_v51 = vcombine.high %v577_v57, %v581_v1  ;;  %v5816_v13 = vcombine.low %v577_v57, %v581_v1  ;;  %v561_v24 = vld [vmem:[#allocation4 + $0x398] sm:$0xff] }
 0x204   : > { %4283 = vmatpush1.bf16.msra.mxu0 %v5720_v11  ;;  %v573_v11 = vld [vmem:[#allocation4 + $0x3f8] sm:$0xff] }
 0x205   : > { %4284 = vmatprep.subr.bf16.mxu0 %v5713_v17  ;;  %v701_v17 = vld [vmem:[#allocation4 + $0x7f8] sm:$0xff]  ;;  %v5809_v19 = vcombine.high %v569_v6, %v573_v11 }
 0x206   : > { %4336 = vmatpush1.bf16.msra.mxu1 %v5848_v16  ;;  %v697_v16 = vld [vmem:[#allocation4 + $0x7d8] sm:$0xff] }
 0x207   : > { %4337 = vmatprep.subr.bf16.mxu1 %v5841_v42  ;;  %v5688_v42 = vcombine.low %v449_v50, %v453_v52  ;;  %v5937_v20 = vcombine.high %v697_v16, %v701_v17  ;;  %v5936_v35 = vcombine.low %v697_v16, %v701_v17  ;;  %v553_v39 = vld [vmem:[#allocation4 + $0x358] sm:$0xff] }
 0x208   : > { %4285 = vmatpush1.bf16.msra.mxu0 %v5712_v29  ;;  %v565_v29 = vld [vmem:[#allocation4 + $0x3b8] sm:$0xff] }
 0x209   : > { %4286 = vmatprep.subr.bf16.mxu0 %v5705_v60  ;;  %v693_v60 = vld [vmem:[#allocation4 + $0x7b8] sm:$0xff]  ;;  %v5801_v36 = vcombine.high %v561_v24, %v565_v29 }
 0x20a   : > { %4338 = vmatpush1.bf16.msra.mxu1 %v5840_v31  ;;  %v689_v31 = vld [vmem:[#allocation4 + $0x798] sm:$0xff] }
 0x20b   : > { %4339 = vmatprep.subr.bf16.mxu1 %v5833_v54  ;;  %v5808_v54 = vcombine.low %v569_v6, %v573_v11  ;;  %v5929_v38 = vcombine.high %v689_v31, %v693_v60  ;;  %v5928_v50 = vcombine.low %v689_v31, %v693_v60  ;;  %v545_v1 = vld [vmem:[#allocation4 + $0x318] sm:$0xff] }
 0x20c   : > { %4287 = vmatpush1.bf16.msra.mxu0 %v5704_v41  ;;  %v557_v41 = vld [vmem:[#allocation4 + $0x378] sm:$0xff] }
 0x20d   : > { %4288 = vmatprep.subr.bf16.mxu0 %v5697_v47  ;;  %v685_v47 = vld [vmem:[#allocation4 + $0x778] sm:$0xff]  ;;  %v5793_v52 = vcombine.high %v553_v39, %v557_v41 }
 0x20e   : > { %4340 = vmatpush1.bf16.msra.mxu1 %v5832_v58  ;;  %v681_v58 = vld [vmem:[#allocation4 + $0x758] sm:$0xff] }
 0x20f   : > { %4341 = vmatprep.subr.bf16.mxu1 %v5825_v63  ;;  %v5800_v63 = vcombine.low %v561_v24, %v565_v29  ;;  %v5921_v57 = vcombine.high %v681_v58, %v685_v47  ;;  %v5920_v6 = vcombine.low %v681_v58, %v685_v47  ;;  %v537_v17 = vld [vmem:[#allocation4 + $0x2d8] sm:$0xff] }
 0x210   : > { %4289 = vmatpush1.bf16.msra.mxu0 %v5696_v2  ;;  %v549_v2 = vld [vmem:[#allocation4 + $0x338] sm:$0xff] }
 0x211   : > { %4290 = vmatprep.subr.bf16.mxu0 %v5689_v4  ;;  %v677_v4 = vld [vmem:[#allocation4 + $0x738] sm:$0xff]  ;;  %v5785_v11 = vcombine.high %v545_v1, %v549_v2 }
 0x212   : > { %4342 = vmatpush1.bf16.msra.mxu1 %v5824_v32  ;;  %v673_v32 = vld [vmem:[#allocation4 + $0x718] sm:$0xff] }
 0x213   : > { %4343 = vmatprep.subr.bf16.mxu1 %v5817_v51  ;;  %v5792_v51 = vcombine.low %v553_v39, %v557_v41  ;;  %v5913_v16 = vcombine.high %v673_v32, %v677_v4  ;;  %v5912_v24 = vcombine.low %v673_v32, %v677_v4  ;;  %v529_v60 = vld [vmem:[#allocation4 + $0x298] sm:$0xff] }
 0x214   : > { %4291 = vmatpush1.bf16.msra.mxu0 %v5688_v42  ;;  %v541_v42 = vld [vmem:[#allocation4 + $0x2f8] sm:$0xff] }
 0x215   : > { %4292 = vmatprep.subr.bf16.mxu0 %v5809_v19  ;;  %v669_v19 = vld [vmem:[#allocation4 + $0x6f8] sm:$0xff]  ;;  %v5777_v29 = vcombine.high %v537_v17, %v541_v42 }
 0x216   : > { %4344 = vmatpush1.bf16.msra.mxu1 %v5816_v13  ;;  %v665_v13 = vld [vmem:[#allocation4 + $0x6d8] sm:$0xff] }
 0x217   : > { %4345 = vmatprep.subr.bf16.mxu1 %v5937_v20  ;;  %v5784_v20 = vcombine.low %v545_v1, %v549_v2  ;;  %v5905_v31 = vcombine.high %v665_v13, %v669_v19  ;;  %v5904_v39 = vcombine.low %v665_v13, %v669_v19  ;;  %v521_v47 = vld [vmem:[#allocation4 + $0x258] sm:$0xff] }
 0x218   : > { %4293 = vmatpush2.bf16.msra.mxu0 %v5808_v54  ;;  %v533_v54 = vld [vmem:[#allocation4 + $0x2b8] sm:$0xff] }
 0x219   : > { %4294 = vmatprep.subr.bf16.mxu0 %v5801_v36  ;;  %v661_v36 = vld [vmem:[#allocation4 + $0x6b8] sm:$0xff]  ;;  %v5769_v41 = vcombine.high %v529_v60, %v533_v54 }
 0x21a   : > { %4346 = vmatpush2.bf16.msra.mxu1 %v5936_v35  ;;  %v657_v35 = vld [vmem:[#allocation4 + $0x698] sm:$0xff] }
 0x21b   : > { %4347 = vmatprep.subr.bf16.mxu1 %v5929_v38  ;;  %v5776_v38 = vcombine.low %v537_v17, %v541_v42  ;;  %v5897_v58 = vcombine.high %v657_v35, %v661_v36  ;;  %v5896_v1 = vcombine.low %v657_v35, %v661_v36  ;;  %v513_v4 = vld [vmem:[#allocation4 + $0x218] sm:$0xff] }
 0x21c   : > { %4295 = vmatpush2.bf16.msra.mxu0 %v5800_v63  ;;  %v525_v63 = vld [vmem:[#allocation4 + $0x278] sm:$0xff] }
 0x21d   : > { %4296 = vmatprep.subr.bf16.mxu0 %v5793_v52  ;;  %v653_v52 = vld [vmem:[#allocation4 + $0x678] sm:$0xff]  ;;  %v5761_v2 = vcombine.high %v521_v47, %v525_v63 }
 0x21e   : > { %4348 = vmatpush2.bf16.msra.mxu1 %v5928_v50  ;;  %v649_v50 = vld [vmem:[#allocation4 + $0x658] sm:$0xff] }
 0x21f   : > { %4349 = vmatprep.subr.bf16.mxu1 %v5921_v57  ;;  %v5768_v57 = vcombine.low %v529_v60, %v533_v54  ;;  %v5889_v32 = vcombine.high %v649_v50, %v653_v52  ;;  %v5888_v17 = vcombine.low %v649_v50, %v653_v52  ;;  %v761_v19 = vld [vmem:[#allocation4 + $0x9d8] sm:$0xff] }
 0x220   : > { %4297 = vmatpush2.bf16.msra.mxu0 %v5792_v51  ;;  %v517_v51 = vld [vmem:[#allocation4 + $0x238] sm:$0xff] }
 0x221   : > { %4298 = vmatprep.subr.bf16.mxu0 %v5785_v11  ;;  %v645_v11 = vld [vmem:[#allocation4 + $0x638] sm:$0xff]  ;;  %v5753_v42 = vcombine.high %v513_v4, %v517_v51 }
 0x222   : > { %4350 = vmatpush2.bf16.msra.mxu1 %v5920_v6  ;;  %v641_v6 = vld [vmem:[#allocation4 + $0x618] sm:$0xff] }
 0x223   : > { %4351 = vmatprep.subr.bf16.mxu1 %v5913_v16  ;;  %v5760_v16 = vcombine.low %v521_v47, %v525_v63  ;;  %v5881_v13 = vcombine.high %v641_v6, %v645_v11  ;;  %v5880_v60 = vcombine.low %v641_v6, %v645_v11  ;;  %v753_v36 = vld [vmem:[#allocation4 + $0x998] sm:$0xff] }
 0x224   : > { %4299 = vmatpush2.bf16.msra.mxu0 %v5784_v20  ;;  %v765_v20 = vld [vmem:[#allocation4 + $0x9f8] sm:$0xff] }
 0x225   : > { %4300 = vmatprep.subr.bf16.mxu0 %v5777_v29  ;;  %v893_v29 = vld [vmem:[#allocation4 + $0xdf8] sm:$0xff]  ;;  %v6001_v54 = vcombine.high %v761_v19, %v765_v20 }
 0x226   : > { %4352 = vmatpush2.bf16.msra.mxu1 %v5912_v24  ;;  %v889_v24 = vld [vmem:[#allocation4 + $0xdd8] sm:$0xff] }
 0x227   : > { %4353 = vmatprep.subr.bf16.mxu1 %v5905_v31  ;;  %v5752_v31 = vcombine.low %v513_v4, %v517_v51  ;;  %v6129_v35 = vcombine.high %v889_v24, %v893_v29  ;;  %v6128_v47 = vcombine.low %v889_v24, %v893_v29  ;;  %v745_v52 = vld [vmem:[#allocation4 + $0x958] sm:$0xff] }
 0x228   : > { %4301 = vmatpush2.bf16.msra.mxu0 %v5776_v38  ;;  %v757_v38 = vld [vmem:[#allocation4 + $0x9b8] sm:$0xff] }
 0x229   : > { %4302 = vmatprep.subr.bf16.mxu0 %v5769_v41  ;;  %v885_v41 = vld [vmem:[#allocation4 + $0xdb8] sm:$0xff]  ;;  %v5993_v63 = vcombine.high %v753_v36, %v757_v38 }
 0x22a   : > { %4354 = vmatpush2.bf16.msra.mxu1 %v5904_v39  ;;  %v881_v39 = vld [vmem:[#allocation4 + $0xd98] sm:$0xff] }
 0x22b   : > { %4355 = vmatprep.subr.bf16.mxu1 %v5897_v58  ;;  %v6000_v58 = vcombine.low %v761_v19, %v765_v20  ;;  %v6121_v50 = vcombine.high %v881_v39, %v885_v41  ;;  %v6120_v4 = vcombine.low %v881_v39, %v885_v41  ;;  %v737_v11 = vld [vmem:[#allocation4 + $0x918] sm:$0xff] }
 0x22c   : > { %4303 = vmatpush2.bf16.msra.mxu0 %v5768_v57  ;;  %v749_v57 = vld [vmem:[#allocation4 + $0x978] sm:$0xff] }
 0x22d   : > { %4304 = vmatprep.subr.bf16.mxu0 %v5761_v2  ;;  %v877_v2 = vld [vmem:[#allocation4 + $0xd78] sm:$0xff]  ;;  %v5985_v51 = vcombine.high %v745_v52, %v749_v57 }
 0x22e   : > { %4356 = vmatpush2.bf16.msra.mxu1 %v5896_v1  ;;  %v873_v1 = vld [vmem:[#allocation4 + $0xd58] sm:$0xff] }
 0x22f   : > { %4357 = vmatprep.subr.bf16.mxu1 %v5889_v32  ;;  %v5992_v32 = vcombine.low %v753_v36, %v757_v38  ;;  %v6113_v6 = vcombine.high %v873_v1, %v877_v2  ;;  %v6112_v19 = vcombine.low %v873_v1, %v877_v2  ;;  %v729_v29 = vld [vmem:[#allocation4 + $0x8d8] sm:$0xff] }
 0x230   : > { %4305 = vmatpush2.bf16.msra.mxu0 %v5760_v16  ;;  %v741_v16 = vld [vmem:[#allocation4 + $0x938] sm:$0xff] }
 0x231   : > { %4306 = vmatprep.subr.bf16.mxu0 %v5753_v42  ;;  %v865_v42 = vld [vmem:[#allocation4 + $0xd18] sm:$0xff]  ;;  %v5977_v20 = vcombine.high %v737_v11, %v741_v16 }
 0x232   : > { %4358 = vmatpush2.bf16.msra.mxu1 %v5888_v17  ;;  %v7270_v17 = vpop.f32.mrf.mxu0  ;;  %v721_v41 = vld [vmem:[#allocation4 + $0x898] sm:$0xff] }
 0x233   : > { %4359 = vmatprep.subr.bf16.mxu1 %v5881_v13  ;;  %v713_v2 = vld [vmem:[#allocation4 + $0x858] sm:$0xff] }
 0x234   : > { %4307 = vmatpush2.bf16.msra.mxu0 %v5752_v31  ;;  %v7273_v13 = vpop.f32.mrf.mxu0  ;;  %v733_v31 = vld [vmem:[#allocation4 + $0x8f8] sm:$0xff] }
 0x235   : > { %4382 = vmatprep.subr.bf16.mxu0 %v6001_v54  ;;  %v5976_v54 = vcombine.low %v737_v11, %v741_v16  ;;  %v5969_v38 = vcombine.high %v729_v29, %v733_v31 }
 0x236   : > { %4360 = vmatpush2.bf16.msra.mxu1 %v5880_v60  ;;  %v857_v60 = vld [vmem:[#allocation4 + $0xcd8] sm:$0xff] }
 0x237   : > { %4435 = vmatprep.subr.bf16.mxu1 %v6129_v35  ;;  %4309 = vmatmul.mubr.bf16.vlgmr.msra.gmra.mxu0 %v7100_v21  ;;  %v869_v21 = vld [vmem:[#allocation4 + $0xd38] sm:$0xff]  ;;  %v7279_v35 = vpop.f32.mrf.mxu0 }
 0x238   : > { %4383 = vmatpush1.bf16.msra.mxu0 %v6000_v58  ;;  %4318 = vmatprep.mubr.bf16.mxu0 %v7110_v55  ;;  %v6105_v24 = vcombine.high %v865_v42, %v869_v21  ;;  %v861_v55 = vld [vmem:[#allocation4 + $0xcf8] sm:$0xff]  ;;  %v6104_v36 = vcombine.low %v865_v42, %v869_v21 }
 0x239   : > { %4362 = vmatmul.mubr.bf16.vlgmr.msra.gmra.mxu1 %v7106_v25  ;;  %4384 = vmatprep.subr.bf16.mxu0 %v5993_v63  ;;  %v5984_v25 = vcombine.low %v745_v52, %v749_v57  ;;  %v6097_v39 = vcombine.high %v857_v60, %v861_v55  ;;  %v725_v58 = vld [vmem:[#allocation4 + $0x8b8] sm:$0xff]  ;;  %v6096_v52 = vcombine.low %v857_v60, %v861_v55 }
 0x23a   : > { %4436 = vmatpush1.bf16.msra.mxu1 %v6128_v47  ;;  %4371 = vmatprep.mubr.bf16.mxu1 %v7113_v59  ;;  %v7277_v59 = vpop.f32.mrf.mxu1  ;;  %v853_v63 = vld [vmem:[#allocation4 + $0xcb8] sm:$0xff]  ;;  %v5961_v57 = vcombine.high %v721_v41, %v725_v58 }
 0x23b   : > { %4437 = vmatprep.subr.bf16.mxu1 %v6121_v50  ;;  %7601 = vst [vmem:[#allocation19_spill] sm:$0xff] %v7277_v59  ;;  %v7285_v50 = vpop.f32.mrf.mxu0  ;;  %v705_v21 = vld [vmem:[#allocation4 + $0x818] sm:$0xff] }
 0x23c   : > { %4385 = vmatpush1.bf16.msra.mxu0 %v5992_v32  ;;  %v7282_v47 = vpop.f32.mrf.mxu1  ;;  %v717_v32 = vld [vmem:[#allocation4 + $0x878] sm:$0xff] }
 0x23d   : > { %4386 = vmatprep.subr.bf16.mxu0 %v5985_v51  ;;  %v845_v51 = vld [vmem:[#allocation4 + $0xc78] sm:$0xff]  ;;  %v7289_v11 = vpop.f32.mrf.mxu0  ;;  %v5953_v16 = vcombine.high %v713_v2, %v717_v32 }
 0x23e   : > { %4438 = vmatpush1.bf16.msra.mxu1 %v6120_v4  ;;  %v7287_v4 = vpop.f32.mrf.mxu1  ;;  %v781_v59 = vld [vmem:[#allocation4 + $0xa78] sm:$0xff] }
 0x23f   : > { %4439 = vmatprep.subr.bf16.mxu1 %v6113_v6  ;;  %4319 = vmatmul.mubr.bf16.gmra.mxu0 %v7120_v43  ;;  %v849_v43 = vld [vmem:[#allocation4 + $0xc98] sm:$0xff]  ;;  %v5960_v6 = vcombine.low %v721_v41, %v725_v58 }
 0x240   : > { %4387 = vmatpush1.bf16.msra.mxu0 %v5984_v25  ;;  %4414 = vmatprep.mubr.bf16.mxu0 %v7136_v61  ;;  %v6089_v1 = vcombine.high %v849_v43, %v853_v63  ;;  %v841_v61 = vld [vmem:[#allocation4 + $0xc58] sm:$0xff] }
 0x241   : > { %4372 = vmatmul.mubr.bf16.gmra.mxu1 %v7132_v48  ;;  %4388 = vmatprep.subr.bf16.mxu0 %v5977_v20  ;;  %v5968_v48 = vcombine.low %v729_v29, %v733_v31  ;;  %v6081_v42 = vcombine.high %v841_v61, %v845_v51  ;;  %v709_v25 = vld [vmem:[#allocation4 + $0x838] sm:$0xff]  ;;  %v7293_v20 = vpop.f32.mrf.mxu0  ;;  %v5952_v31 = vcombine.low %v713_v2, %v717_v32 }
 0x242   : > { %4440 = vmatpush1.bf16.msra.mxu1 %v6112_v19  ;;  %4467 = vmatprep.mubr.bf16.mxu1 %v7141_v62  ;;  %v6088_v62 = vcombine.low %v849_v43, %v853_v63  ;;  %v7291_v19 = vpop.f32.mrf.mxu1  ;;  %7602 = vst [vmem:[#allocation20_spill] sm:$0xff] %v7293_v20  ;;  %v837_v29 = vld [vmem:[#allocation4 + $0xc38] sm:$0xff]  ;;  %v6080_v60 = vcombine.low %v841_v61, %v845_v51 }
 0x243   : > { %4441 = vmatprep.subr.bf16.mxu1 %v6105_v24  ;;  %v833_v24 = vld [vmem:[#allocation4 + $0xc18] sm:$0xff]  ;;  %v5945_v55 = vcombine.high %v705_v21, %v709_v25  ;;  %v7297_v41 = vpop.f32.mrf.mxu0  ;;  %v5944_v63 = vcombine.low %v705_v21, %v709_v25 }
 0x244   : > { %4389 = vmatpush1.bf16.msra.mxu0 %v5976_v54  ;;  %v6073_v54 = vcombine.high %v833_v24, %v837_v29  ;;  %v953_v58 = vld [vmem:[#allocation4 + $0xfd8] sm:$0xff] }
 0x245   : > { %4390 = vmatprep.subr.bf16.mxu0 %v5969_v38  ;;  %v829_v38 = vld [vmem:[#allocation4 + $0xbf8] sm:$0xff]  ;;  %v7301_v61 = vpop.f32.mrf.mxu0 }
 0x246   : > { %4442 = vmatpush1.bf16.msra.mxu1 %v6104_v36  ;;  %v825_v36 = vld [vmem:[#allocation4 + $0xbd8] sm:$0xff] }
 0x247   : > { %4443 = vmatprep.subr.bf16.mxu1 %v6097_v39  ;;  %v7295_v39 = vpop.f32.mrf.mxu1  ;;  %v957_v43 = vld [vmem:[#allocation4 + $0xff8] sm:$0xff] }
 0x248   : > { %4391 = vmatpush1.bf16.msra.mxu0 %v5968_v48  ;;  %v817_v2 = vld [vmem:[#allocation4 + $0xb98] sm:$0xff] }
 0x249   : > { %4392 = vmatprep.subr.bf16.mxu0 %v5961_v57  ;;  %v7299_v48 = vpop.f32.mrf.mxu1  ;;  %v6065_v57 = vcombine.high %v825_v36, %v829_v38  ;;  %v821_v32 = vld [vmem:[#allocation4 + $0xbb8] sm:$0xff] }
 0x24a   : > { %4444 = vmatpush1.bf16.msra.mxu1 %v6096_v52  ;;  %7603 = vst [vmem:[#allocation21_spill] sm:$0xff] %v7299_v48  ;;  %v6072_v52 = vcombine.low %v833_v24, %v837_v29  ;;  %v945_v51 = vld [vmem:[#allocation4 + $0xf98] sm:$0xff]  ;;  %v6057_v21 = vcombine.high %v817_v2, %v821_v32 }
 0x24b   : > { %4445 = vmatprep.subr.bf16.mxu1 %v6089_v1  ;;  %v6193_v1 = vcombine.high %v953_v58, %v957_v43  ;;  %v809_v24 = vld [vmem:[#allocation4 + $0xb58] sm:$0xff] }
 0x24c   : > { %4393 = vmatpush1.bf16.msra.mxu0 %v5960_v6  ;;  %v949_v6 = vld [vmem:[#allocation4 + $0xfb8] sm:$0xff] }
 0x24d   : > { %4394 = vmatprep.subr.bf16.mxu0 %v5953_v16  ;;  %v7303_v16 = vpop.f32.mrf.mxu1  ;;  %v6185_v25 = vcombine.high %v945_v51, %v949_v6  ;;  %v813_v29 = vld [vmem:[#allocation4 + $0xb78] sm:$0xff] }
 0x24e   : > { %4446 = vmatpush1.bf16.msra.mxu1 %v6088_v62  ;;  %v6064_v62 = vcombine.low %v825_v36, %v829_v38  ;;  %v6184_v36 = vcombine.low %v945_v51, %v949_v6  ;;  %v6049_v38 = vcombine.high %v809_v24, %v813_v29 }
 0x24f   : > { %4447 = vmatprep.subr.bf16.mxu1 %v6081_v42  ;;  %v6192_v42 = vcombine.low %v953_v58, %v957_v43  ;;  %v7307_v5 = vpop.f32.mrf.mxu1  ;;  %v801_v43 = vld [vmem:[#allocation4 + $0xb18] sm:$0xff] }
 0x250   : > { %4395 = vmatpush1.bf16.msra.mxu0 %v5952_v31  ;;  %v7305_v31 = vpop.f32.mrf.mxu0  ;;  %7604 = vst [vmem:[#allocation22_spill] sm:$0xff] %v7307_v5  ;;  %v789_v5 = vld [vmem:[#allocation4 + $0xab8] sm:$0xff] }
 0x251   : > { %4396 = vmatprep.subr.bf16.mxu0 %v5945_v55  ;;  %v941_v55 = vld [vmem:[#allocation4 + $0xf78] sm:$0xff] }
 0x252   : > { %4448 = vmatpush1.bf16.msra.mxu1 %v6080_v60  ;;  %v937_v60 = vld [vmem:[#allocation4 + $0xf58] sm:$0xff] }
 0x253   : > { %4449 = vmatprep.subr.bf16.mxu1 %v6073_v54  ;;  %v6056_v54 = vcombine.low %v817_v2, %v821_v32  ;;  %v6177_v58 = vcombine.high %v937_v60, %v941_v55  ;;  %v6048_v2 = vcombine.low %v809_v24, %v813_v29  ;;  %v7313_v32 = vpop.f32.mrf.mxu1  ;;  %v925_v24 = vld [vmem:[#allocation4 + $0xef8] sm:$0xff]  ;;  %v7323_v29 = vrot.slane %v7315_v0, %v974_v56 }
 0x254   : > { %4397 = vmatpush1.bf16.msra.mxu0 %v5944_v63  ;;  %v7309_v63 = vpop.f32.mrf.mxu0 }
 0x255   : > { %4398 = vmatprep.subr.bf16.mxu0 %v6065_v57  ;;  %7605 = vst [vmem:[#allocation23_spill] sm:$0xff] %v7309_v63  ;;  %v966_v57 = vsub.s32 1, %v7182_v12  ;;  %v7320_v46 = vpop.f32.mrf.mxu1 }
 0x256   : > { %4450 = vmatpush1.bf16.msra.mxu1 %v6072_v52  ;;  %v805_v52 = vld [vmem:[#allocation4 + $0xb38] sm:$0xff]  ;;  %7606 = vst [vmem:[#allocation24_spill] sm:$0xff] %v7320_v46 }
 0x257   : > { %4451 = vmatprep.subr.bf16.mxu1 %v6193_v1  ;;  %v929_v1 = vld [vmem:[#allocation4 + $0xf18] sm:$0xff]  ;;  %v6041_v51 = vcombine.high %v801_v43, %v805_v52  ;;  %v7318_v45 = vrot.slane %v7315_v0, %v966_v57  ;;  %v3893_v57 = vadd.f32 %v7289_v11, %v7323_v29 }
 0x258   : > { %4399 = vmatpush2.bf16.msra.mxu0 %v6064_v62  ;;  %v3994_v62 = vpop.f32.mrf.mxu0  ;;  %v6169_v6 = vcombine.high %v929_v1, %v933_v34  ;;  %v785_v46 = vld [vmem:[#allocation4 + $0xa98] sm:$0xff] }
 0x259   : > { %4400 = vmatprep.subr.bf16.mxu0 %v6057_v21  ;;  %v793_v21 = vld [vmem:[#allocation4 + $0xad8] sm:$0xff]  ;;  %v3677_v56 = vadd.f32 %v7190_v49, %v7318_v45 }
 0x25a   : > { %4452 = vmatpush2.bf16.msra.mxu1 %v6192_v42  ;;  %v6176_v42 = vcombine.low %v937_v60, %v941_v55  ;;  %v3681_v60 = vadd.f32 %v7199_v9, %v7318_v45  ;;  %v7327_v55 = vpop.f32.mrf.mxu0  ;;  %v3889_v9 = vadd.f32 %v7279_v35, %v7323_v29  ;;  %v777_v49 = vld [vmem:[#allocation4 + $0xa58] sm:$0xff] }
 0x25b   : > { %4453 = vmatprep.subr.bf16.mxu1 %v6185_v25  ;;  %v797_v25 = vld [vmem:[#allocation4 + $0xaf8] sm:$0xff]  ;;  %v3730_v28 = vadd.f32 %v7194_v53, %v3677_v56 }
 0x25c   : > { %4401 = vmatpush2.bf16.msra.mxu0 %v6056_v54  ;;  %v921_v54 = vld [vmem:[#allocation4 + $0xed8] sm:$0xff] }
 0x25d   : > { %4402 = vmatprep.subr.bf16.mxu0 %v6049_v38  ;;  %v6168_v38 = vcombine.low %v929_v1, %v933_v34  ;;  %v6161_v48 = vcombine.high %v921_v54, %v925_v24  ;;  %v3734_v34 = vadd.f32 %v7203_v14, %v3681_v60  ;;  %v3998_v1 = vpop.f32.mrf.mxu0  ;;  %v6160_v11 = vcombine.low %v921_v54, %v925_v24  ;;  %v897_v56 = vld [vmem:[#allocation4 + $0xe18] sm:$0xff] }
 0x25e   : > { %4454 = vmatpush2.bf16.msra.mxu1 %v6184_v36  ;;  %v6040_v36 = vcombine.low %v801_v43, %v805_v52  ;;  %v4047_v43 = vpop.f32.mrf.mxu1  ;;  %v913_v52 = vld [vmem:[#allocation4 + $0xe98] sm:$0xff]  ;;  %v3942_v14 = vadd.f32 %v7287_v4, %v3889_v9  ;;  %v6024_v54 = vcombine.low %v785_v46, %v789_v5  ;;  %v3783_v24 = vadd.f32 %v7226_v37, %v3730_v28 }
 0x25f   : > { %4455 = vmatprep.subr.bf16.mxu1 %v6177_v58  ;;  %v6033_v58 = vcombine.high %v793_v21, %v797_v25  ;;  %v3787_v63 = vadd.f32 %v7233_v3, %v3734_v34  ;;  %v773_v3 = vld [vmem:[#allocation4 + $0xa38] sm:$0xff]  ;;  %v6016_v9 = vcombine.low %v777_v49, %v781_v59 }
 0x260   : > { %4403 = vmatpush2.bf16.msra.mxu0 %v6048_v2  ;;  %v917_v2 = vld [vmem:[#allocation4 + $0xeb8] sm:$0xff]  ;;  %v7339_v35 = vpop.f32.mrf.mxu1  ;;  %v3995_v60 = vadd.f32 %v3994_v62, %v3942_v14  ;;  %v7345_v62 = vpop.f32.mrf.mxu0 }
 0x261   : > { %4404 = vmatprep.subr.bf16.mxu0 %v6041_v51  ;;  %v6025_v51 = vcombine.high %v785_v46, %v789_v5  ;;  %v6153_v20 = vcombine.high %v913_v52, %v917_v2  ;;  %v901_v34 = vld [vmem:[#allocation4 + $0xe38] sm:$0xff]  ;;  %v3836_v46 = vadd.f32 %v7228_v40, %v3783_v24  ;;  %v970_v40 = vsub.s32 2, %v7182_v12 }
 0x262   : > { %4456 = vmatpush2.bf16.msra.mxu1 %v6176_v42  ;;  %v6032_v42 = vcombine.low %v793_v21, %v797_v25  ;;  %v905_v21 = vld [vmem:[#allocation4 + $0xe58] sm:$0xff]  ;;  %v4048_v5 = vadd.f32 %v4047_v43, %v3995_v60  ;;  %v3903_v24 = vadd.f32 %v7305_v31, %v7323_v29 }
 0x263   : > { %4457 = vmatprep.subr.bf16.mxu1 %v6169_v6  ;;  %v3946_v6 = vadd.f32 %v7295_v39, %v3893_v57  ;;  %v909_v25 = vld [vmem:[#allocation4 + $0xe78] sm:$0xff]  ;;  %v6152_v39 = vcombine.low %v913_v52, %v917_v2  ;;  %v4051_v57 = vpop.f32.mrf.mxu1  ;;  %v6494_v52 = vld [vmem:[#allocation7 + $0xf8] sm:$0xff]   ;;  %v7348_v2 = vpop.f32.mrf.mxu0 }
 0x264   : > { %4405 = vmatpush2.bf16.msra.mxu0 %v6040_v36  ;;  %v6145_v53 = vcombine.high %v905_v21, %v909_v25  ;;  %v6144_v28 = vcombine.low %v905_v21, %v909_v25  ;;  %v3691_v21 = vadd.f32 %v7219_v18, %v7318_v45  ;;  %v6500_v18 = vld [vmem:[#allocation7 + $0xb0] sm:$0xff]  }
 0x265   : > { %4406 = vmatprep.subr.bf16.mxu0 %v6033_v58  ;;  %v3999_v36 = vadd.f32 %v3998_v1, %v3946_v6  ;;  %v3840_v58 = vadd.f32 %v7235_v10, %v3787_v63  ;;  %v6136_v63 = vcombine.low %v897_v56, %v901_v34  ;;  %v7350_v43 = vpop.f32.mrf.mxu1  ;;  %v3687_v1 = vadd.f32 %v7208_v27, %v7318_v45  ;;  %v7359_v14 = vpop.f32.mrf.mxu0  ;;  %v6499_v27 = vld [vmem:[#allocation7 + $0x30] sm:$0xff]   ;;  %v6501_v45 = vld [vmem:[#allocation7 + $0x68] sm:$0xff]  }
 0x266   : > { %4458 = vmatpush2.bf16.msra.mxu1 %v6168_v38  ;;  %v769_v38 = vld [vmem:[#allocation4 + $0xa18] sm:$0xff]  ;;  %v971_v6 = vrot.slane %v7315_v0, %v970_v40  ;;  %v7611_v40 = vld [vmem:[#allocation22_spill] sm:$0xff] }
 0x267   : > { %4459 = vmatprep.subr.bf16.mxu1 %v6161_v48  ;;  %v6017_v48 = vcombine.high %v777_v49, %v781_v59  ;;  %v4052_v4 = vadd.f32 %v4051_v57, %v3999_v36  ;;  %v6009_v37 = vcombine.high %v769_v38, %v773_v3  ;;  %6565 = vtanh.f32 %v3840_v58  ;;  %v6493_v59 = vld [vmem:[#allocation7 + $0x78] sm:$0xff]   ;;  %v6498_v49 = vld [vmem:[#allocation7 + $0xf0] sm:$0xff]   ;;  %v7361_v36 = vpop.f32.mrf.mxu1  ;;  %v4008_v60 = vpop.f32.mrf.mxu0 }
 0x268   : > { %4407 = vmatpush2.bf16.msra.mxu0 %v6032_v42  ;;  %v6008_v10 = vcombine.low %v769_v38, %v773_v3  ;;  %v6495_v42 = vld [vmem:[#allocation7 + $0x38] sm:$0xff]   ;;  %v3891_v25 = vadd.f32 %v7285_v50, %v971_v6  ;;  %v6502_v50 = vld [vmem:[#allocation7 + $0xe8] sm:$0xff]  }
 0x269   : > { %4408 = vmatprep.subr.bf16.mxu0 %v6025_v51  ;;  %6567 = vtanh.f32 %v4052_v4  ;;  %v6497_v51 = vld [vmem:[#allocation7 + $0x70] sm:$0xff]  }
 0x26a   : > { %4460 = vmatpush2.bf16.msra.mxu1 %v6160_v11  ;;  %6569 = vtanh.f32 %v3836_v46  ;;  %v6496_v11 = vld [vmem:[#allocation7 + $0xb8] sm:$0xff]   ;;  %v7607_v4 = vld [vmem:[#allocation23_spill] sm:$0xff] }
 0x26b   : > { %4461 = vmatprep.subr.bf16.mxu1 %v6153_v20  ;;  %v6137_v20 = vcombine.high %v897_v56, %v901_v34  ;;  %6571 = vtanh.f32 %v4048_v5  ;;  %v3901_v34 = vadd.f32 %v7301_v61, %v971_v6 }
 0x26c   : > { %4409 = vmatpush2.bf16.msra.mxu0 %v6024_v54  ;;  %v3740_v54 = vadd.f32 %v7212_v33, %v3687_v1  ;;  %v3899_v33 = vadd.f32 %v7297_v41, %v7323_v29 }
 0x26d   : > { %4410 = vmatprep.subr.bf16.mxu0 %v6017_v48  ;;  %v3944_v48 = vadd.f32 %v7291_v19, %v3891_v25  ;;  %v6505_v19 = vld [vmem:[#allocation7 + $0x60] sm:$0xff]   ;;  %v6514_v25 = vld [vmem:[#allocation7 + $0xd0] sm:$0xff]  }
 0x26e   : > { %4462 = vmatpush2.bf16.msra.mxu1 %v6152_v39  ;;  %v3744_v39 = vadd.f32 %v7221_v22, %v3691_v21  ;;  %v3956_v22 = vadd.f32 %v7313_v32, %v3903_v24  ;;  %v3952_v57 = vadd.f32 %v7303_v16, %v3899_v33  ;;  %v6506_v32 = vld [vmem:[#allocation7 + $0xe0] sm:$0xff]   ;;  %v6517_v24 = vld [vmem:[#allocation7 + $0x48] sm:$0xff]  }
 0x26f   : > { %4463 = vmatprep.subr.bf16.mxu1 %v6145_v53  ;;  %v7375_v53 = vpop.f32.mrf.mxu1  ;;  %v6508_v16 = vld [vmem:[#allocation7 + $0xa0] sm:$0xff]  }
 0x270   : > { %4411 = vmatpush2.bf16.msra.mxu0 %v6016_v9  ;;  %v4009_v56 = vadd.f32 %v4008_v60, %v3956_v22 }
 0x271   : > { %4412 = vmatprep.subr.bf16.mxu0 %v6009_v37  ;;  %v4061_v46 = vpop.f32.mrf.mxu1  ;;  %v7609_v37 = vld [vmem:[#allocation19_spill] sm:$0xff] }
 0x272   : > { %4464 = vmatpush2.bf16.msra.mxu1 %v6144_v28  ;;  %v6507_v28 = vld [vmem:[#allocation7 + $0x20] sm:$0xff]  }
 0x273   : > { %4465 = vmatprep.subr.bf16.mxu1 %v6137_v20  ;;  %v7610_v20 = vld [vmem:[#allocation20_spill] sm:$0xff] }
 0x274   : > { %4413 = vmatpush2.bf16.msra.mxu0 %v6008_v10  ;;  %v6566_v31 = vpop.eup %6565  ;;  %v3897_v10 = vadd.f32 %v7610_v20, %v971_v6  ;;  %v6533_v20 = vld [vmem:[#allocation7 + $0x158] sm:$0xff]  }
 0x275   : > { %6262 = vmatprep.subr.bf16.mxu0 %v6493_v59  ;;  %v4062_v59 = vadd.f32 %v4061_v46, %v4009_v56  ;;  %v6528_v56 = vld [vmem:[#allocation7 + $0x130] sm:$0xff]   ;;  %v6530_v46 = vld [vmem:[#allocation7 + $0x128] sm:$0xff]  }
 0x276   : > { %4466 = vmatpush2.bf16.msra.mxu1 %v6136_v63  ;;  %v6568_v38 = vpop.eup %6567  ;;  %v6510_v63 = vld [vmem:[#allocation7 + $0xd8] sm:$0xff]  }
 0x277   : > { %6290 = vmatprep.subr.bf16.mxu1 %v6494_v52  ;;  %4415 = vmatmul.mubr.bf16.vlgmr.msra.gmra.mxu0 %v7151_v7  ;;  %v3887_v7 = vadd.f32 %v7273_v13, %v971_v6  ;;  %v6503_v13 = vld [vmem:[#allocation7 + $0x28] sm:$0xff]   ;;  %v6570_v3 = vpop.eup %6569  ;;  %v3954_v52 = vadd.f32 %v7611_v40, %v3901_v34  ;;  %v6513_v6 = vld [vmem:[#allocation7 + $0x50] sm:$0xff]   ;;  %v4098_v34 = vpop.f32.mrf.mxu0 }
 0x278   : > { %6263 = vmatpush3.bf16.msra.mxu0 %v6495_v42  ;;  %4424 = vmatprep.mubr.bf16.mxu0 %v7158_v15  ;;  %v3797_v15 = vadd.f32 %v7270_v17, %v3744_v39  ;;  %v6572_v29 = vpop.eup %6571  ;;  %v4521_v17 = vpack.c.bf16 %v6566_v31, %v6570_v3  ;;  %v7612_v42 = vld [vmem:[#allocation24_spill] sm:$0xff]  ;;  %v6521_v39 = vld [vmem:[#allocation7 + $0x40] sm:$0xff]  }
 0x279   : > { %4468 = vmatmul.mubr.bf16.vlgmr.msra.gmra.mxu1 %v7155_v8  ;;  %6264 = vmatprep.subr.bf16.mxu0 %v6497_v51  ;;  %v3793_v8 = vadd.f32 %v7240_v23, %v3740_v54  ;;  %v6504_v23 = vld [vmem:[#allocation7 + $0xa8] sm:$0xff]   ;;  %v3940_v41 = vadd.f32 %v7282_v47, %v3887_v7  ;;  %v6512_v51 = vld [vmem:[#allocation7 + $0x98] sm:$0xff]   ;;  %v4007_v21 = vadd.f32 %v7359_v14, %v3954_v52  ;;  %v6515_v54 = vld [vmem:[#allocation7 + $0x10] sm:$0xff]  }
 0x27a   : > { %6291 = vmatpush3.bf16.msra.mxu1 %v6496_v11  ;;  %4477 = vmatprep.mubr.bf16.mxu1 %v7161_v44  ;;  %v3997_v44 = vadd.f32 %v7327_v55, %v3944_v48  ;;  %v7608_v47 = vld [vmem:[#allocation14_spill] sm:$0xff]  ;;  %v4523_v55 = vpack.c.bf16 %v6568_v38, %v6572_v29  ;;  %v3850_v5 = vadd.f32 %v7609_v37, %v3797_v15  ;;  %v6525_v48 = vld [vmem:[#allocation7 + $0x178] sm:$0xff]   ;;  %v7615_v29 = vld [vmem:[#allocation15_spill] sm:$0xff] }
 0x27b   : > { %6292 = vmatprep.subr.bf16.mxu1 %v6498_v49  ;;  %v3846_v58 = vadd.f32 %v7242_v30, %v3793_v8  ;;  %v3993_v9 = vadd.f32 %v7607_v4, %v3940_v41  ;;  %v4005_v30 = vadd.f32 %v7348_v2, %v3952_v57  ;;  %v6511_v2 = vld [vmem:[#allocation7 + $0x18] sm:$0xff]   ;;  %v6519_v14 = vld [vmem:[#allocation7 + $0x8] sm:$0xff]   ;;  %v6523_v8 = vld [vmem:[#allocation7] sm:$0xff]   ;;  %v4151_v4 = vpop.f32.mrf.mxu1 }
 0x27c   : > { %6265 = vmatpush3.bf16.msra.mxu0 %v6499_v27  ;;  %v4050_v61 = vadd.f32 %v7339_v35, %v3997_v44  ;;  %v7613_v35 = vld [vmem:[#allocation21_spill] sm:$0xff]  ;;  %v6527_v41 = vld [vmem:[#allocation7 + $0x170] sm:$0xff]   ;;  %v7617_v37 = vld [vmem:[#allocation18_spill] sm:$0xff] }
 0x27d   : > { %6266 = vmatprep.subr.bf16.mxu0 %v6501_v45  ;;  %6573 = vtanh.f32 %v3846_v58  ;;  %v4046_v1 = vadd.f32 %v7612_v42, %v3993_v9  ;;  %v4058_v11 = vadd.f32 %v7361_v36, %v4005_v30  ;;  %v3950_v49 = vadd.f32 %v7613_v35, %v3897_v10  ;;  %v6516_v36 = vld [vmem:[#allocation7 + $0x90] sm:$0xff]   ;;  %v6518_v45 = vld [vmem:[#allocation7 + $0xc8] sm:$0xff]   ;;  %v6524_v31 = vld [vmem:[#allocation7 + $0x80] sm:$0xff]  }
 0x27e   : > { %6293 = vmatpush3.bf16.msra.mxu1 %v6500_v18  ;;  %6575 = vtanh.f32 %v3850_v5  ;;  %v4060_v18 = vadd.f32 %v7375_v53, %v4007_v21  ;;  %v6526_v15 = vld [vmem:[#allocation7 + $0x138] sm:$0xff]  }
 0x27f   : > { %6294 = vmatprep.subr.bf16.mxu1 %v6502_v50  ;;  %4425 = vmatmul.mubr.bf16.gmra.mxu0 %v7165_v26  ;;  %v6509_v26 = vld [vmem:[#allocation7 + $0x58] sm:$0xff]   ;;  %6577 = vtanh.f32 %v4050_v61  ;;  %v4003_v27 = vadd.f32 %v7345_v62, %v3950_v49  ;;  %v6520_v50 = vld [vmem:[#allocation7 + $0x88] sm:$0xff]   ;;  %v6522_v62 = vld [vmem:[#allocation7 + $0xc0] sm:$0xff]  }
 0x280   : > { %6267 = vmatpush3.bf16.msra.mxu0 %v6503_v13  ;;  %5087 = vmatprep.mubr.bf16.mxu0 %v4521_v17  ;;  %6579 = vtanh.f32 %v4062_v59  ;;  %v6542_v44 = vld [vmem:[#allocation7 + $0x1b8] sm:$0xff]   ;;  %v6529_v17 = vld [vmem:[#allocation7 + $0x168] sm:$0xff]   ;;  %v6535_v59 = vld [vmem:[#allocation7 + $0x150] sm:$0xff]  }
 0x281   : > { %4478 = vmatmul.mubr.bf16.gmra.mxu1 %v7608_v47  ;;  %6268 = vmatprep.subr.bf16.mxu0 %v6505_v19  ;;  %6581 = vtanh.f32 %v4046_v1  ;;  %v4056_v7 = vadd.f32 %v7350_v43, %v4003_v27  ;;  %v6541_v43 = vld [vmem:[#allocation7 + $0x1f8] sm:$0xff]   ;;  %v6536_v1 = vld [vmem:[#allocation7 + $0x110] sm:$0xff]   ;;  %v6538_v49 = vld [vmem:[#allocation7 + $0x108] sm:$0xff]  }
 0x282   : > { %6295 = vmatpush3.bf16.msra.mxu1 %v6504_v23  ;;  %5136 = vmatprep.mubr.bf16.mxu1 %v4523_v55  ;;  %6583 = vtanh.f32 %v4058_v11  ;;  %v7614_v19 = vld [vmem:[#allocation16_spill] sm:$0xff]  ;;  %v6531_v55 = vld [vmem:[#allocation7 + $0x160] sm:$0xff]   ;;  %v6537_v11 = vld [vmem:[#allocation7 + $0x148] sm:$0xff]  }
 0x283   : > { %6296 = vmatprep.subr.bf16.mxu1 %v6506_v32  ;;  %6585 = vtanh.f32 %v4060_v18  ;;  %v7616_v58 = vpack.c.bf16 %v7614_v19, %v7615_v29  ;;  %v7618_v5 = vld [vmem:[#allocation17_spill] sm:$0xff] }
 0x284   : > { %6269 = vmatpush3.bf16.msra.mxu0 %v6507_v28  ;;  %6587 = vtanh.f32 %v4056_v7  ;;  %v4100_v28 = vpop.f32.mrf.mxu0  ;;  %v7619_v30 = vpack.c.bf16 %v7617_v37, %v7618_v5 }
 0x285   : > { %6270 = vmatprep.subr.bf16.mxu0 %v6509_v26  ;;  %v6532_v26 = vld [vmem:[#allocation7 + $0x120] sm:$0xff]  }
 0x286   : > { %6297 = vmatpush3.bf16.msra.mxu1 %v6508_v16  ;;  %v4153_v16 = vpop.f32.mrf.mxu1  ;;  %v4102_v10 = vpop.f32.mrf.mxu0 }
 0x287   : > { %6298 = vmatprep.subr.bf16.mxu1 %v6510_v63  ;;  %v6534_v63 = vld [vmem:[#allocation7 + $0x118] sm:$0xff]  }
 0x288   : > { %6271 = vmatpush3.bf16.msra.mxu0 %v6511_v2  ;;  %v4155_v61 = vpop.f32.mrf.mxu1  ;;  %v4104_v40 = vpop.f32.mrf.mxu0 }
 0x289   : > { %6272 = vmatprep.subr.bf16.mxu0 %v6513_v6  ;;  %v978_v6 = vsub.s32 4, %v7182_v12 }
 0x28a   : > { %6299 = vmatpush3.bf16.msra.mxu1 %v6512_v51  ;;  %v6574_v33 = vpop.eup %6573  ;;  %v4157_v52 = vpop.f32.mrf.mxu1  ;;  %v982_v51 = vsub.s32 5, %v7182_v12 }
 0x28b   : > { %6300 = vmatprep.subr.bf16.mxu1 %v6514_v25  ;;  %v6576_v60 = vpop.eup %6575  ;;  %v4108_v42 = vpop.f32.mrf.mxu0  ;;  %v6539_v25 = vld [vmem:[#allocation7 + $0x140] sm:$0xff]  }
 0x28c   : > { %6273 = vmatpush3.bf16.msra.mxu0 %v6515_v54  ;;  %v6578_v53 = vpop.eup %6577  ;;  %v4529_v3 = vpack.c.bf16 %v6576_v60, %v6574_v33  ;;  %v7405_v2 = vpop.f32.mrf.mxu1  ;;  %v983_v27 = vrot.slane %v7315_v0, %v982_v51  ;;  %v979_v54 = vrot.slane %v7315_v0, %v978_v6  ;;  %v6544_v60 = vld [vmem:[#allocation7 + $0x1b0] sm:$0xff]   ;;  %v6550_v6 = vld [vmem:[#allocation7 + $0x198] sm:$0xff]  }
 0x28d   : > { %6274 = vmatprep.subr.bf16.mxu0 %v6517_v24  ;;  %v6580_v13 = vpop.eup %6579  ;;  %v4110_v35 = vpop.f32.mrf.mxu0  ;;  %v6540_v24 = vld [vmem:[#allocation7 + $0x100] sm:$0xff]  }
 0x28e   : > { %6301 = vmatpush3.bf16.msra.mxu1 %v6516_v36  ;;  %v6582_v38 = vpop.eup %6581  ;;  %v4163_v21 = vpop.f32.mrf.mxu1  ;;  %v4099_v7 = vadd.f32 %v4098_v34, %v979_v54 }
 0x28f   : > { %6302 = vmatprep.subr.bf16.mxu1 %v6518_v45  ;;  %v6584_v22 = vpop.eup %6583  ;;  %v4522_v23 = vpack.c.bf16 %v6578_v53, %v6582_v38  ;;  %v4112_v36 = vpop.f32.mrf.mxu0  ;;  %v4101_v45 = vadd.f32 %v4100_v28, %v983_v27 }
 0x290   : > { %6275 = vmatpush3.bf16.msra.mxu0 %v6519_v14  ;;  %v4531_v57 = vpack.c.bf16 %v6580_v13, %v6584_v22  ;;  %v6586_v32 = vpop.eup %6585  ;;  %v4165_v18 = vpop.f32.mrf.mxu1 }
 0x291   : > { %6276 = vmatprep.subr.bf16.mxu0 %v6521_v39  ;;  %v6588_v9 = vpop.eup %6587  ;;  %v4114_v14 = vpop.f32.mrf.mxu0  ;;  %v4154_v33 = vadd.f32 %v4153_v16, %v4101_v45  ;;  %v6548_v16 = vld [vmem:[#allocation7 + $0x1a0] sm:$0xff]  }
 0x292   : > { %6303 = vmatpush3.bf16.msra.mxu1 %v6520_v50  ;;  %v4530_v47 = vpack.c.bf16 %v6586_v32, %v6588_v9  ;;  %v4103_v50 = vadd.f32 %v4102_v10, %v979_v54  ;;  %v4167_v39 = vpop.f32.mrf.mxu1  ;;  %v4113_v32 = vadd.f32 %v4112_v36, %v979_v54  ;;  %v4115_v37 = vadd.f32 %v4114_v14, %v983_v27  ;;  %v6552_v36 = vld [vmem:[#allocation7 + $0x190] sm:$0xff]   ;;  %v6555_v45 = vld [vmem:[#allocation7 + $0x1c0] sm:$0xff]  }
 0x293   : > { %6304 = vmatprep.subr.bf16.mxu1 %v6522_v62 }
 0x294   : > { %6277 = vmatpush3.bf16.msra.mxu0 %v6523_v8  ;;  %v6543_v8 = vld [vmem:[#allocation7 + $0x1f0] sm:$0xff]   ;;  %v4156_v13 = vadd.f32 %v4155_v61, %v4103_v50  ;;  %v4166_v10 = vadd.f32 %v4165_v18, %v4113_v32  ;;  %v6554_v18 = vld [vmem:[#allocation7 + $0x188] sm:$0xff]   ;;  %v6556_v50 = vld [vmem:[#allocation7 + $0x180] sm:$0xff]  }
 0x295   : > { %6318 = vmatprep.subr.bf16.mxu0 %v6525_v48 }
 0x296   : > { %6305 = vmatpush3.bf16.msra.mxu1 %v6524_v31  ;;  %v4105_v31 = vadd.f32 %v4104_v40, %v983_v27 }
 0x297   : > { %6346 = vmatprep.subr.bf16.mxu1 %v6541_v43  ;;  %5088 = vmatmul.mubr.bf16.vlgmr.msra.gmra.mxu0 %v7616_v58  ;;  %v4152_v43 = vadd.f32 %v4151_v4, %v4099_v7 }
 0x298   : > { %5095 = vmatprep.mubr.bf16.mxu0 %v4529_v3  ;;  %6319 = vmatpush3.bf16.msra.mxu0 %v6526_v15  ;;  %v6545_v3 = vld [vmem:[#allocation7 + $0x1e8] sm:$0xff]  }
 0x299   : > { %5137 = vmatmul.mubr.bf16.vlgmr.msra.gmra.mxu1 %v4522_v23  ;;  %6320 = vmatprep.subr.bf16.mxu0 %v6527_v41  ;;  %v4158_v41 = vadd.f32 %v4157_v52, %v4105_v31  ;;  %v6549_v52 = vld [vmem:[#allocation7 + $0x1d8] sm:$0xff]  }
 0x29a   : > { %5144 = vmatprep.mubr.bf16.mxu1 %v4531_v57  ;;  %6347 = vmatpush3.bf16.msra.mxu1 %v6542_v44  ;;  %v4111_v44 = vadd.f32 %v4110_v35, %v983_v27  ;;  %v6546_v57 = vld [vmem:[#allocation7 + $0x1a8] sm:$0xff]   ;;  %v6551_v27 = vld [vmem:[#allocation7 + $0x1d0] sm:$0xff]  }
 0x29b   : > { %6348 = vmatprep.subr.bf16.mxu1 %v6543_v8 }
 0x29c   : > { %6321 = vmatpush3.bf16.msra.mxu0 %v6528_v56  ;;  %v4109_v56 = vadd.f32 %v4108_v42, %v979_v54  ;;  %v4164_v28 = vadd.f32 %v4163_v21, %v4111_v44  ;;  %v4168_v42 = vadd.f32 %v4167_v39, %v4115_v37 }
 0x29d   : > { %6322 = vmatprep.subr.bf16.mxu0 %v6529_v17 }
 0x29e   : > { %6349 = vmatpush3.bf16.msra.mxu1 %v6544_v60 }
 0x29f   : > { %5096 = vmatmul.mubr.bf16.gmra.mxu0 %v7619_v30  ;;  %6350 = vmatprep.subr.bf16.mxu1 %v6545_v3 }
 0x2a0   : > { %6323 = vmatpush3.bf16.msra.mxu0 %v6530_v46 }
 0x2a1   : > { %5145 = vmatmul.mubr.bf16.gmra.mxu1 %v4530_v47  ;;  %6324 = vmatprep.subr.bf16.mxu0 %v6531_v55  ;;  %v6547_v55 = vld [vmem:[#allocation7 + $0x1e0] sm:$0xff]  }
 0x2a2   : > { %6351 = vmatpush3.bf16.msra.mxu1 %v6546_v57  ;;  %v990_v57 = vsub.s32 7, %v7182_v12 }
 0x2a3   : > { %6352 = vmatprep.subr.bf16.mxu1 %v6547_v55 }
 0x2a4   : > { %6325 = vmatpush3.bf16.msra.mxu0 %v6532_v26  ;;  %v4162_v26 = vadd.f32 %v7405_v2, %v4109_v56  ;;  %v986_v56 = vsub.s32 6, %v7182_v12 }
 0x2a5   : > { %6326 = vmatprep.subr.bf16.mxu0 %v6533_v20 }
 0x2a6   : > { %6353 = vmatpush3.bf16.msra.mxu1 %v6548_v16 }
 0x2a7   : > { %6354 = vmatprep.subr.bf16.mxu1 %v6549_v52 }
 0x2a8   : > { %6327 = vmatpush3.bf16.msra.mxu0 %v6534_v63 }
 0x2a9   : > { %6328 = vmatprep.subr.bf16.mxu0 %v6535_v59 }
 0x2aa   : > { %6355 = vmatpush3.bf16.msra.mxu1 %v6550_v6 }
 0x2ab   : > { %6356 = vmatprep.subr.bf16.mxu1 %v6551_v27 }
 0x2ac   : > { %6329 = vmatpush3.bf16.msra.mxu0 %v6536_v1 }
 0x2ad   : > { %6330 = vmatprep.subr.bf16.mxu0 %v6537_v11 }
 0x2ae   : > { %6357 = vmatpush3.bf16.msra.mxu1 %v6552_v36 }
 0x2b0   : > { %6331 = vmatpush3.bf16.msra.mxu0 %v6538_v49 }
 0x2b1   : > { %6332 = vmatprep.subr.bf16.mxu0 %v6539_v25 }
 0x2b4   : > { %6333 = vmatpush3.bf16.msra.mxu0 %v6540_v24  ;;  %v6553_v24 = vld [vmem:[#allocation7 + $0x1c8] sm:$0xff]  }
 0x2b5   : > { %6358 = vmatprep.subr.bf16.mxu1 %v6553_v24 }
 0x2b6   : > { %6359 = vmatpush3.bf16.msra.mxu1 %v6554_v18 }
 0x2b7   : > { %v4204_v62 = vpop.f32.mrf.mxu0  ;;  %6360 = vmatprep.subr.bf16.mxu1 %v6555_v45 }
 0x2b8   : > { %v4205_v22 = vadd.f32 %v4204_v62, %v4152_v43 }
 0x2b9   : > { %v4257_v48 = vpop.f32.mrf.mxu1  ;;  %v4206_v53 = vpop.f32.mrf.mxu0 }
 0x2ba   : > { %v4207_v38 = vadd.f32 %v4206_v53, %v4154_v33  ;;  %v4258_v46 = vadd.f32 %v4257_v48, %v4205_v22  ;;  %6361 = vmatpush3.bf16.msra.mxu1 %v6556_v50 }
 0x2bb   : > { %v4259_v15 = vpop.f32.mrf.mxu1  ;;  %v4208_v23 = vpop.f32.mrf.mxu0 }
 0x2bc   : > { %v4260_v19 = vadd.f32 %v4259_v15, %v4207_v38  ;;  %v4209_v29 = vadd.f32 %v4208_v23, %v4156_v13 }
 0x2bd   : > { %v4261_v58 = vpop.f32.mrf.mxu1  ;;  %v4210_v17 = vpop.f32.mrf.mxu0 }
 0x2be   : > { %v4262_v34 = vadd.f32 %v4261_v58, %v4209_v29  ;;  %v4211_v4 = vadd.f32 %v4210_v17, %v4158_v41  ;;  %6589 = vtanh.f32 %v4260_v19 }
 0x2bf   : > { %v4263_v9 = vpop.f32.mrf.mxu1  ;;  %v4214_v47 = vpop.f32.mrf.mxu0 }
 0x2c0   : > { %v4264_v5 = vadd.f32 %v4263_v9, %v4211_v4  ;;  %6591 = vtanh.f32 %v4262_v34  ;;  %v4215_v59 = vadd.f32 %v4214_v47, %v4162_v26  ;;  %v991_v34 = vrot.slane %v7315_v0, %v990_v57 }
 0x2c1   : > { %v4267_v30 = vpop.f32.mrf.mxu1  ;;  %v4216_v20 = vpop.f32.mrf.mxu0  ;;  %v987_v4 = vrot.slane %v7315_v0, %v986_v56 }
 0x2c2   : > { %6593 = vtanh.f32 %v4264_v5  ;;  %v4217_v61 = vadd.f32 %v4216_v20, %v4164_v28  ;;  %v4268_v25 = vadd.f32 %v4267_v30, %v4215_v59 }
 0x2c3   : > { %v4269_v63 = vpop.f32.mrf.mxu1  ;;  %6595 = vtanh.f32 %v4258_v46  ;;  %v4218_v40 = vpop.f32.mrf.mxu0 }
 0x2c4   : > { %v4219_v1 = vadd.f32 %v4218_v40, %v4166_v10  ;;  %v4270_v11 = vadd.f32 %v4269_v63, %v4217_v61 }
 0x2c5   : > { %v4271_v51 = vpop.f32.mrf.mxu1  ;;  %v4220_v35 = vpop.f32.mrf.mxu0 }
 0x2c6   : > { %v4221_v2 = vadd.f32 %v4220_v35, %v4168_v42  ;;  %v4272_v49 = vadd.f32 %v4271_v51, %v4219_v1  ;;  %6597 = vtanh.f32 %v4270_v11 }
 0x2c7   : > { %v4273_v21 = vpop.f32.mrf.mxu1 }
 0x2c8   : > { %v4274_v54 = vadd.f32 %v4273_v21, %v4221_v2  ;;  %6599 = vtanh.f32 %v4272_v49 }
 0x2ca   : > { %6601 = vtanh.f32 %v4274_v54 }
 0x2cb   : > { %6603 = vtanh.f32 %v4268_v25  ;;  %v6590_v7 = vpop.eup %6589 }
 0x2cd   : > { %v6592_v14 = vpop.eup %6591 }
 0x2cf   : > { %v6594_v39 = vpop.eup %6593 }
 0x2d0   : > { %v6596_v62 = vpop.eup %6595  ;;  %v4525_v8 = vpack.c.bf16 %v6594_v39, %v6590_v7 }
 0x2d1   : > { %v4524_v33 = vpack.c.bf16 %v6592_v14, %v6596_v62 }
 0x2d2   : > { %5185 = vmatprep.mubr.bf16.mxu0 %v4525_v8 }
 0x2d3   : > { %5186 = vmatmul.mubr.bf16.vlgmr.msra.gmra.mxu0 %v4524_v33  ;;  %v6598_v31 = vpop.eup %6597 }
 0x2d5   : > { %v6600_v48 = vpop.eup %6599 }
 0x2d7   : > { %v6602_v60 = vpop.eup %6601 }
 0x2d8   : > { %v6604_v43 = vpop.eup %6603  ;;  %v4533_v53 = vpack.c.bf16 %v6602_v60, %v6598_v31 }
 0x2d9   : > { %v4532_v13 = vpack.c.bf16 %v6600_v48, %v6604_v43 }
 0x2da   : > { %5193 = vmatprep.mubr.bf16.mxu0 %v4533_v53 }
 0x2db   : > { %5194 = vmatmul.mubr.bf16.gmra.mxu0 %v4532_v13 }
 0x2f7   : > { %v4310_v38 = vpop.f32.mrf.mxu0 }
 0x2f8   : > { %v4311_v55 = vadd.f32 %v4310_v38, %v987_v4 }
 0x2f9   : > { %v4363_v15 = vpop.f32.mrf.mxu1  ;;  %v4312_v22 = vpop.f32.mrf.mxu0 }
 0x2fa   : > { %v4313_v47 = vadd.f32 %v4312_v22, %v991_v34  ;;  %v4364_v10 = vadd.f32 %v4363_v15, %v4311_v55 }
 0x2fb   : > { %v4365_v23 = vpop.f32.mrf.mxu1  ;;  %v4314_v3 = vpop.f32.mrf.mxu0 }
 0x2fc   : > { %v4315_v37 = vadd.f32 %v4314_v3, %v987_v4  ;;  %v4366_v16 = vadd.f32 %v4365_v23, %v4313_v47 }
 0x2fd   : > { %v4367_v41 = vpop.f32.mrf.mxu1  ;;  %v4316_v44 = vpop.f32.mrf.mxu0 }
 0x2fe   : > { %v4317_v26 = vadd.f32 %v4316_v44, %v991_v34  ;;  %v4368_v12 = vadd.f32 %v4367_v41, %v4315_v37 }
 0x2ff   : > { %v4369_v19 = vpop.f32.mrf.mxu1  ;;  %v4320_v29 = vpop.f32.mrf.mxu0 }
 0x300   : > { %v4370_v42 = vadd.f32 %v4369_v19, %v4317_v26  ;;  %v4321_v6 = vadd.f32 %v4320_v29, %v987_v4 }
 0x301   : > { %v4373_v58 = vpop.f32.mrf.mxu1  ;;  %v4322_v17 = vpop.f32.mrf.mxu0 }
 0x302   : > { %v4323_v0 = vadd.f32 %v4322_v17, %v991_v34  ;;  %v4374_v7 = vadd.f32 %v4373_v58, %v4321_v6 }
 0x303   : > { %v4375_v32 = vpop.f32.mrf.mxu1  ;;  %v4324_v9 = vpop.f32.mrf.mxu0 }
 0x304   : > { %v4325_v2 = vadd.f32 %v4324_v9, %v987_v4  ;;  %v4376_v36 = vadd.f32 %v4375_v32, %v4323_v0  ;;  %v6194_v0 = vld [vmem:[#allocation9] ss:$0 sm:$0xff] }
 0x305   : > { %v4377_v46 = vpop.f32.mrf.mxu1  ;;  %v4326_v28 = vpop.f32.mrf.mxu0 }
 0x306   : > { %v4327_v24 = vadd.f32 %v4326_v28, %v991_v34  ;;  %v4378_v50 = vadd.f32 %v4377_v46, %v4325_v2 }
 0x307   : > { %v4379_v5 = vpop.f32.mrf.mxu1 }
 0x308   : > { %v4380_v31 = vadd.f32 %v4379_v5, %v4327_v24 }
 0x337   : > { %v4416_v30 = vpop.f32.mrf.mxu0 }
 0x338   : > { %v4417_v40 = vadd.f32 %v4416_v30, %v4364_v10 }
 0x339   : > { %v4469_v20 = vpop.f32.mrf.mxu1  ;;  %v4418_v61 = vpop.f32.mrf.mxu0 }
 0x33a   : > { %v4419_v63 = vadd.f32 %v4418_v61, %v4366_v16  ;;  %v4470_v27 = vadd.f32 %v4469_v20, %v4417_v40 }
 0x33b   : > { %v4471_v59 = vpop.f32.mrf.mxu1  ;;  %v4420_v52 = vpop.f32.mrf.mxu0 }
 0x33c   : > { %v4472_v1 = vadd.f32 %v4471_v59, %v4419_v63  ;;  %v4421_v11 = vadd.f32 %v4420_v52, %v4368_v12 }
 0x33d   : > { %v4473_v51 = vpop.f32.mrf.mxu1  ;;  %v4422_v35 = vpop.f32.mrf.mxu0 }
 0x33e   : > { %v4474_v49 = vadd.f32 %v4473_v51, %v4421_v11  ;;  %v4423_v21 = vadd.f32 %v4422_v35, %v4370_v42  ;;  %6605 = vtanh.f32 %v4472_v1 }
 0x33f   : > { %v4475_v25 = vpop.f32.mrf.mxu1  ;;  %v4426_v54 = vpop.f32.mrf.mxu0 }
 0x340   : > { %v4476_v18 = vadd.f32 %v4475_v25, %v4423_v21  ;;  %6607 = vtanh.f32 %v4474_v49  ;;  %v4427_v8 = vadd.f32 %v4426_v54, %v4374_v7 }
 0x341   : > { %v4479_v45 = vpop.f32.mrf.mxu1  ;;  %v4428_v14 = vpop.f32.mrf.mxu0 }
 0x342   : > { %6609 = vtanh.f32 %v4476_v18  ;;  %v4429_v39 = vadd.f32 %v4428_v14, %v4376_v36  ;;  %v4480_v15 = vadd.f32 %v4479_v45, %v4427_v8 }
 0x343   : > { %v4481_v62 = vpop.f32.mrf.mxu1  ;;  %6611 = vtanh.f32 %v4470_v27  ;;  %v4430_v33 = vpop.f32.mrf.mxu0 }
 0x344   : > { %v4482_v48 = vadd.f32 %v4481_v62, %v4429_v39  ;;  %v4431_v60 = vadd.f32 %v4430_v33, %v4378_v50 }
 0x345   : > { %v4483_v43 = vpop.f32.mrf.mxu1  ;;  %v4432_v53 = vpop.f32.mrf.mxu0 }
 0x346   : > { %v4484_v13 = vadd.f32 %v4483_v43, %v4431_v60  ;;  %v4433_v38 = vadd.f32 %v4432_v53, %v4380_v31  ;;  %6613 = vtanh.f32 %v4482_v48 }
 0x347   : > { %v4485_v22 = vpop.f32.mrf.mxu1 }
 0x348   : > { %v4486_v23 = vadd.f32 %v4485_v22, %v4433_v38  ;;  %6615 = vtanh.f32 %v4484_v13 }
 0x34a   : > { %6617 = vtanh.f32 %v4486_v23 }
 0x34b   : > { %6619 = vtanh.f32 %v4480_v15  ;;  %v6606_v3 = vpop.eup %6605 }
 0x34d   : > { %v6608_v41 = vpop.eup %6607 }
 0x34f   : > { %v6610_v44 = vpop.eup %6609 }
 0x350   : > { %v6612_v19 = vpop.eup %6611  ;;  %v4527_v29 = vpack.c.bf16 %v6610_v44, %v6606_v3 }
 0x351   : > { %v4526_v58 = vpack.c.bf16 %v6608_v41, %v6612_v19 }
 0x352   : > { %5234 = vmatprep.mubr.bf16.mxu1 %v4527_v29 }
 0x353   : > { %5235 = vmatmul.mubr.bf16.vlgmr.msra.gmra.mxu1 %v4526_v58  ;;  %v6614_v57 = vpop.eup %6613 }
 0x355   : > { %v6616_v56 = vpop.eup %6615 }
 0x357   : > { %v6618_v17 = vpop.eup %6617  ;;  %v6278_v9 = vpop.f32.mrf.mxu0 }
 0x358   : > { %v6620_v32 = vpop.eup %6619  ;;  %v4535_v34 = vpack.c.bf16 %v6618_v17, %v6614_v57 }
 0x359   : > { %v4534_v4 = vpack.c.bf16 %v6616_v56, %v6620_v32  ;;  %v6279_v46 = vpop.f32.mrf.mxu0  ;;  %v6306_v37 = vpop.f32.mrf.mxu1 }
 0x35a   : > { %5242 = vmatprep.mubr.bf16.mxu1 %v4535_v34  ;;  %v6280_v42 = vadd.f32 %v6279_v46, %v6278_v9 }
 0x35b   : > { %5243 = vmatmul.mubr.bf16.gmra.mxu1 %v4534_v4  ;;  %v6281_v47 = vpop.f32.mrf.mxu0  ;;  %v6307_v30 = vpop.f32.mrf.mxu1 }
 0x35c   : > { %v5090_v51 = vadd.f32 %v6280_v42, %v6194_v0  ;;  %v6308_v2 = vadd.f32 %v6307_v30, %v6306_v37 }
 0x35d   : > { %v6282_v55 = vpop.f32.mrf.mxu0  ;;  %v6309_v26 = vpop.f32.mrf.mxu1 }
 0x35e   : > { %v6283_v6 = vadd.f32 %v6282_v55, %v6281_v47  ;;  %v5139_v27 = vadd.f32 %v6308_v2, %v5090_v51 }
 0x35f   : > { %v6284_v28 = vpop.f32.mrf.mxu0  ;;  %v6310_v61 = vpop.f32.mrf.mxu1 }
 0x360   : > { %v5093_v54 = vadd.f32 %v6283_v6, %v6194_v0  ;;  %v6311_v18 = vadd.f32 %v6310_v61, %v6309_v26 }
 0x361   : > { %v6285_v5 = vpop.f32.mrf.mxu0  ;;  %v6312_v63 = vpop.f32.mrf.mxu1 }
 0x362   : > { %v6286_v36 = vadd.f32 %v6285_v5, %v6284_v28  ;;  %v5142_v62 = vadd.f32 %v6311_v18, %v5093_v54 }
 0x363   : > { %v6287_v16 = vpop.f32.mrf.mxu0  ;;  %v6313_v40 = vpop.f32.mrf.mxu1 }
 0x364   : > { %v5098_v8 = vadd.f32 %v6286_v36, %v6194_v0  ;;  %v6314_v48 = vadd.f32 %v6313_v40, %v6312_v63 }
 0x365   : > { %v6288_v20 = vpop.f32.mrf.mxu0  ;;  %v6315_v1 = vpop.f32.mrf.mxu1 }
 0x366   : > { %v6289_v33 = vadd.f32 %v6288_v20, %v6287_v16  ;;  %v5147_v23 = vadd.f32 %v6314_v48, %v5098_v8 }
 0x367   : > { %v6316_v35 = vpop.f32.mrf.mxu1 }
 0x368   : > { %v5101_v3 = vadd.f32 %v6289_v33, %v6194_v0  ;;  %v6317_v44 = vadd.f32 %v6316_v35, %v6315_v1 }
 0x36a   : > { %v5150_v32 = vadd.f32 %v6317_v44, %v5101_v3 }
 0x393   : > { %v6334_v10 = vpop.f32.mrf.mxu0 }
 0x395   : > { %v6335_v12 = vpop.f32.mrf.mxu0 }
 0x396   : > { %v6336_v49 = vadd.f32 %v6335_v12, %v6334_v10 }
 0x397   : > { %v6337_v59 = vpop.f32.mrf.mxu0 }
 0x398   : > { %v5188_v45 = vadd.f32 %v6336_v49, %v5139_v27 }
 0x399   : > { %v6338_v52 = vpop.f32.mrf.mxu0 }
 0x39a   : > { %v6339_v7 = vadd.f32 %v6338_v52, %v6337_v59 }
 0x39b   : > { %v6340_v11 = vpop.f32.mrf.mxu0 }
 0x39c   : > { %v5191_v43 = vadd.f32 %v6339_v7, %v5142_v62 }
 0x39d   : > { %v6341_v21 = vpop.f32.mrf.mxu0 }
 0x39e   : > { %v6342_v53 = vadd.f32 %v6341_v21, %v6340_v11 }
 0x39f   : > { %v6343_v50 = vpop.f32.mrf.mxu0 }
 0x3a0   : > { %v5196_v29 = vadd.f32 %v6342_v53, %v5147_v23 }
 0x3a1   : > { %v6344_v15 = vpop.f32.mrf.mxu0 }
 0x3a2   : > { %v6345_v58 = vadd.f32 %v6344_v15, %v6343_v50 }
 0x3a4   : > { %v5199_v9 = vadd.f32 %v6345_v58, %v5150_v32 }
 0x413   : > { %v6362_v25 = vpop.f32.mrf.mxu1 }
 0x415   : > { %v6363_v24 = vpop.f32.mrf.mxu1 }
 0x416   : > { %v6364_v14 = vadd.f32 %v6363_v24, %v6362_v25 }
 0x417   : > { %v6365_v39 = vpop.f32.mrf.mxu1 }
 0x418   : > { %v7416_v31 = vadd.f32 %v6364_v14, %v5188_v45 }
 0x419   : > { %v6366_v60 = vpop.f32.mrf.mxu1 }
 0x41a   : > { %v6367_v13 = vadd.f32 %v6366_v60, %v6365_v39  ;;  %v5301_v38 = vsel %vm5300_vm0, %v7416_v31, -inf  ;;  %v5252_v55 = vsel %vm5251_vm1, %v7416_v31, -inf }
 0x41b   : > { %v6368_v22 = vpop.f32.mrf.mxu1  ;;  %5302 = vmax.xlane.f32.xlu0 %v5301_v38 }
 0x41c   : > { %v7420_v41 = vadd.f32 %v6367_v13, %v5191_v43 }
 0x41d   : > { %v6369_v19 = vpop.f32.mrf.mxu1 }
 0x41e   : > { %v6370_v57 = vadd.f32 %v6369_v19, %v6368_v22  ;;  %v5304_v56 = vsel %vm5300_vm0, %v7420_v41, -inf  ;;  %v5255_v30 = vsel %vm5251_vm1, %v7420_v41, -inf }
 0x41f   : > { %v6371_v17 = vpop.f32.mrf.mxu1  ;;  %5305 = vmax.xlane.f32.xlu0 %v5304_v56 }
 0x420   : > { %v7424_v34 = vadd.f32 %v6370_v57, %v5196_v29 }
 0x421   : > { %v6372_v4 = vpop.f32.mrf.mxu1 }
 0x422   : > { %v6373_v46 = vadd.f32 %v6372_v4, %v6371_v17  ;;  %v5307_v47 = vsel %vm5300_vm0, %v7424_v34, -inf  ;;  %v5258_v5 = vsel %vm5251_vm1, %v7424_v34, -inf }
 0x423   : > { %5308 = vmax.xlane.f32.xlu1 %v5307_v47  ;;  %5253 = vmax.xlane.f32.xlu0 %v5252_v55 }
 0x424   : > { %v7430_v28 = vadd.f32 %v6373_v46, %v5199_v9 }
 0x426   : > { %v5310_v37 = vsel %vm5300_vm0, %v7430_v28, -inf  ;;  %v5261_v16 = vsel %vm5251_vm1, %v7430_v28, -inf }
 0x427   : > { %5311 = vmax.xlane.f32.xlu1 %v5310_v37  ;;  %5259 = vmax.xlane.f32.xlu0 %v5258_v5 }
 0x42b   : > { %5256 = vmax.xlane.f32.xlu1 %v5255_v30 }
 0x42f   : > { %5262 = vmax.xlane.f32.xlu1 %v5261_v16 }
 0x4a4   : > { %v5303_v26 = vpop.xlane.xlu0 %5302 }
 0x4a5   : > { %v5313_v20 = vsub.f32 %v7416_v31, %v5303_v26 }
 0x4a7   : > { %v5317_v10 = vmul.f32 1.442695, %v5313_v20 }
 0x4a8   : > { %v5306_v61 = vpop.xlane.xlu0 %5305 }
 0x4a9   : > { %6621 = vpow2.f32 %v5317_v10  ;;  %v5314_v12 = vsub.f32 %v7420_v41, %v5306_v61 }
 0x4ab   : > { %v5319_v63 = vmul.f32 1.442695, %v5314_v12 }
 0x4ac   : > { %v5309_v59 = vpop.xlane.xlu1 %5308  ;;  %v5254_v51 = vpop.xlane.xlu0 %5253 }
 0x4ad   : > { %6623 = vpow2.f32 %v5319_v63  ;;  %v5315_v40 = vsub.f32 %v7424_v34, %v5309_v59  ;;  %v5264_v35 = vsub.f32 %v7416_v31, %v5254_v51 }
 0x4af   : > { %v5321_v52 = vmul.f32 1.442695, %v5315_v40  ;;  %v5268_v21 = vmul.f32 1.442695, %v5264_v35 }
 0x4b0   : > { %v5312_v42 = vpop.xlane.xlu1 %5311  ;;  %v5260_v49 = vpop.xlane.xlu0 %5259 }
 0x4b1   : > { %6625 = vpow2.f32 %v5321_v52  ;;  %v5316_v0 = vsub.f32 %v7430_v28, %v5312_v42  ;;  %v5266_v25 = vsub.f32 %v7424_v34, %v5260_v49 }
 0x4b3   : > { %v5323_v1 = vmul.f32 1.442695, %v5316_v0  ;;  %v5272_v54 = vmul.f32 1.442695, %v5266_v25 }
 0x4b4   : > { %v5257_v36 = vpop.xlane.xlu1 %5256 }
 0x4b5   : > { %6627 = vpow2.f32 %v5323_v1  ;;  %v5265_v24 = vsub.f32 %v7420_v41, %v5257_v36 }
 0x4b6   : > { %v7444_v11 = vpop.eup %6621  ;;  %6629 = vpow2.f32 %v5268_v21 }
 0x4b7   : > { %5329 = vrot.lane.b32.xlu0 %v7444_v11, %s6871_s2  ;;  %6631 = vpow2.f32 %v5272_v54  ;;  %v5270_v45 = vmul.f32 1.442695, %v5265_v24 }
 0x4b8   : > { %v5263_v8 = vpop.xlane.xlu1 %5262 }
 0x4b9   : > { %6633 = vpow2.f32 %v5270_v45  ;;  %v5267_v33 = vsub.f32 %v7430_v28, %v5263_v8 }
 0x4ba   : > { %v7447_v6 = vpop.eup %6623 }
 0x4bb   : > { %5331 = vrot.lane.b32.xlu1 %v7447_v6, %s6871_s2  ;;  %v5274_v48 = vmul.f32 1.442695, %v5267_v33 }
 0x4bd   : > { %6635 = vpow2.f32 %v5274_v48 }
 0x4be   : > { %v7451_v2 = vpop.eup %6625 }
 0x4bf   : > { %5333 = vrot.lane.b32.xlu1 %v7451_v2, %s6871_s2 }
 0x4c2   : > { %v7455_v27 = vpop.eup %6627 }
 0x4c3   : > { %5335 = vrot.lane.b32.xlu1 %v7455_v27, %s6871_s2  ;;  %v6630_v18 = vpop.eup %6629 }
 0x4c4   : > { %v5276_v7 = vsel %vm5251_vm1, %v6630_v18, 0.0  ;;  %v7460_v14 = vpop.eup %6631 }
 0x4c5   : > { %v5282_v50 = vsel %vm5251_vm1, %v7460_v14, 0.0 }
 0x4c6   : > { %v7464_v39 = vpop.eup %6633 }
 0x4c7   : > { %v5279_v62 = vsel %vm5251_vm1, %v7464_v39, 0.0 }
 0x4ca   : > { %v6636_v60 = vpop.eup %6635 }
 0x4cb   : > { %v5285_v43 = vsel %vm5251_vm1, %v6636_v60, 0.0 }
 0x4d6   : > { %5277 = vadd.xlane.f32.xlu0 %v5276_v7 }
 0x4da   : > { %5283 = vadd.xlane.f32.xlu0 %v5282_v50 }
 0x4e7   : > { %5280 = vadd.xlane.f32.xlu1 %v5279_v62 }
 0x4f0   : > { %5369 = vrot.lane.b32.xlu0 %v7416_v31, %s6872_s5 }
 0x4f4   : > { %5386 = vrot.lane.b32.xlu0 %v7416_v31, %s6873_s7 }
 0x4f8   : > { %5371 = vrot.lane.b32.xlu1 %v7420_v41, %s6872_s5 }
 0x4fc   : > { %5373 = vrot.lane.b32.xlu1 %v7424_v34, %s6872_s5 }
 0x500   : > { %5375 = vrot.lane.b32.xlu1 %v7430_v28, %s6872_s5 }
 0x504   : > { %5388 = vrot.lane.b32.xlu1 %v7420_v41, %s6873_s7 }
 0x513   : > { %5286 = vadd.xlane.f32.xlu0 %v5285_v43 }
 0x529   : > { %v5330_v31 = vpop.permute.xlu0 %5329 }
 0x52a   : > { %v5341_v53 = vsel %vm5251_vm1, %v5330_v31, 0.0 }
 0x52b   : > { %5342 = vadd.xlane.f32.xlu0 %v5341_v53 }
 0x52d   : > { %v5332_v13 = vpop.permute.xlu1 %5331 }
 0x52e   : > { %v5344_v38 = vsel %vm5251_vm1, %v5332_v13, 0.0 }
 0x52f   : > { %5345 = vadd.xlane.f32.xlu1 %v5344_v38 }
 0x531   : > { %v5334_v15 = vpop.permute.xlu1 %5333 }
 0x532   : > { %v5347_v22 = vsel %vm5251_vm1, %v5334_v15, 0.0 }
 0x533   : > { %5348 = vadd.xlane.f32.xlu0 %v5347_v22 }
 0x535   : > { %v5336_v23 = vpop.permute.xlu1 %5335 }
 0x536   : > { %v5350_v3 = vsel %vm5251_vm1, %v5336_v23, 0.0 }
 0x537   : > { %5351 = vadd.xlane.f32.xlu1 %v5350_v3 }
 0x548   : > { %5392 = vrot.lane.b32.xlu1 %v7430_v28, %s6873_s7 }
 0x549   : > { %5390 = vrot.lane.b32.xlu0 %v7424_v34, %s6873_s7 }
 0x55f   : > { %v5278_v41 = vpop.xlane.xlu0 %5277 }
 0x560   : > { %6637 = vrcp.f32 %v5278_v41 }
 0x563   : > { %v5284_v44 = vpop.xlane.xlu0 %5283 }
 0x564   : > { %6639 = vrcp.f32 %v5284_v44 }
 0x567   : > { %v5370_v19 = vpop.permute.xlu0 %5369 }
 0x568   : > { %5382 = vst.msk [vmem:[%s417_s15] sm:$0xff] %vm5381_vm2, %v5370_v19 }
 0x56b   : > { %v5387_v29 = vpop.permute.xlu0 %5386 }
 0x56c   : > { %5398 = vst.msk [vmem:[%s7492_s18] sm:$0xff] %vm5381_vm2, %v5387_v29 }
 0x56d   : > { %v6638_v58 = vpop.eup %6637 }
 0x56e   : > { %v5292_v57 = vmul.f32 %v6638_v58, %v6630_v18 }
 0x570   : > { %5296 = vst.msk [vmem:[%s7499_s16] sm:$0xff] %vm5251_vm1, %v5292_v57  ;;  %v5281_v56 = vpop.xlane.xlu1 %5280 }
 0x571   : > { %v6640_v17 = vpop.eup %6639  ;;  %6641 = vrcp.f32 %v5281_v56 }
 0x572   : > { %v5294_v32 = vmul.f32 %v6640_v17, %v7460_v14 }
 0x574   : > { %5298 = vst.msk [vmem:[%s7499_s16 + $0x10] sm:$0xff] %vm5251_vm1, %v5294_v32  ;;  %v5372_v34 = vpop.permute.xlu1 %5371 }
 0x575   : > { %5383 = vst.msk [vmem:[%s417_s15 + $0x8] sm:$0xff] %vm5381_vm2, %v5372_v34 }
 0x578   : > { %v5374_v4 = vpop.permute.xlu1 %5373 }
 0x579   : > { %5384 = vst.msk [vmem:[%s417_s15 + $0x10] sm:$0xff] %vm5381_vm2, %v5374_v4 }
 0x57c   : > { %v5376_v9 = vpop.permute.xlu1 %5375 }
 0x57d   : > { %5385 = vst.msk [vmem:[%s417_s15 + $0x18] sm:$0xff] %vm5381_vm2, %v5376_v9 }
 0x57e   : > { %v6642_v46 = vpop.eup %6641 }
 0x57f   : > { %v5293_v47 = vmul.f32 %v6642_v46, %v7464_v39 }
 0x580   : > { %v5389_v55 = vpop.permute.xlu1 %5388 }
 0x581   : > { %5297 = vst.msk [vmem:[%s7499_s16 + $0x8] sm:$0xff] %vm5251_vm1, %v5293_v47 }
 0x582   : > { %5399 = vst.msk [vmem:[%s7492_s18 + $0x8] sm:$0xff] %vm5381_vm2, %v5389_v55 }
 0x59c   : > { %v5287_v28 = vpop.xlane.xlu0 %5286 }
 0x59d   : > { %6643 = vrcp.f32 %v5287_v28 }
 0x5aa   : > { %v6644_v37 = vpop.eup %6643 }
 0x5ab   : > { %v5295_v5 = vmul.f32 %v6644_v37, %v6636_v60 }
 0x5ad   : > { %5299 = vst.msk [vmem:[%s7499_s16 + $0x18] sm:$0xff] %vm5251_vm1, %v5295_v5 }
 0x5b4   : > { %v5343_v30 = vpop.xlane.xlu0 %5342 }
 0x5b5   : > { %6645 = vrcp.f32 %v5343_v30 }
 0x5b8   : > { %v5346_v16 = vpop.xlane.xlu1 %5345 }
 0x5b9   : > { %6647 = vrcp.f32 %v5346_v16 }
 0x5bc   : > { %v5349_v26 = vpop.xlane.xlu0 %5348 }
 0x5bd   : > { %6649 = vrcp.f32 %v5349_v26 }
 0x5c0   : > { %v5352_v20 = vpop.xlane.xlu1 %5351  ;;  %v5391_v10 = vpop.permute.xlu0 %5390 }
 0x5c1   : > { %6651 = vrcp.f32 %v5352_v20  ;;  %5400 = vst.msk [vmem:[%s7492_s18 + $0x10] sm:$0xff] %vm5381_vm2, %v5391_v10 }
 0x5c2   : > { %v6646_v61 = vpop.eup %6645 }
 0x5c3   : > { %v5357_v12 = vmul.f32 %v6646_v61, %v7444_v11 }
 0x5c4   : > { %v5393_v63 = vpop.permute.xlu1 %5392 }
 0x5c5   : > { %5361 = vst.msk [vmem:[%s7499_s16] sm:$0xff] %vm5300_vm0, %v5357_v12 }
 0x5c6   : > { %5401 = vst.msk [vmem:[%s7492_s18 + $0x18] sm:$0xff] %vm5381_vm2, %v5393_v63  ;;  %v6648_v59 = vpop.eup %6647 }
 0x5c7   : > { %v5358_v40 = vmul.f32 %v6648_v59, %v7447_v6 }
 0x5c9   : > { %5362 = vst.msk [vmem:[%s7499_s16 + $0x8] sm:$0xff] %vm5300_vm0, %v5358_v40 }
 0x5ca   : > { %v6650_v52 = vpop.eup %6649 }
 0x5cb   : > { %v5359_v42 = vmul.f32 %v6650_v52, %v7451_v2 }
 0x5cd   : > { %5363 = vst.msk [vmem:[%s7499_s16 + $0x10] sm:$0xff] %vm5300_vm0, %v5359_v42 }
 0x5ce   : > { %v6652_v0 = vpop.eup %6651 }
 0x5cf   : > { %v5360_v1 = vmul.f32 %v6652_v0, %v7455_v27 }
 0x5d1   : > { %5364 = vst.msk [vmem:[%s7499_s16 + $0x18] sm:$0xff] %vm5300_vm0, %v5360_v1 }
 0x5d2 PF: > { %s23_s8 = sadd.s32 1, %s6860_s8   ;;  %s7622_s21 = sld [smem:[#allocation13_spill]] }
 0x5d3   : > { %p20_p10 = scmp.ge.s32.totalorder %s23_s8, 6   ;;  %s7623_s24 = smov %s6836_s25 }
 0x5d4   : > { %s7624_s25 = smov %s6840_s26  ;;  %s7625_s26 = smov %s7039_s3 }
 0x5d5   : > { %s7626_s27 = smov %s6852_s29  ;;  %s7627_s28 = smov %s6856_s30 }
 0x5d6   : > { %s7629_s30 = smov %s7635_s14  ;;  %22 = sbr.rel (!%p20_p10) target bundleno = 14 (0xe), region = 120 }
 0x5d8   : > { %s7628_s29 = smov %s7622_s21 }
 0x5db   :  { %5482 = vsyncpa [#allocation3], 1 }
 0x5dc   :  { %5484 = vsyncpa [#allocation3 + $0x1], 1 }
 0x5dd   :  { %5485 = vsyncpa [#allocation5], 1 }
 0x5de   :  { %5486 = vsyncpa [#allocation8], 1 }

</bundles_post_ra>
